<compile_context>
chip_gen: v5e
topology: v5e:2x2
jax: 0.10.0
libtpu: 0.0.40
codegen_flags: <defaults>
</compile_context>

<pallas_src>
import jax
import jax.numpy as jnp
from jax.experimental import pallas as pl
from jax.experimental.pallas import tpu as pltpu


# Fixed geometry implied by the module (the fc layers require 28x28 inputs).
_HIN = 28
_C1, _C2, _C3 = 32, 64, 128
_H1, _H2, _H3 = 14, 7, 4          # spatial size after each stride-2 conv
_K1 = 16                          # conv1 im2col K: 9 taps zero-padded to 16
_NZ = 2                           # latent dim per head (mu / logvar)
_NFC = 128                        # fused fc output N padded to a full lane width


# ----------------------------------------------------------------------------
# In-kernel helpers (values only: leading-dim reshapes, static slices, concats)
# ----------------------------------------------------------------------------
def _zero_pad_hw(x, lo, hi):
    """Zero-pad the two leading (spatial) dims of an (H, W, B, C) value."""
    h, w, b, c = x.shape
    x = jnp.concatenate([jnp.zeros((lo, w, b, c), x.dtype), x,
                         jnp.zeros((hi, w, b, c), x.dtype)], axis=0)
    hp = h + lo + hi
    x = jnp.concatenate([jnp.zeros((hp, lo, b, c), x.dtype), x,
                         jnp.zeros((hp, hi, b, c), x.dtype)], axis=1)
    return x


def _im2col_s2(xpad, n_out):
    """3x3 / stride-2 im2col of a zero-padded (Hp, Wp, B, C) activation.

    Stride-2 row/column selection is done via parity-split reshapes of the
    LEADING dims + static slices (no strided loads, no gathers).  Returns
    (n_out, n_out, B, 9*C) with K ordered (ky, kx, cin), matching the
    host-prepared weight layout.  Requires Hp, Wp even.
    """
    hp, wp, b, c = xpad.shape
    taps = []
    for ky in range(3):
        rows = xpad.reshape(hp // 2, 2, wp, b, c)[ky // 2:ky // 2 + n_out, ky % 2]
        rows = rows.reshape(n_out, wp // 2, 2, b, c)
        for kx in range(3):
            taps.append(rows[:, kx // 2:kx // 2 + n_out, kx % 2])
    return jnp.concatenate(taps, axis=-1)


# ----------------------------------------------------------------------------
# Fused encoder kernel (single invocation, no grid; 4 GEMMs total)
# ----------------------------------------------------------------------------
def _encoder_kernel(cols1_ref, w1_ref, b1_ref, w2_ref, b2_ref,
                    w3_ref, b3_ref, wfc_ref, bfc_ref, z_ref):
    bp = z_ref.shape[0]                                         # padded batch (mult. of 8)

    # ---- conv1 + ReLU: one GEMM over all (oh, ow, b) rows --------------------
    y1 = jnp.dot(cols1_ref[...], w1_ref[...],
                 preferred_element_type=jnp.float32)            # (196*bp, 32)
    y1 = jnp.maximum(y1 + b1_ref[...], 0.0)
    y1 = y1.reshape(_H1, _H1, bp, _C1)                          # (14, 14, bp, 32)
    y1 = _zero_pad_hw(y1, 1, 1)                                 # (16, 16, bp, 32)

    # ---- conv2 + ReLU: 9 taps folded into K, one GEMM ------------------------
    cols2 = _im2col_s2(y1, _H2)                                 # (7, 7, bp, 288)
    cols2 = cols2.reshape(_H2 * _H2 * bp, 9 * _C1).astype(jnp.bfloat16)
    y2 = jnp.dot(cols2, w2_ref[...], preferred_element_type=jnp.float32)
    y2 = jnp.maximum(y2 + b2_ref[...], 0.0)
    y2 = y2.reshape(_H2, _H2, bp, _C2)                          # (7, 7, bp, 64)
    # pad to 10x10 (1 before, 2 after) so the parity reshape is even; the extra
    # trailing pad row/col is never read.
    y2 = _zero_pad_hw(y2, 1, 2)                                 # (10, 10, bp, 64)

    # ---- conv3 + ReLU ---------------------------------------------------------
    cols3 = _im2col_s2(y2, _H3)                                 # (4, 4, bp, 576)
    cols3 = cols3.reshape(_H3 * _H3 * bp, 9 * _C2).astype(jnp.bfloat16)
    y3 = jnp.dot(cols3, w3_ref[...], preferred_element_type=jnp.float32)
    y3 = jnp.maximum(y3 + b3_ref[...], 0.0)                     # (16*bp, 128)

    # ---- fused fc_mu | fc_logvar: flatten (h, w, c) into lanes, one GEMM ------
    y3 = y3.reshape(_H3 * _H3, bp, _C3)                         # rows were (h, w, b)
    xfc = jnp.concatenate([y3[hw] for hw in range(_H3 * _H3)],
                          axis=-1).astype(jnp.bfloat16)         # (bp, 2048)
    z = jnp.dot(xfc, wfc_ref[...], preferred_element_type=jnp.float32)
    z_ref[...] = z + bfc_ref[...]                               # (bp, 128) lane-dense


# ----------------------------------------------------------------------------
# Host-side glue (layout prep only; all hot math is in the kernel above)
# ----------------------------------------------------------------------------
def _conv1_im2col(x):
    """(Bp, 1, 28, 28) f32 -> (14*14*Bp, 16) bf16 patches.

    Rows ordered (oh, ow, b); K ordered (kh, kw), zero-padded 9 -> 16."""
    bp = x.shape[0]
    xpad = jnp.pad(x[:, 0], ((0, 0), (1, 1), (1, 1)))           # (Bp, 30, 30)
    taps = [xpad[:, kh:kh + 2 * _H1:2, kw:kw + 2 * _H1:2]
            for kh in range(3) for kw in range(3)]              # 9 x (Bp, 14, 14)
    cols = jnp.stack(taps, axis=-1)                             # (Bp, 14, 14, 9)
    cols = jnp.pad(cols, ((0, 0), (0, 0), (0, 0), (0, _K1 - 9)))
    cols = cols.transpose(1, 2, 0, 3).reshape(_H1 * _H1 * bp, _K1)
    return cols.astype(jnp.bfloat16)


def _prep_weights(params):
    """PyTorch-layout params -> bf16 MXU operands with kernel-matching K order."""
    w1 = params["conv1_w"].reshape(_C1, 9).T                               # (9, 32)
    w1 = jnp.pad(w1, ((0, _K1 - 9), (0, 0))).astype(jnp.bfloat16)          # (16, 32)
    w2 = params["conv2_w"].transpose(2, 3, 1, 0).reshape(9 * _C1, _C2).astype(jnp.bfloat16)
    w3 = params["conv3_w"].transpose(2, 3, 1, 0).reshape(9 * _C2, _C3).astype(jnp.bfloat16)
    b1 = params["conv1_b"].reshape(1, _C1).astype(jnp.float32)
    b2 = params["conv2_b"].reshape(1, _C2).astype(jnp.float32)
    b3 = params["conv3_b"].reshape(1, _C3).astype(jnp.float32)
    # Fuse fc_mu / fc_logvar along N, reorder K from PyTorch's (c, h, w) flatten
    # order to the kernel's (h, w, c) order, and pad N from 4 to 128 lanes.
    wfc = jnp.concatenate([params["fc_mu_w"], params["fc_logvar_w"]], axis=1)  # (2048, 4)
    wfc = wfc.reshape(_C3, _H3, _H3, 2 * _NZ).transpose(1, 2, 0, 3)
    wfc = wfc.reshape(_C3 * _H3 * _H3, 2 * _NZ)
    wfc = jnp.pad(wfc, ((0, 0), (0, _NFC - 2 * _NZ))).astype(jnp.bfloat16)     # (2048, 128)
    bfc = jnp.concatenate([params["fc_mu_b"], params["fc_logvar_b"]])
    bfc = jnp.pad(bfc, (0, _NFC - 2 * _NZ)).reshape(1, _NFC).astype(jnp.float32)
    return w1, b1, w2, b2, w3, b3, wfc, bfc


def encoder_forward(params, x):
    """x: (B, 1, 28, 28) float32 -> (z_mean, z_log_var), each (B, 2)."""
    B, C, H, W = x.shape
    assert C == 1 and H == _HIN and W == _HIN, "Encoder expects (B, 1, 28, 28)"
    bp = max(8, ((B + 7) // 8) * 8)                 # batch padded to sublane tile
    xb = jnp.pad(x, ((0, bp - B), (0, 0), (0, 0), (0, 0)))

    cols1 = _conv1_im2col(xb)
    w1, b1, w2, b2, w3, b3, wfc, bfc = _prep_weights(params)

    vmem = lambda: pl.BlockSpec(memory_space=pltpu.VMEM)
    z = pl.pallas_call(
        _encoder_kernel,
        out_shape=jax.ShapeDtypeStruct((bp, _NFC), jnp.float32),
        in_specs=[vmem() for _ in range(9)],
        out_specs=vmem(),
    )(cols1, w1, b1, w2, b2, w3, b3, wfc, bfc)

    return z[:B, :_NZ], z[:B, _NZ:2 * _NZ]


# ----------------------------------------------------------------------------
# Pure-JAX reference (same math, no Pallas) used as a sanity check
# ----------------------------------------------------------------------------
def _reference_forward(params, x):
    dn = ("NCHW", "OIHW", "NCHW")
    y = x
    for wname, bname in (("conv1_w", "conv1_b"), ("conv2_w", "conv2_b"),
                         ("conv3_w", "conv3_b")):
        y = jax.lax.conv_general_dilated(y, params[wname], window_strides=(2, 2),
                                         padding=((1, 1), (1, 1)),
                                         dimension_numbers=dn)
        y = jax.nn.relu(y + params[bname].reshape(1, -1, 1, 1))
    yf = y.reshape(y.shape[0], -1)                              # (B, 2048), (c,h,w) order
    z_mean = yf @ params["fc_mu_w"] + params["fc_mu_b"]
    z_log_var = yf @ params["fc_logvar_w"] + params["fc_logvar_b"]
    return z_mean, z_log_var


# ----------------------------------------------------------------------------
# Deterministic parameter initialization (synthetic, PyTorch-shaped)
# ----------------------------------------------------------------------------
def init_params(key):
    def uniform(k, shape, bound):
        return jax.random.uniform(k, shape, jnp.float32, -bound, bound)

    keys = jax.random.split(key, 10)
    params = {}
    params["conv1_w"] = uniform(keys[0], (32, 1, 3, 3), (1 * 9) ** -0.5)
    params["conv1_b"] = uniform(keys[1], (32,), (1 * 9) ** -0.5)
    params["conv2_w"] = uniform(keys[2], (64, 32, 3, 3), (32 * 9) ** -0.5)
    params["conv2_b"] = uniform(keys[3], (64,), (32 * 9) ** -0.5)
    params["conv3_w"] = uniform(keys[4], (128, 64, 3, 3), (64 * 9) ** -0.5)
    params["conv3_b"] = uniform(keys[5], (128,), (64 * 9) ** -0.5)
    # fc weights stored as (K, N) = (2048, 2); K order follows PyTorch's .view
    # flatten order (c, h, w).
    fan_in = 128 * 4 * 4
    params["fc_mu_w"] = uniform(keys[6], (fan_in, 2), fan_in ** -0.5)
    params["fc_mu_b"] = uniform(keys[7], (2,), fan_in ** -0.5)
    params["fc_logvar_w"] = uniform(keys[8], (fan_in, 2), fan_in ** -0.5)
    params["fc_logvar_b"] = uniform(keys[9], (2,), fan_in ** -0.5)
    return params


if __name__ == "__main__":
    key = jax.random.PRNGKey(0)
    pkey, xkey = jax.random.split(key)
    params = init_params(pkey)

    # MNIST-shaped input (the module's fc layers require 28x28), small batch.
    x = jax.random.normal(xkey, (2, 1, 28, 28), jnp.float32)

    z_mean, z_log_var = jax.jit(encoder_forward)(params, x)
    jax.block_until_ready(z_mean)
    jax.block_until_ready(z_log_var)
    assert z_mean.shape == (2, 2) and z_log_var.shape == (2, 2)

    # Sanity check against a pure-JAX reference (loose tolerance: kernel uses
    # bf16 MXU operands with f32 accumulation).
    zm_ref, zl_ref = _reference_forward(params, x)
    err = max(float(jnp.max(jnp.abs(z_mean - zm_ref))),
              float(jnp.max(jnp.abs(z_log_var - zl_ref))))
    assert err < 0.1, f"mismatch vs reference: {err}"

    print("KERNEL_OK")
</pallas_src>

<mosaic_0001>
module attributes {stable_mosaic.version = 11 : i64} {
  func.func @_encoder_kernel(%arg0: memref<1568x16xbf16, #tpu.memory_space<vmem>>, %arg1: memref<16x32xbf16, #tpu.memory_space<vmem>>, %arg2: memref<1x32xf32, #tpu.memory_space<vmem>>, %arg3: memref<288x64xbf16, #tpu.memory_space<vmem>>, %arg4: memref<1x64xf32, #tpu.memory_space<vmem>>, %arg5: memref<576x128xbf16, #tpu.memory_space<vmem>>, %arg6: memref<1x128xf32, #tpu.memory_space<vmem>>, %arg7: memref<2048x128xbf16, #tpu.memory_space<vmem>>, %arg8: memref<1x128xf32, #tpu.memory_space<vmem>>, %arg9: memref<8x128xf32, #tpu.memory_space<vmem>>) attributes {dimension_semantics = [], scalar_prefetch = 0 : i64, scratch_operands = 0 : i64, tpu.core_type = #tpu.core_type<tc>} {
    %c0 = arith.constant 0 : index
    %c0_0 = arith.constant 0 : index
    %0 = vector.load %arg0[%c0, %c0_0] : memref<1568x16xbf16, #tpu.memory_space<vmem>>, vector<1568x16xbf16>
    %c0_1 = arith.constant 0 : index
    %c0_2 = arith.constant 0 : index
    %1 = vector.load %arg1[%c0_1, %c0_2] : memref<16x32xbf16, #tpu.memory_space<vmem>>, vector<16x32xbf16>
    %cst = arith.constant dense<0.000000e+00> : vector<1568x32xf32>
    %2 = tpu.matmul %0, %1, %cst {dimension_numbers = #tpu.dot_dimension_numbers<[1], [0], [0], [1], [0, 0, 1, 1], [], []>} : vector<1568x16xbf16>, vector<16x32xbf16>, vector<1568x32xf32> -> vector<1568x32xf32>
    %c0_3 = arith.constant 0 : index
    %c0_4 = arith.constant 0 : index
    %3 = vector.load %arg2[%c0_3, %c0_4] : memref<1x32xf32, #tpu.memory_space<vmem>>, vector<1x32xf32>
    %4 = vector.broadcast %3 : vector<1x32xf32> to vector<1568x32xf32>
    %5 = arith.addf %2, %4 : vector<1568x32xf32>
    %cst_5 = arith.constant 0.000000e+00 : f32
    %6 = vector.broadcast %cst_5 : f32 to vector<1568x32xf32>
    %7 = arith.maximumf %5, %6 : vector<1568x32xf32>
    %8 = vector.shape_cast %7 : vector<1568x32xf32> to vector<14x14x8x32xf32>
    %cst_6 = arith.constant 0.000000e+00 : f32
    %9 = vector.broadcast %cst_6 : f32 to vector<1x14x8x32xf32>
    %cst_7 = arith.constant 0.000000e+00 : f32
    %10 = vector.broadcast %cst_7 : f32 to vector<1x14x8x32xf32>
    %11 = tpu.concatenate %9, %8, %10 in 0 : vector<1x14x8x32xf32>, vector<14x14x8x32xf32>, vector<1x14x8x32xf32> -> vector<16x14x8x32xf32>
    %cst_8 = arith.constant 0.000000e+00 : f32
    %12 = vector.broadcast %cst_8 : f32 to vector<16x1x8x32xf32>
    %cst_9 = arith.constant 0.000000e+00 : f32
    %13 = vector.broadcast %cst_9 : f32 to vector<16x1x8x32xf32>
    %14 = tpu.concatenate %12, %11, %13 in 1 : vector<16x1x8x32xf32>, vector<16x14x8x32xf32>, vector<16x1x8x32xf32> -> vector<16x16x8x32xf32>
    %15 = vector.shape_cast %14 : vector<16x16x8x32xf32> to vector<8x2x16x8x32xf32>
    %16 = vector.extract_strided_slice %15 {offsets = [0, 0, 0, 0, 0], sizes = [7, 1, 16, 8, 32], strides = [1, 1, 1, 1, 1]} : vector<8x2x16x8x32xf32> to vector<7x1x16x8x32xf32>
    %17 = vector.shape_cast %16 : vector<7x1x16x8x32xf32> to vector<7x16x8x32xf32>
    %18 = vector.shape_cast %17 : vector<7x16x8x32xf32> to vector<7x8x2x8x32xf32>
    %19 = vector.extract_strided_slice %18 {offsets = [0, 0, 0, 0, 0], sizes = [7, 7, 1, 8, 32], strides = [1, 1, 1, 1, 1]} : vector<7x8x2x8x32xf32> to vector<7x7x1x8x32xf32>
    %20 = vector.shape_cast %19 : vector<7x7x1x8x32xf32> to vector<7x7x8x32xf32>
    %21 = vector.extract_strided_slice %18 {offsets = [0, 0, 1, 0, 0], sizes = [7, 7, 1, 8, 32], strides = [1, 1, 1, 1, 1]} : vector<7x8x2x8x32xf32> to vector<7x7x1x8x32xf32>
    %22 = vector.shape_cast %21 : vector<7x7x1x8x32xf32> to vector<7x7x8x32xf32>
    %23 = vector.extract_strided_slice %18 {offsets = [0, 1, 0, 0, 0], sizes = [7, 7, 1, 8, 32], strides = [1, 1, 1, 1, 1]} : vector<7x8x2x8x32xf32> to vector<7x7x1x8x32xf32>
    %24 = vector.shape_cast %23 : vector<7x7x1x8x32xf32> to vector<7x7x8x32xf32>
    %25 = vector.shape_cast %14 : vector<16x16x8x32xf32> to vector<8x2x16x8x32xf32>
    %26 = vector.extract_strided_slice %25 {offsets = [0, 1, 0, 0, 0], sizes = [7, 1, 16, 8, 32], strides = [1, 1, 1, 1, 1]} : vector<8x2x16x8x32xf32> to vector<7x1x16x8x32xf32>
    %27 = vector.shape_cast %26 : vector<7x1x16x8x32xf32> to vector<7x16x8x32xf32>
    %28 = vector.shape_cast %27 : vector<7x16x8x32xf32> to vector<7x8x2x8x32xf32>
    %29 = vector.extract_strided_slice %28 {offsets = [0, 0, 0, 0, 0], sizes = [7, 7, 1, 8, 32], strides = [1, 1, 1, 1, 1]} : vector<7x8x2x8x32xf32> to vector<7x7x1x8x32xf32>
    %30 = vector.shape_cast %29 : vector<7x7x1x8x32xf32> to vector<7x7x8x32xf32>
    %31 = vector.extract_strided_slice %28 {offsets = [0, 0, 1, 0, 0], sizes = [7, 7, 1, 8, 32], strides = [1, 1, 1, 1, 1]} : vector<7x8x2x8x32xf32> to vector<7x7x1x8x32xf32>
    %32 = vector.shape_cast %31 : vector<7x7x1x8x32xf32> to vector<7x7x8x32xf32>
    %33 = vector.extract_strided_slice %28 {offsets = [0, 1, 0, 0, 0], sizes = [7, 7, 1, 8, 32], strides = [1, 1, 1, 1, 1]} : vector<7x8x2x8x32xf32> to vector<7x7x1x8x32xf32>
    %34 = vector.shape_cast %33 : vector<7x7x1x8x32xf32> to vector<7x7x8x32xf32>
    %35 = vector.shape_cast %14 : vector<16x16x8x32xf32> to vector<8x2x16x8x32xf32>
    %36 = vector.extract_strided_slice %35 {offsets = [1, 0, 0, 0, 0], sizes = [7, 1, 16, 8, 32], strides = [1, 1, 1, 1, 1]} : vector<8x2x16x8x32xf32> to vector<7x1x16x8x32xf32>
    %37 = vector.shape_cast %36 : vector<7x1x16x8x32xf32> to vector<7x16x8x32xf32>
    %38 = vector.shape_cast %37 : vector<7x16x8x32xf32> to vector<7x8x2x8x32xf32>
    %39 = vector.extract_strided_slice %38 {offsets = [0, 0, 0, 0, 0], sizes = [7, 7, 1, 8, 32], strides = [1, 1, 1, 1, 1]} : vector<7x8x2x8x32xf32> to vector<7x7x1x8x32xf32>
    %40 = vector.shape_cast %39 : vector<7x7x1x8x32xf32> to vector<7x7x8x32xf32>
    %41 = vector.extract_strided_slice %38 {offsets = [0, 0, 1, 0, 0], sizes = [7, 7, 1, 8, 32], strides = [1, 1, 1, 1, 1]} : vector<7x8x2x8x32xf32> to vector<7x7x1x8x32xf32>
    %42 = vector.shape_cast %41 : vector<7x7x1x8x32xf32> to vector<7x7x8x32xf32>
    %43 = vector.extract_strided_slice %38 {offsets = [0, 1, 0, 0, 0], sizes = [7, 7, 1, 8, 32], strides = [1, 1, 1, 1, 1]} : vector<7x8x2x8x32xf32> to vector<7x7x1x8x32xf32>
    %44 = vector.shape_cast %43 : vector<7x7x1x8x32xf32> to vector<7x7x8x32xf32>
    %45 = tpu.concatenate %20, %22, %24, %30, %32, %34, %40, %42, %44 in 3 : vector<7x7x8x32xf32>, vector<7x7x8x32xf32>, vector<7x7x8x32xf32>, vector<7x7x8x32xf32>, vector<7x7x8x32xf32>, vector<7x7x8x32xf32>, vector<7x7x8x32xf32>, vector<7x7x8x32xf32>, vector<7x7x8x32xf32> -> vector<7x7x8x288xf32>
    %46 = vector.shape_cast %45 : vector<7x7x8x288xf32> to vector<392x288xf32>
    %47 = arith.truncf %46 : vector<392x288xf32> to vector<392x288xbf16>
    %c0_10 = arith.constant 0 : index
    %c0_11 = arith.constant 0 : index
    %48 = vector.load %arg3[%c0_10, %c0_11] : memref<288x64xbf16, #tpu.memory_space<vmem>>, vector<288x64xbf16>
    %cst_12 = arith.constant dense<0.000000e+00> : vector<392x64xf32>
    %49 = tpu.matmul %47, %48, %cst_12 {dimension_numbers = #tpu.dot_dimension_numbers<[1], [0], [0], [1], [0, 0, 1, 1], [], []>} : vector<392x288xbf16>, vector<288x64xbf16>, vector<392x64xf32> -> vector<392x64xf32>
    %c0_13 = arith.constant 0 : index
    %c0_14 = arith.constant 0 : index
    %50 = vector.load %arg4[%c0_13, %c0_14] : memref<1x64xf32, #tpu.memory_space<vmem>>, vector<1x64xf32>
    %51 = vector.broadcast %50 : vector<1x64xf32> to vector<392x64xf32>
    %52 = arith.addf %49, %51 : vector<392x64xf32>
    %cst_15 = arith.constant 0.000000e+00 : f32
    %53 = vector.broadcast %cst_15 : f32 to vector<392x64xf32>
    %54 = arith.maximumf %52, %53 : vector<392x64xf32>
    %55 = vector.shape_cast %54 : vector<392x64xf32> to vector<7x7x8x64xf32>
    %cst_16 = arith.constant 0.000000e+00 : f32
    %56 = vector.broadcast %cst_16 : f32 to vector<1x7x8x64xf32>
    %cst_17 = arith.constant 0.000000e+00 : f32
    %57 = vector.broadcast %cst_17 : f32 to vector<2x7x8x64xf32>
    %58 = tpu.concatenate %56, %55, %57 in 0 : vector<1x7x8x64xf32>, vector<7x7x8x64xf32>, vector<2x7x8x64xf32> -> vector<10x7x8x64xf32>
    %cst_18 = arith.constant 0.000000e+00 : f32
    %59 = vector.broadcast %cst_18 : f32 to vector<10x1x8x64xf32>
    %cst_19 = arith.constant 0.000000e+00 : f32
    %60 = vector.broadcast %cst_19 : f32 to vector<10x2x8x64xf32>
    %61 = tpu.concatenate %59, %58, %60 in 1 : vector<10x1x8x64xf32>, vector<10x7x8x64xf32>, vector<10x2x8x64xf32> -> vector<10x10x8x64xf32>
    %62 = vector.shape_cast %61 : vector<10x10x8x64xf32> to vector<5x2x10x8x64xf32>
    %63 = vector.extract_strided_slice %62 {offsets = [0, 0, 0, 0, 0], sizes = [4, 1, 10, 8, 64], strides = [1, 1, 1, 1, 1]} : vector<5x2x10x8x64xf32> to vector<4x1x10x8x64xf32>
    %64 = vector.shape_cast %63 : vector<4x1x10x8x64xf32> to vector<4x10x8x64xf32>
    %65 = vector.shape_cast %64 : vector<4x10x8x64xf32> to vector<4x5x2x8x64xf32>
    %66 = vector.extract_strided_slice %65 {offsets = [0, 0, 0, 0, 0], sizes = [4, 4, 1, 8, 64], strides = [1, 1, 1, 1, 1]} : vector<4x5x2x8x64xf32> to vector<4x4x1x8x64xf32>
    %67 = vector.shape_cast %66 : vector<4x4x1x8x64xf32> to vector<4x4x8x64xf32>
    %68 = vector.extract_strided_slice %65 {offsets = [0, 0, 1, 0, 0], sizes = [4, 4, 1, 8, 64], strides = [1, 1, 1, 1, 1]} : vector<4x5x2x8x64xf32> to vector<4x4x1x8x64xf32>
    %69 = vector.shape_cast %68 : vector<4x4x1x8x64xf32> to vector<4x4x8x64xf32>
    %70 = vector.extract_strided_slice %65 {offsets = [0, 1, 0, 0, 0], sizes = [4, 4, 1, 8, 64], strides = [1, 1, 1, 1, 1]} : vector<4x5x2x8x64xf32> to vector<4x4x1x8x64xf32>
    %71 = vector.shape_cast %70 : vector<4x4x1x8x64xf32> to vector<4x4x8x64xf32>
    %72 = vector.shape_cast %61 : vector<10x10x8x64xf32> to vector<5x2x10x8x64xf32>
    %73 = vector.extract_strided_slice %72 {offsets = [0, 1, 0, 0, 0], sizes = [4, 1, 10, 8, 64], strides = [1, 1, 1, 1, 1]} : vector<5x2x10x8x64xf32> to vector<4x1x10x8x64xf32>
    %74 = vector.shape_cast %73 : vector<4x1x10x8x64xf32> to vector<4x10x8x64xf32>
    %75 = vector.shape_cast %74 : vector<4x10x8x64xf32> to vector<4x5x2x8x64xf32>
    %76 = vector.extract_strided_slice %75 {offsets = [0, 0, 0, 0, 0], sizes = [4, 4, 1, 8, 64], strides = [1, 1, 1, 1, 1]} : vector<4x5x2x8x64xf32> to vector<4x4x1x8x64xf32>
    %77 = vector.shape_cast %76 : vector<4x4x1x8x64xf32> to vector<4x4x8x64xf32>
    %78 = vector.extract_strided_slice %75 {offsets = [0, 0, 1, 0, 0], sizes = [4, 4, 1, 8, 64], strides = [1, 1, 1, 1, 1]} : vector<4x5x2x8x64xf32> to vector<4x4x1x8x64xf32>
    %79 = vector.shape_cast %78 : vector<4x4x1x8x64xf32> to vector<4x4x8x64xf32>
    %80 = vector.extract_strided_slice %75 {offsets = [0, 1, 0, 0, 0], sizes = [4, 4, 1, 8, 64], strides = [1, 1, 1, 1, 1]} : vector<4x5x2x8x64xf32> to vector<4x4x1x8x64xf32>
    %81 = vector.shape_cast %80 : vector<4x4x1x8x64xf32> to vector<4x4x8x64xf32>
    %82 = vector.shape_cast %61 : vector<10x10x8x64xf32> to vector<5x2x10x8x64xf32>
    %83 = vector.extract_strided_slice %82 {offsets = [1, 0, 0, 0, 0], sizes = [4, 1, 10, 8, 64], strides = [1, 1, 1, 1, 1]} : vector<5x2x10x8x64xf32> to vector<4x1x10x8x64xf32>
    %84 = vector.shape_cast %83 : vector<4x1x10x8x64xf32> to vector<4x10x8x64xf32>
    %85 = vector.shape_cast %84 : vector<4x10x8x64xf32> to vector<4x5x2x8x64xf32>
    %86 = vector.extract_strided_slice %85 {offsets = [0, 0, 0, 0, 0], sizes = [4, 4, 1, 8, 64], strides = [1, 1, 1, 1, 1]} : vector<4x5x2x8x64xf32> to vector<4x4x1x8x64xf32>
    %87 = vector.shape_cast %86 : vector<4x4x1x8x64xf32> to vector<4x4x8x64xf32>
    %88 = vector.extract_strided_slice %85 {offsets = [0, 0, 1, 0, 0], sizes = [4, 4, 1, 8, 64], strides = [1, 1, 1, 1, 1]} : vector<4x5x2x8x64xf32> to vector<4x4x1x8x64xf32>
    %89 = vector.shape_cast %88 : vector<4x4x1x8x64xf32> to vector<4x4x8x64xf32>
    %90 = vector.extract_strided_slice %85 {offsets = [0, 1, 0, 0, 0], sizes = [4, 4, 1, 8, 64], strides = [1, 1, 1, 1, 1]} : vector<4x5x2x8x64xf32> to vector<4x4x1x8x64xf32>
    %91 = vector.shape_cast %90 : vector<4x4x1x8x64xf32> to vector<4x4x8x64xf32>
    %92 = tpu.concatenate %67, %69, %71, %77, %79, %81, %87, %89, %91 in 3 : vector<4x4x8x64xf32>, vector<4x4x8x64xf32>, vector<4x4x8x64xf32>, vector<4x4x8x64xf32>, vector<4x4x8x64xf32>, vector<4x4x8x64xf32>, vector<4x4x8x64xf32>, vector<4x4x8x64xf32>, vector<4x4x8x64xf32> -> vector<4x4x8x576xf32>
    %93 = vector.shape_cast %92 : vector<4x4x8x576xf32> to vector<128x576xf32>
    %94 = arith.truncf %93 : vector<128x576xf32> to vector<128x576xbf16>
    %c0_20 = arith.constant 0 : index
    %c0_21 = arith.constant 0 : index
    %95 = vector.load %arg5[%c0_20, %c0_21] : memref<576x128xbf16, #tpu.memory_space<vmem>>, vector<576x128xbf16>
    %cst_22 = arith.constant dense<0.000000e+00> : vector<128x128xf32>
    %96 = tpu.matmul %94, %95, %cst_22 {dimension_numbers = #tpu.dot_dimension_numbers<[1], [0], [0], [1], [0, 0, 1, 1], [], []>} : vector<128x576xbf16>, vector<576x128xbf16>, vector<128x128xf32> -> vector<128x128xf32>
    %c0_23 = arith.constant 0 : index
    %c0_24 = arith.constant 0 : index
    %97 = vector.load %arg6[%c0_23, %c0_24] : memref<1x128xf32, #tpu.memory_space<vmem>>, vector<1x128xf32>
    %98 = vector.broadcast %97 : vector<1x128xf32> to vector<128x128xf32>
    %99 = arith.addf %96, %98 : vector<128x128xf32>
    %cst_25 = arith.constant 0.000000e+00 : f32
    %100 = vector.broadcast %cst_25 : f32 to vector<128x128xf32>
    %101 = arith.maximumf %99, %100 : vector<128x128xf32>
    %102 = vector.shape_cast %101 : vector<128x128xf32> to vector<16x8x128xf32>
    %103 = vector.extract_strided_slice %102 {offsets = [0, 0, 0], sizes = [1, 8, 128], strides = [1, 1, 1]} : vector<16x8x128xf32> to vector<1x8x128xf32>
    %104 = vector.shape_cast %103 : vector<1x8x128xf32> to vector<8x128xf32>
    %105 = vector.extract_strided_slice %102 {offsets = [1, 0, 0], sizes = [1, 8, 128], strides = [1, 1, 1]} : vector<16x8x128xf32> to vector<1x8x128xf32>
    %106 = vector.shape_cast %105 : vector<1x8x128xf32> to vector<8x128xf32>
    %107 = vector.extract_strided_slice %102 {offsets = [2, 0, 0], sizes = [1, 8, 128], strides = [1, 1, 1]} : vector<16x8x128xf32> to vector<1x8x128xf32>
    %108 = vector.shape_cast %107 : vector<1x8x128xf32> to vector<8x128xf32>
    %109 = vector.extract_strided_slice %102 {offsets = [3, 0, 0], sizes = [1, 8, 128], strides = [1, 1, 1]} : vector<16x8x128xf32> to vector<1x8x128xf32>
    %110 = vector.shape_cast %109 : vector<1x8x128xf32> to vector<8x128xf32>
    %111 = vector.extract_strided_slice %102 {offsets = [4, 0, 0], sizes = [1, 8, 128], strides = [1, 1, 1]} : vector<16x8x128xf32> to vector<1x8x128xf32>
    %112 = vector.shape_cast %111 : vector<1x8x128xf32> to vector<8x128xf32>
    %113 = vector.extract_strided_slice %102 {offsets = [5, 0, 0], sizes = [1, 8, 128], strides = [1, 1, 1]} : vector<16x8x128xf32> to vector<1x8x128xf32>
    %114 = vector.shape_cast %113 : vector<1x8x128xf32> to vector<8x128xf32>
    %115 = vector.extract_strided_slice %102 {offsets = [6, 0, 0], sizes = [1, 8, 128], strides = [1, 1, 1]} : vector<16x8x128xf32> to vector<1x8x128xf32>
    %116 = vector.shape_cast %115 : vector<1x8x128xf32> to vector<8x128xf32>
    %117 = vector.extract_strided_slice %102 {offsets = [7, 0, 0], sizes = [1, 8, 128], strides = [1, 1, 1]} : vector<16x8x128xf32> to vector<1x8x128xf32>
    %118 = vector.shape_cast %117 : vector<1x8x128xf32> to vector<8x128xf32>
    %119 = vector.extract_strided_slice %102 {offsets = [8, 0, 0], sizes = [1, 8, 128], strides = [1, 1, 1]} : vector<16x8x128xf32> to vector<1x8x128xf32>
    %120 = vector.shape_cast %119 : vector<1x8x128xf32> to vector<8x128xf32>
    %121 = vector.extract_strided_slice %102 {offsets = [9, 0, 0], sizes = [1, 8, 128], strides = [1, 1, 1]} : vector<16x8x128xf32> to vector<1x8x128xf32>
    %122 = vector.shape_cast %121 : vector<1x8x128xf32> to vector<8x128xf32>
    %123 = vector.extract_strided_slice %102 {offsets = [10, 0, 0], sizes = [1, 8, 128], strides = [1, 1, 1]} : vector<16x8x128xf32> to vector<1x8x128xf32>
    %124 = vector.shape_cast %123 : vector<1x8x128xf32> to vector<8x128xf32>
    %125 = vector.extract_strided_slice %102 {offsets = [11, 0, 0], sizes = [1, 8, 128], strides = [1, 1, 1]} : vector<16x8x128xf32> to vector<1x8x128xf32>
    %126 = vector.shape_cast %125 : vector<1x8x128xf32> to vector<8x128xf32>
    %127 = vector.extract_strided_slice %102 {offsets = [12, 0, 0], sizes = [1, 8, 128], strides = [1, 1, 1]} : vector<16x8x128xf32> to vector<1x8x128xf32>
    %128 = vector.shape_cast %127 : vector<1x8x128xf32> to vector<8x128xf32>
    %129 = vector.extract_strided_slice %102 {offsets = [13, 0, 0], sizes = [1, 8, 128], strides = [1, 1, 1]} : vector<16x8x128xf32> to vector<1x8x128xf32>
    %130 = vector.shape_cast %129 : vector<1x8x128xf32> to vector<8x128xf32>
    %131 = vector.extract_strided_slice %102 {offsets = [14, 0, 0], sizes = [1, 8, 128], strides = [1, 1, 1]} : vector<16x8x128xf32> to vector<1x8x128xf32>
    %132 = vector.shape_cast %131 : vector<1x8x128xf32> to vector<8x128xf32>
    %133 = vector.extract_strided_slice %102 {offsets = [15, 0, 0], sizes = [1, 8, 128], strides = [1, 1, 1]} : vector<16x8x128xf32> to vector<1x8x128xf32>
    %134 = vector.shape_cast %133 : vector<1x8x128xf32> to vector<8x128xf32>
    %135 = tpu.concatenate %104, %106, %108, %110, %112, %114, %116, %118, %120, %122, %124, %126, %128, %130, %132, %134 in 1 : vector<8x128xf32>, vector<8x128xf32>, vector<8x128xf32>, vector<8x128xf32>, vector<8x128xf32>, vector<8x128xf32>, vector<8x128xf32>, vector<8x128xf32>, vector<8x128xf32>, vector<8x128xf32>, vector<8x128xf32>, vector<8x128xf32>, vector<8x128xf32>, vector<8x128xf32>, vector<8x128xf32>, vector<8x128xf32> -> vector<8x2048xf32>
    %136 = arith.truncf %135 : vector<8x2048xf32> to vector<8x2048xbf16>
    %c0_26 = arith.constant 0 : index
    %c0_27 = arith.constant 0 : index
    %137 = vector.load %arg7[%c0_26, %c0_27] : memref<2048x128xbf16, #tpu.memory_space<vmem>>, vector<2048x128xbf16>
    %cst_28 = arith.constant dense<0.000000e+00> : vector<8x128xf32>
    %138 = tpu.matmul %136, %137, %cst_28 {dimension_numbers = #tpu.dot_dimension_numbers<[1], [0], [0], [1], [0, 0, 1, 1], [], []>} : vector<8x2048xbf16>, vector<2048x128xbf16>, vector<8x128xf32> -> vector<8x128xf32>
    %c0_29 = arith.constant 0 : index
    %c0_30 = arith.constant 0 : index
    %139 = vector.load %arg8[%c0_29, %c0_30] : memref<1x128xf32, #tpu.memory_space<vmem>>, vector<1x128xf32>
    %140 = vector.broadcast %139 : vector<1x128xf32> to vector<8x128xf32>
    %141 = arith.addf %138, %140 : vector<8x128xf32>
    %c0_31 = arith.constant 0 : index
    %c0_32 = arith.constant 0 : index
    %142 = vector.load %arg9[%c0_31, %c0_32] : memref<8x128xf32, #tpu.memory_space<vmem>>, vector<8x128xf32>
    tpu.vector_store %arg9[%c0_31, %c0_32], %141 {strides = array<i32>} : memref<8x128xf32, #tpu.memory_space<vmem>>, vector<8x128xf32>,
    return
  }
}

</mosaic_0001>

<bundles_post_ra>
// kernel: encoder_forward.1
= control target key start
LH: loop header
LB: loop body
LE: loop exit
PB: predicated region body
PF: predicated region fallthrough
CT: control target
= control target key end

     0   :  { %vm731_vm0 = vcmask 130048   ;;  %v7840_v23 = vmov 0.0   ;;  %s7841_s24 = smov 96   ;;  %s7842_s10 = smov 32   ;;  %vm2567_vm1 = vcmask 261120   ;;  %vm2611_vm2 = vcmask 523264   ;;  %s11643_s1 = inlined_call_operand.vmem [shape: bf16[16,32], index: 1, kind: input, shape index: {}]   ;;  %s11644_s0 = inlined_call_operand.vmem [shape: bf16[1568,16], index: 0, kind: input, shape index: {}]   ;;  %s11645_s2 = inlined_call_operand.vmem [shape: f32[1,32], index: 2, kind: input, shape index: {}]   ;;  %s11646_s3 = inlined_call_operand.vmem [shape: bf16[288,64], index: 3, kind: input, shape index: {}]   ;;  %s11647_s4 = inlined_call_operand.vmem [shape: f32[1,64], index: 4, kind: input, shape index: {}]   ;;  %s11648_s5 = inlined_call_operand.vmem [shape: bf16[576,128], index: 5, kind: input, shape index: {}]   ;;  %s11649_s6 = inlined_call_operand.vmem [shape: f32[1,128], index: 6, kind: input, shape index: {}]   ;;  %s11650_s7 = inlined_call_operand.vmem [shape: bf16[2048,128], index: 7, kind: input, shape index: {}]   ;;  %s11651_s8 = inlined_call_operand.vmem [shape: f32[1,128], index: 8, kind: input, shape index: {}]   ;;  %s11652_s9 = inlined_call_operand.vmem [shape: f32[8,128], index: 9, kind: output, shape index: {}]  }
   0x1   :  { %v7016_v0 = vld [vmem:[%s11643_s1] sm:$0xff]  ;;  %v6919_v2 = vld [vmem:[%s11644_s0 + $0x8] sm:$0xff]  ;;  %v6920_v4 = vld [vmem:[%s11644_s0 + $0x10] sm:$0xff]  ;;  %s7843_s1 = smov 64   ;;  %vm2655_vm3 = vcmask 785408   ;;  %vm7844_vm6 = vmmov 1  }
   0x2   :  { %v6918_v1 = vld [vmem:[%s11644_s0] sm:$0xff]  ;;  %1033 = vmatpush.bf16.msra.mxu0 %v7016_v0  ;;  %7201 = vmatpush.bf16.msra.mxu3 %v7016_v0  ;;  %v7003_v3 = vld [vmem:[%s11644_s0 + $0x2a8] sm:$0xff]  ;;  %v7004_v5 = vld [vmem:[%s11644_s0 + $0x2b0] sm:$0xff] }
   0x3   :  { %7199 = vmatpush.bf16.msra.mxu1 %v7016_v0  ;;  %7200 = vmatpush.bf16.msra.mxu2 %v7016_v0  ;;  %v6921_v6 = vld [vmem:[%s11644_s0 + $0x18] sm:$0xff]  ;;  %v6922_v8 = vld [vmem:[%s11644_s0 + $0x20] sm:$0xff]  ;;  %v6923_v10 = vld [vmem:[%s11644_s0 + $0x28] sm:$0xff] }
   0x4   :  { %v7005_v7 = vld [vmem:[%s11644_s0 + $0x2b8] sm:$0xff]  ;;  %v7006_v9 = vld [vmem:[%s11644_s0 + $0x2c0] sm:$0xff]  ;;  %v7007_v11 = vld [vmem:[%s11644_s0 + $0x2c8] sm:$0xff] }
   0x5   :  { %5995 = vmatmul.msk.bf16.vlgmr.msra.gmra.mxu0 %vm731_vm0, %v6918_v1  ;;  %6080 = vmatmul.msk.bf16.vlgmr.msra.gmra.mxu3 %vm731_vm0, %v7003_v3  ;;  %v6924_v12 = vld [vmem:[%s11644_s0 + $0x30] sm:$0xff]  ;;  %v6925_v14 = vld [vmem:[%s11644_s0 + $0x38] sm:$0xff]  ;;  %v6926_v16 = vld [vmem:[%s11644_s0 + $0x40] sm:$0xff] }
   0x6   :  { %v7008_v13 = vld [vmem:[%s11644_s0 + $0x2d0] sm:$0xff]  ;;  %v7009_v15 = vld [vmem:[%s11644_s0 + $0x2d8] sm:$0xff]  ;;  %v7968_v18 = vld [vmem:[%s11645_s2] ss:$0 sm:$0xff] }
   0x7   :  { %v7010_v22 = vld [vmem:[%s11644_s0 + $0x2e0] sm:$0xff]  ;;  %v6927_v25 = vld [vmem:[%s11644_s0 + $0x48] sm:$0xff]  ;;  %v6980_v27 = vld [vmem:[%s11644_s0 + $0x1f0] sm:$0xff] }
   0x8   :  { %6057 = vmatmul.msk.bf16.vlgmr.msra.gmra.mxu1 %vm731_vm0, %v6980_v27  ;;  %v7011_v31 = vld [vmem:[%s11644_s0 + $0x2e8] sm:$0xff]  ;;  %v6928_v33 = vld [vmem:[%s11644_s0 + $0x50] sm:$0xff]  ;;  %v6981_v36 = vld [vmem:[%s11644_s0 + $0x1f8] sm:$0xff] }
   0x9   :  { %v7012_v39 = vld [vmem:[%s11644_s0 + $0x2f0] sm:$0xff]  ;;  %v6929_v40 = vld [vmem:[%s11644_s0 + $0x58] sm:$0xff]  ;;  %v6982_v43 = vld [vmem:[%s11644_s0 + $0x200] sm:$0xff] }
   0xa   :  { %v6993_v46 = vld [vmem:[%s11644_s0 + $0x258] sm:$0xff]  ;;  %v6930_v48 = vld [vmem:[%s11644_s0 + $0x60] sm:$0xff]  ;;  %v6983_v52 = vld [vmem:[%s11644_s0 + $0x208] sm:$0xff] }
   0xb   :  { %v7013_v47 = vld [vmem:[%s11644_s0 + $0x2f8] sm:$0xff]  ;;  %6070 = vmatmul.msk.bf16.vlgmr.msra.gmra.mxu2 %vm731_vm0, %v6993_v46  ;;  %v6994_v58 = vld [vmem:[%s11644_s0 + $0x260] sm:$0xff]  ;;  %v6931_v62 = vld [vmem:[%s11644_s0 + $0x68] sm:$0xff] }
   0xc   :  { %v7014_v59 = vld [vmem:[%s11644_s0 + $0x300] sm:$0xff]  ;;  %v6984_v3 = vld [vmem:[%s11644_s0 + $0x210] sm:$0xff]  ;;  %vm10219_vm4 = vmneg %vm2611_vm2 }
   0xd   :  { %vm10241_vm5 = vmpackc.low %vm10219_vm4, %vm10219_vm4 }
   0xe   :  { %vm10506_vm7 = vmpackc.low %vm7844_vm6, %vm10219_vm4 }
   0xf   :  { %vm10872_vm8 = vmpackc.low %vm10219_vm4, %vm7844_vm6 }
  0x15   :  { %5996 = vmatmul.msk.bf16.gmra.mxu0 %vm731_vm0, %v6919_v2  ;;  %6081 = vmatmul.msk.bf16.gmra.mxu3 %vm731_vm0, %v7004_v5 }
  0x18   :  { %6058 = vmatmul.msk.bf16.gmra.mxu1 %vm731_vm0, %v6981_v36 }
  0x1b   :  { %6071 = vmatmul.msk.bf16.gmra.mxu2 %vm731_vm0, %v6994_v58 }
  0x25   :  { %5997 = vmatmul.msk.bf16.gmra.mxu0 %vm731_vm0, %v6920_v4  ;;  %6082 = vmatmul.msk.bf16.gmra.mxu3 %vm731_vm0, %v7005_v7  ;;  %v7015_v7 = vld [vmem:[%s11644_s0 + $0x308] sm:$0xff] }
  0x28   :  { %6059 = vmatmul.msk.bf16.gmra.mxu1 %vm731_vm0, %v6982_v43 }
  0x35   :  { %5998 = vmatmul.msk.bf16.gmra.mxu0 %vm731_vm0, %v6921_v6  ;;  %6083 = vmatmul.msk.bf16.gmra.mxu3 %vm731_vm0, %v7006_v9  ;;  %v6995_v6 = vld [vmem:[%s11644_s0 + $0x268] sm:$0xff] }
  0x36   :  { %6072 = vmatmul.msk.bf16.gmra.mxu2 %vm731_vm0, %v6995_v6 }
  0x38   :  { %6060 = vmatmul.msk.bf16.gmra.mxu1 %vm731_vm0, %v6983_v52 }
  0x45   :  { %5999 = vmatmul.msk.bf16.gmra.mxu0 %vm731_vm0, %v6922_v8  ;;  %6084 = vmatmul.msk.bf16.gmra.mxu3 %vm731_vm0, %v7007_v11  ;;  %v6932_v8 = vld [vmem:[%s11644_s0 + $0x70] sm:$0xff]  ;;  %v7034_v11 = vld [vmem:[%s11646_s3 + $0x88] sm:$0xff] }
  0x46   :  { %3422 = vmatpush.bf16.msrb.mxu3 %v7034_v11 }
  0x48   :  { %6061 = vmatmul.msk.bf16.gmra.mxu1 %vm731_vm0, %v6984_v3 }
  0x55   :  { %6000 = vmatmul.msk.bf16.gmra.mxu0 %vm731_vm0, %v6923_v10  ;;  %6085 = vmatmul.msk.bf16.gmra.mxu3 %vm731_vm0, %v7008_v13 }
  0x65   :  { %6001 = vmatmul.msk.bf16.gmra.mxu0 %vm731_vm0, %v6924_v12  ;;  %6086 = vmatmul.msk.bf16.gmra.mxu3 %vm731_vm0, %v7009_v15  ;;  %v6985_v12 = vld [vmem:[%s11644_s0 + $0x218] sm:$0xff]  ;;  %v7033_v15 = vld [vmem:[%s11646_s3 + $0x80] sm:$0xff] }
  0x66   :  { %6062 = vmatmul.msk.bf16.gmra.mxu1 %vm731_vm0, %v6985_v12  ;;  %3423 = vmatpush.bf16.msrb.mxu3 %v7033_v15 }
  0x75   :  { %6002 = vmatmul.msk.bf16.gmra.mxu0 %vm731_vm0, %v6925_v14  ;;  %6087 = vmatmul.msk.bf16.gmra.mxu3 %vm731_vm0, %v7010_v22  ;;  %v6986_v22 = vld [vmem:[%s11644_s0 + $0x220] sm:$0xff] }
  0x76   :  { %6063 = vmatmul.msk.bf16.gmra.mxu1 %vm731_vm0, %v6986_v22 }
  0x82   :  { %v7962_v17 = vpop.f32.mrf.mxu0 }
  0x85   :  { %6003 = vmatmul.msk.bf16.gmra.mxu0 %vm731_vm0, %v6926_v16  ;;  %6088 = vmatmul.msk.bf16.gmra.mxu3 %vm731_vm0, %v7011_v31  ;;  %v6996_v16 = vld [vmem:[%s11644_s0 + $0x270] sm:$0xff] }
  0x86   :  { %6073 = vmatmul.msk.bf16.gmra.mxu2 %vm731_vm0, %v6996_v16 }
  0x88   :  { %v7998_v35 = vpop.f32.mrf.mxu3 }
  0x89   :  { %11757 = vst [vmem:[#allocation2_spill] sm:$0xff] %v7998_v35 }
  0x8a   :  { %v1037_v19 = vpop.f32.mrf.mxu0 }
  0x8b   :  { %v1038_v20 = vadd.f32 %v7968_v18, %v1037_v19  ;;  %v6933_v19 = vld [vmem:[%s11644_s0 + $0x78] sm:$0xff] }
  0x8d   :  { %v1526_v21 = vmax.f32 %v1038_v20, 0.0 }
  0x8f   :  { %v7228_v24 = vpack.i.bf16 %v1526_v21, %v7840_v23 }
  0x90   :  { %v8005_v38 = vpop.f32.mrf.mxu3 }
  0x91   :  { %7229 = vrot.lane.b32.xlu2 %v7228_v24, %s7841_s24  ;;  %11758 = vst [vmem:[#allocation3_spill] sm:$0xff] %v8005_v38 }
  0x92   :  { %v7980_v26 = vpop.f32.mrf.mxu0 }
  0x95   :  { %6004 = vmatmul.msk.bf16.gmra.mxu0 %vm731_vm0, %v6927_v25  ;;  %6089 = vmatmul.msk.bf16.gmra.mxu3 %vm731_vm0, %v7012_v39 }
  0x98   :  { %v8016_v42 = vpop.f32.mrf.mxu3 }
  0x99   :  { %11759 = vst [vmem:[#allocation4_spill] sm:$0xff] %v8016_v42 }
  0x9a   :  { %v1042_v28 = vpop.f32.mrf.mxu0 }
  0x9b   :  { %v1043_v29 = vadd.f32 %v7968_v18, %v1042_v28 }
  0x9d   :  { %v1528_v30 = vmax.f32 %v1043_v29, 0.0  ;;  %v6997_v29 = vld [vmem:[%s11644_s0 + $0x278] sm:$0xff] }
  0x9e   :  { %6074 = vmatmul.msk.bf16.gmra.mxu2 %vm731_vm0, %v6997_v29 }
  0x9f   :  { %v7208_v32 = vpack.i.bf16 %v1528_v30, %v1526_v21 }
  0xa0   :  { %v8023_v45 = vpop.f32.mrf.mxu3 }
  0xa1   :  { %7209 = vrot.lane.b32.xlu0 %v7208_v32, %s7842_s10  ;;  %11760 = vst [vmem:[#allocation5_spill] sm:$0xff] %v8023_v45  ;;  %v6934_v32 = vld [vmem:[%s11644_s0 + $0x80] sm:$0xff] }
  0xa2   :  { %v7996_v34 = vpop.f32.mrf.mxu0 }
  0xa5   :  { %6005 = vmatmul.msk.bf16.gmra.mxu0 %vm731_vm0, %v6928_v33  ;;  %6090 = vmatmul.msk.bf16.gmra.mxu3 %vm731_vm0, %v7013_v47 }
  0xa8   :  { %v8038_v50 = vpop.f32.mrf.mxu3 }
  0xa9   :  { %11761 = vst [vmem:[#allocation6_spill] sm:$0xff] %v8038_v50 }
  0xaa   :  { %v1047_v37 = vpop.f32.mrf.mxu0 }
  0xab   :  { %v8056_v60 = vadd.f32 %v7968_v18, %v1047_v37 }
  0xad   :  { %v1530_v0 = vmax.f32 %v8056_v60, 0.0 }
  0xaf   :  { %v7248_v2 = vpack.i.bf16 %v1530_v0, %v1528_v30 }
  0xb0   :  { %v8047_v55 = vpop.f32.mrf.mxu3 }
  0xb1   :  { %11762 = vst [vmem:[#allocation7_spill] sm:$0xff] %v8047_v55 }
  0xb2   :  { %v8014_v41 = vpop.f32.mrf.mxu0 }
  0xb5   :  { %6006 = vmatmul.msk.bf16.gmra.mxu0 %vm731_vm0, %v6929_v40  ;;  %6091 = vmatmul.msk.bf16.gmra.mxu3 %vm731_vm0, %v7014_v59 }
  0xb8   :  { %v8070_v1 = vpop.f32.mrf.mxu3 }
  0xb9   :  { %11763 = vst [vmem:[#allocation8_spill] sm:$0xff] %v8070_v1 }
  0xba   :  { %v1052_v44 = vpop.f32.mrf.mxu0 }
  0xbb   :  { %v1053_v51 = vadd.f32 %v7968_v18, %v1052_v44  ;;  %v6987_v44 = vld [vmem:[%s11644_s0 + $0x228] sm:$0xff] }
  0xbc   :  { %6064 = vmatmul.msk.bf16.gmra.mxu1 %vm731_vm0, %v6987_v44 }
  0xbd   :  { %v1532_v56 = vmax.f32 %v1053_v51, 0.0 }
  0xc0   :  { %v8080_v5 = vpop.f32.mrf.mxu3 }
  0xc1   :  { %11764 = vst [vmem:[#allocation9_spill] sm:$0xff] %v8080_v5 }
  0xc2   :  { %v8036_v49 = vpop.f32.mrf.mxu0 }
  0xc5   :  { %6007 = vmatmul.msk.bf16.gmra.mxu0 %vm731_vm0, %v6930_v48  ;;  %6092 = vmatmul.msk.bf16.gmra.mxu3 %vm731_vm0, %v7015_v7 }
  0xc8   :  { %v8095_v10 = vpop.f32.mrf.mxu3 }
  0xc9   :  { %11765 = vst [vmem:[#allocation10_spill] sm:$0xff] %v8095_v10 }
  0xca   :  { %v1057_v53 = vpop.f32.mrf.mxu0 }
  0xcb   :  { %v1058_v54 = vadd.f32 %v7968_v18, %v1057_v53  ;;  %v7223_v53 = vpack.i.bf16 %v1530_v0, %v7840_v23  ;;  %v6988_v0 = vld [vmem:[%s11644_s0 + $0x230] sm:$0xff] }
  0xcc   :  { %6065 = vmatmul.msk.bf16.gmra.mxu1 %vm731_vm0, %v6988_v0 }
  0xcd   :  { %v1534_v57 = vmax.f32 %v1058_v54, 0.0  ;;  %v6998_v54 = vld [vmem:[%s11644_s0 + $0x280] sm:$0xff] }
  0xce   :  { %6075 = vmatmul.msk.bf16.gmra.mxu2 %vm731_vm0, %v6998_v54 }
  0xcf   :  { %v8058_v61 = vpack.i.bf16 %v1534_v57, %v1532_v56  ;;  %v6935_v56 = vld [vmem:[%s11644_s0 + $0x88] sm:$0xff] }
  0xd0   :  { %v8105_v14 = vpop.f32.mrf.mxu3 }
  0xd1   :  { %7234 = vrot.lane.b32.xlu2 %v8058_v61, %s7842_s10  ;;  %11766 = vst [vmem:[#allocation11_spill] sm:$0xff] %v8105_v14 }
  0xd2   :  { %v8067_v63 = vpop.f32.mrf.mxu0 }
  0xd5   :  { %6008 = vmatmul.msk.bf16.gmra.mxu0 %vm731_vm0, %v6931_v62  ;;  %v8177_v62 = vpop.f32.mrf.mxu1 }
  0xd6   :  { %11772 = vst [vmem:[#allocation17_spill] sm:$0xff] %v8177_v62 }
  0xd8   :  { %v8117_v21 = vpop.f32.mrf.mxu3 }
  0xd9   :  { %7249 = vrot.lane.b32.xlu2 %v7248_v2, %s7841_s24  ;;  %11767 = vst [vmem:[#allocation12_spill] sm:$0xff] %v8117_v21 }
  0xda   :  { %v8077_v4 = vpop.f32.mrf.mxu0 }
  0xdb   :  { %v8198_v16 = vadd.f32 %v7968_v18, %v8077_v4 }
  0xdd   :  { %v8194_v15 = vpop.f32.mrf.mxu1 }
  0xde   :  { %11774 = vst [vmem:[#allocation19_spill] sm:$0xff] %v8194_v15 }
  0xe0   :  { %v8125_v27 = vpop.f32.mrf.mxu3 }
  0xe1   :  { %11768 = vst [vmem:[#allocation13_spill] sm:$0xff] %v8125_v27 }
  0xe2   :  { %v8093_v9 = vpop.f32.mrf.mxu0 }
  0xe5   :  { %6009 = vmatmul.msk.bf16.gmra.mxu0 %vm731_vm0, %v6932_v8  ;;  %v6999_v8 = vld [vmem:[%s11644_s0 + $0x288] sm:$0xff] }
  0xe6   :  { %6076 = vmatmul.msk.bf16.gmra.mxu2 %vm731_vm0, %v6999_v8 }
  0xe8   :  { %v8143_v37 = vpop.f32.mrf.mxu3 }
  0xe9   :  { %11769 = vst [vmem:[#allocation14_spill] sm:$0xff] %v8143_v37 }
  0xea   :  { %v1067_v13 = vpop.f32.mrf.mxu0 }
  0xeb   :  { %v1068_v11 = vadd.f32 %v7968_v18, %v1067_v13 }
  0xed   :  { %v1538_v22 = vmax.f32 %v1068_v11, 0.0  ;;  %v6990_v11 = vld [vmem:[%s11644_s0 + $0x240] sm:$0xff] }
  0xf0   :  { %v8155_v48 = vpop.f32.mrf.mxu3 }
  0xf1   :  { %11770 = vst [vmem:[#allocation15_spill] sm:$0xff] %v8155_v48 }
  0xf2   :  { %v1070_v20 = vpop.f32.mrf.mxu0 }
  0xf3   :  { %v8135_v31 = vadd.f32 %v7968_v18, %v1070_v20 }
  0xf5   :  { %6010 = vmatmul.msk.bf16.gmra.mxu0 %vm731_vm0, %v6933_v19  ;;  %v11656_v39 = vmax.f32 %v8135_v31, 0.0  ;;  %v6936_v19 = vld [vmem:[%s11644_s0 + $0x90] sm:$0xff]  ;;  %v11788_v50 = vmax.f32 %v8135_v31, 0.0  ;;  %v1041_v31 = vadd.f32 %v7968_v18, %v7980_v26 }
  0xf7   :  { %v1527_v26 = vmax.f32 %v1041_v31, 0.0 }
  0xf8   :  { %v8172_v59 = vpop.f32.mrf.mxu3 }
  0xf9   :  { %11771 = vst [vmem:[#allocation16_spill] sm:$0xff] %v8172_v59 }
  0xfa   :  { %v1072_v24 = vpop.f32.mrf.mxu0 }
  0xfb   :  { %v1073_v25 = vadd.f32 %v7968_v18, %v1072_v24 }
  0xfd   :  { %v8127_v28 = vmax.f32 %v1073_v25, 0.0  ;;  %v11654_v25 = vmax.f32 %v8198_v16, 0.0 }
  0xff   :  { %v7213_v30 = vpack.i.bf16 %v8127_v28, %v7840_v23 }
 0x100   :  { %v8184_v6 = vpop.f32.mrf.mxu3 }
 0x101   :  { %7214 = vrot.lane.b32.xlu0 %v7213_v30, %s7843_s1  ;;  %11773 = vst [vmem:[#allocation18_spill] sm:$0xff] %v8184_v6  ;;  %v7253_v30 = vpack.i.bf16 %v1538_v22, %v11654_v25 }
 0x102   :  { %v1075_v33 = vpop.f32.mrf.mxu0 }
 0x103   :  { %v1076_v36 = vadd.f32 %v7968_v18, %v1075_v33  ;;  %v6989_v33 = vld [vmem:[%s11644_s0 + $0x238] sm:$0xff] }
 0x104   :  { %6066 = vmatmul.msk.bf16.gmra.mxu1 %vm731_vm0, %v6989_v33  ;;  %v6938_v33 = vld [vmem:[%s11644_s0 + $0xa0] sm:$0xff] }
 0x105   :  { %v1541_v40 = vmax.f32 %v1076_v36, 0.0  ;;  %6011 = vmatmul.msk.bf16.gmra.mxu0 %vm731_vm0, %v6934_v32  ;;  %v8210_v32 = vpop.f32.mrf.mxu1 }
 0x107   :  { %v7218_v43 = vpack.i.bf16 %v1541_v40, %v11656_v39 }
 0x108   :  { %v1500_v24 = vpop.f32.mrf.mxu3 }
 0x109   :  { %7219 = vrot.lane.b32.xlu1 %v7218_v43, %s7841_s24 }
 0x10a   :  { %v1077_v46 = vpop.f32.mrf.mxu0 }
 0x10b   :  { %v1078_v47 = vadd.f32 %v7968_v18, %v1077_v46 }
 0x10d   :  { %v8157_v51 = vmax.f32 %v1078_v47, 0.0  ;;  %v7000_v47 = vld [vmem:[%s11644_s0 + $0x290] sm:$0xff] }
 0x10e   :  { %6077 = vmatmul.msk.bf16.gmra.mxu2 %vm731_vm0, %v7000_v47 }
 0x10f   :  { %v2854_v52 = vpack.c.bf16 %v8157_v51, %v8127_v28 }
 0x110   :  { %v8219_v43 = vpop.f32.mrf.mxu3 }
 0x111   :  { %6165 = vmatmul.msk.bf16.vlgmr.msrb.gmra.mxu3 %vm2567_vm1, %v2854_v52  ;;  %7224 = vrot.lane.b32.xlu1 %v7223_v53, %s7842_s10  ;;  %11775 = vst [vmem:[#allocation20_spill] sm:$0xff] %v8219_v43  ;;  %v8228_v52 = vpop.f32.mrf.mxu1  ;;  %v6937_v53 = vld [vmem:[%s11644_s0 + $0x98] sm:$0xff] }
 0x112   :  { %v1080_v57 = vpop.f32.mrf.mxu0 }
 0x113   :  { %v1081_v58 = vadd.f32 %v7968_v18, %v1080_v57  ;;  %v1501_v57 = vadd.f32 %v7968_v18, %v1500_v24  ;;  %v7001_v24 = vld [vmem:[%s11644_s0 + $0x298] sm:$0xff] }
 0x114   :  { %6067 = vmatmul.msk.bf16.gmra.mxu1 %vm731_vm0, %v6990_v11 }
 0x115   :  { %v1543_v23 = vmax.f32 %v1081_v58, 0.0  ;;  %6012 = vmatmul.msk.bf16.gmra.mxu0 %vm731_vm0, %v6935_v56 }
 0x117   :  { %v8175_v60 = vpack.i.bf16 %v1543_v23, %v1541_v40 }
 0x118   :  { %v1505_v58 = vpop.f32.mrf.mxu3 }
 0x11a   :  { %v1082_v2 = vpop.f32.mrf.mxu0 }
 0x11b   :  { %v1083_v3 = vadd.f32 %v7968_v18, %v1082_v2  ;;  %v1711_v2 = vmax.f32 %v1501_v57, 0.0 }
 0x11d   :  { %v8186_v7 = vmax.f32 %v1083_v3, 0.0  ;;  %v8243_v3 = vpop.f32.mrf.mxu1 }
 0x11e   :  { %6078 = vmatmul.msk.bf16.gmra.mxu2 %vm731_vm0, %v7001_v24 }
 0x11f   :  { %v7238_v12 = vpack.i.bf16 %v8186_v7, %v8157_v51 }
 0x120   :  { %v8252_v22 = vpop.f32.mrf.mxu3 }
 0x121   :  { %7239 = vrot.lane.b32.xlu0 %v7238_v12, %s7843_s1  ;;  %11777 = vst [vmem:[#allocation22_spill] sm:$0xff] %v8252_v22 }
 0x122   :  { %v1085_v20 = vpop.f32.mrf.mxu0 }
 0x123   :  { %v1086_v13 = vadd.f32 %v7968_v18, %v1085_v20 }
 0x125   :  { %v1545_v29 = vmax.f32 %v1086_v13, 0.0  ;;  %6013 = vmatmul.msk.bf16.gmra.mxu0 %vm731_vm0, %v6936_v19 }
 0x127   :  { %v7243_v4 = vpack.i.bf16 %v1545_v29, %v1543_v23 }
 0x128   :  { %v1510_v47 = vpop.f32.mrf.mxu3 }
 0x129   :  { %7244 = vrot.lane.b32.xlu1 %v7243_v4, %s7841_s24  ;;  %7254 = vrot.lane.b32.xlu0 %v7253_v30, %s7842_s10  ;;  %v8261_v4 = vpop.f32.mrf.mxu1  ;;  %v7032_v30 = vld [vmem:[%s11646_s3 + $0x78] sm:$0xff] }
 0x12a   :  { %v1087_v36 = vpop.f32.mrf.mxu0  ;;  %3283 = vmatpush.bf16.msrb.mxu2 %v7032_v30  ;;  %v7002_v30 = vld [vmem:[%s11644_s0 + $0x2a0] sm:$0xff] }
 0x12b   :  { %v1088_v40 = vadd.f32 %v7968_v18, %v1087_v36 }
 0x12d   :  { %v8221_v44 = vmax.f32 %v1088_v40, 0.0 }
 0x12e   :  { %6079 = vmatmul.msk.bf16.gmra.mxu2 %vm731_vm0, %v7002_v30  ;;  %v7021_v30 = vld [vmem:[%s11646_s3 + $0x20] sm:$0xff] }
 0x12f   :  { %v2857_v46 = vpack.c.bf16 %v8221_v44, %v8186_v7 }
 0x131   :  { %6166 = vmatmul.msk.bf16.gmra.mxu3 %vm2567_vm1, %v2857_v46  ;;  %7269 = vrot.lane.b32.xlu0 %v8058_v61, %s7841_s24  ;;  %v1506_v61 = vadd.f32 %v7968_v18, %v1505_v58  ;;  %v8274_v46 = vpop.f32.mrf.mxu2  ;;  %v1360_v57 = vpop.f32.mrf.mxu1  ;;  %v7030_v58 = vld [vmem:[%s11646_s3 + $0x68] sm:$0xff] }
 0x132   :  { %v1090_v54 = vpop.f32.mrf.mxu0  ;;  %11778 = vst [vmem:[#allocation23_spill] sm:$0xff] %v8274_v46 }
 0x133   :  { %v1091_v56 = vadd.f32 %v7968_v18, %v1090_v54  ;;  %v1713_v8 = vmax.f32 %v1506_v61, 0.0 }
 0x135   :  { %v1547_v23 = vmax.f32 %v1091_v56, 0.0  ;;  %6014 = vmatmul.msk.bf16.gmra.mxu0 %vm731_vm0, %v6937_v53  ;;  %v8249_v20 = vpack.i.bf16 %v1713_v8, %v1711_v2  ;;  %v7031_v53 = vld [vmem:[%s11646_s3 + $0x70] sm:$0xff]  ;;  %v6991_v2 = vld [vmem:[%s11644_s0 + $0x248] sm:$0xff]  ;;  %v7024_v8 = vld [vmem:[%s11646_s3 + $0x38] sm:$0xff] }
 0x136   :  { %3284 = vmatpush.bf16.msrb.mxu2 %v7031_v53  ;;  %6068 = vmatmul.msk.bf16.gmra.mxu1 %vm731_vm0, %v6991_v2  ;;  %v7028_v53 = vld [vmem:[%s11646_s3 + $0x58] sm:$0xff]  ;;  %v1511_v2 = vadd.f32 %v7968_v18, %v1510_v47 }
 0x137   :  { %v8240_v0 = vpack.i.bf16 %v1547_v23, %v1545_v29  ;;  %11776 = vst [vmem:[#allocation21_spill] sm:$0xff] %v8249_v20  ;;  %3150 = vmatpush.bf16.msrb.mxu1 %v7024_v8 }
 0x13a   :  { %v1092_v12 = vpop.f32.mrf.mxu0  ;;  %3285 = vmatpush.bf16.msrb.mxu2 %v7030_v58 }
 0x13b   :  { %v1093_v19 = vadd.f32 %v7968_v18, %v1092_v12  ;;  %v8297_v12 = vpop.f32.mrf.mxu3 }
 0x13c   :  { %11780 = vst [vmem:[#allocation25_spill] sm:$0xff] %v8297_v12 }
 0x13d   :  { %v8254_v13 = vmax.f32 %v1093_v19, 0.0  ;;  %v7029_v19 = vld [vmem:[%s11646_s3 + $0x60] sm:$0xff] }
 0x13e   :  { %3286 = vmatpush.bf16.msrb.mxu2 %v7029_v19 }
 0x13f   :  { %v7258_v29 = vpack.i.bf16 %v8254_v13, %v8221_v44 }
 0x141   :  { %7259 = vrot.lane.b32.xlu1 %v7258_v29, %s7843_s1  ;;  %v7023_v29 = vld [vmem:[%s11646_s3 + $0x30] sm:$0xff] }
 0x142   :  { %v1095_v36 = vpop.f32.mrf.mxu0  ;;  %3151 = vmatpush.bf16.msrb.mxu1 %v7023_v29  ;;  %3287 = vmatpush.bf16.msrb.mxu2 %v7028_v53  ;;  %v1715_v29 = vmax.f32 %v1511_v2, 0.0  ;;  %v6992_v2 = vld [vmem:[%s11644_s0 + $0x250] sm:$0xff] }
 0x143   :  { %v8272_v40 = vadd.f32 %v7968_v18, %v1095_v36  ;;  %v8312_v36 = vpop.f32.mrf.mxu1  ;;  %v1515_v19 = vpop.f32.mrf.mxu3 }
 0x144   :  { %v1516_v47 = vadd.f32 %v7968_v18, %v1515_v19 }
 0x145   :  { %v11653_v54 = vmax.f32 %v8272_v40, 0.0  ;;  %6015 = vmatmul.msk.bf16.gmra.mxu0 %vm731_vm0, %v6938_v33 }
 0x146   :  { %v1717_v53 = vmax.f32 %v1516_v47, 0.0  ;;  %6069 = vmatmul.msk.bf16.gmra.mxu1 %vm731_vm0, %v6992_v2 }
 0x147   :  { %v7263_v56 = vpack.i.bf16 %v11653_v54, %v1547_v23  ;;  %v8295_v23 = vpop.f32.mrf.mxu2  ;;  %v7026_v54 = vld [vmem:[%s11646_s3 + $0x48] sm:$0xff] }
 0x148   :  { %11779 = vst [vmem:[#allocation24_spill] sm:$0xff] %v8295_v23  ;;  %v8350_v25 = vpack.i.bf16 %v1717_v53, %v1715_v29  ;;  %v7019_v53 = vld [vmem:[%s11646_s3 + $0x10] sm:$0xff] }
 0x149   :  { %7264 = vrot.lane.b32.xlu2 %v7263_v56, %s7841_s24  ;;  %v6939_v56 = vld [vmem:[%s11644_s0 + $0xa8] sm:$0xff] }
 0x14a   :  { %v1097_v61 = vpop.f32.mrf.mxu0  ;;  %11783 = vst [vmem:[#allocation28_spill] sm:$0xff] %v8350_v25 }
 0x14b   :  { %v1098_v11 = vadd.f32 %v7968_v18, %v1097_v61  ;;  %v7022_v61 = vld [vmem:[%s11646_s3 + $0x28] sm:$0xff] }
 0x14c   :  { %3152 = vmatpush.bf16.msrb.mxu1 %v7022_v61  ;;  %v1365_v61 = vpop.f32.mrf.mxu1 }
 0x14d   :  { %v8302_v24 = vmax.f32 %v1098_v11, 0.0  ;;  %v7027_v11 = vld [vmem:[%s11646_s3 + $0x50] sm:$0xff] }
 0x14e   :  { %3288 = vmatpush.bf16.msrb.mxu2 %v7027_v11 }
 0x14f   :  { %v2860_v33 = vpack.c.bf16 %v8302_v24, %v8254_v13  ;;  %v8328_v8 = vpop.f32.mrf.mxu2 }
 0x150   :  { %11781 = vst [vmem:[#allocation26_spill] sm:$0xff] %v8328_v8  ;;  %3153 = vmatpush.bf16.msrb.mxu1 %v7021_v30 }
 0x151   :  { %6167 = vmatmul.msk.bf16.gmra.mxu3 %vm2567_vm1, %v2860_v33  ;;  %v8339_v33 = vadd.f32 %v7968_v18, %v1360_v57  ;;  %v7020_v57 = vld [vmem:[%s11646_s3 + $0x18] sm:$0xff] }
 0x152   :  { %v8321_v58 = vpop.f32.mrf.mxu0  ;;  %3289 = vmatpush.bf16.msrb.mxu2 %v7026_v54  ;;  %v6940_v54 = vld [vmem:[%s11644_s0 + $0xb0] sm:$0xff] }
 0x153   :  { %11782 = vst [vmem:[#allocation27_spill] sm:$0xff] %v8339_v33  ;;  %v11655_v11 = vmax.f32 %v8339_v33, 0.0 }
 0x154   :  { %3154 = vmatpush.bf16.msrb.mxu1 %v7020_v57  ;;  %v7018_v57 = vld [vmem:[%s11646_s3 + $0x8] sm:$0xff] }
 0x155   :  { %6016 = vmatmul.msk.bf16.gmra.mxu0 %vm731_vm0, %v6939_v56  ;;  %v1366_v56 = vadd.f32 %v7968_v18, %v1365_v61  ;;  %v7025_v61 = vld [vmem:[%s11646_s3 + $0x40] sm:$0xff] }
 0x156   :  { %3290 = vmatpush.bf16.msrb.mxu2 %v7025_v61  ;;  %v7017_v61 = vld [vmem:[%s11646_s3] sm:$0xff] }
 0x157   :  { %v1657_v47 = vmax.f32 %v1366_v56, 0.0  ;;  %v8357_v30 = vpop.f32.mrf.mxu2  ;;  %v8369_v56 = vpop.f32.mrf.mxu1 }
 0x158   :  { %11784 = vst [vmem:[#allocation29_spill] sm:$0xff] %v8357_v30  ;;  %3155 = vmatpush.bf16.msrb.mxu1 %v7019_v53 }
 0x159   :  { %v8364_v29 = vpack.i.bf16 %v1657_v47, %v11655_v11 }
 0x15a   :  { %v8348_v19 = vpop.f32.mrf.mxu0 }
 0x15b   :  { %11785 = vst [vmem:[#allocation30_spill] sm:$0xff] %v8364_v29 }
 0x15c   :  { %3156 = vmatpush.bf16.msrb.mxu1 %v7018_v57 }
 0x15f   :  { %v1420_v11 = vpop.f32.mrf.mxu2  ;;  %v1370_v39 = vpop.f32.mrf.mxu1 }
 0x160   :  { %3157 = vmatpush.bf16.msrb.mxu1 %v7017_v61  ;;  %v1371_v53 = vadd.f32 %v7968_v18, %v1370_v39  ;;  %v8403_v39 = vadd.f32 %v7968_v18, %v1420_v11 }
 0x162   :  { %v8374_v2 = vpop.f32.mrf.mxu0  ;;  %v1659_v1 = vmax.f32 %v1371_v53, 0.0  ;;  %v1679_v25 = vmax.f32 %v8403_v39, 0.0 }
 0x164   :  { %v8390_v57 = vpack.i.bf16 %v1659_v1, %v1657_v47 }
 0x165   :  { %6017 = vmatmul.msk.bf16.gmra.mxu0 %vm731_vm0, %v6940_v54  ;;  %v7210_v54 = vpop.permute.xlu0 %7209 }
 0x166   :  { %11787 = vst [vmem:[#allocation32_spill] sm:$0xff] %v8390_v57  ;;  %v7212_v8 = vunpack.i.h.bf16 %v7210_v54  ;;  %v7211_v46 = vunpack.i.l.bf16 %v7210_v54 }
 0x167   :  { %v8387_v10 = vpop.f32.mrf.mxu2  ;;  %v8396_v61 = vpop.f32.mrf.mxu1 }
 0x168   :  { %11786 = vst [vmem:[#allocation31_spill] sm:$0xff] %v8387_v10  ;;  %v2706_v54 = vsel %vm2567_vm1, %v1527_v26, %v7212_v8  ;;  %v7230_v8 = vpop.permute.xlu2 %7229 }
 0x169   :  { %11789 = vst [vmem:[#allocation33_spill] sm:$0xff] %v8396_v61 }
 0x16a   :  { %v1107_v21 = vpop.f32.mrf.mxu0 }
 0x16b   :  { %v8385_v27 = vadd.f32 %v7968_v18, %v1107_v21  ;;  %v6941_v21 = vld [vmem:[%s11644_s0 + $0xb8] sm:$0xff] }
 0x16d   :  { %v11657_v35 = vmax.f32 %v8385_v27, 0.0 }
 0x16f   :  { %v7273_v42 = vpack.i.bf16 %v11788_v50, %v11657_v35  ;;  %v1425_v47 = vpop.f32.mrf.mxu2  ;;  %v1375_v20 = vpop.f32.mrf.mxu1 }
 0x170   :  { %v8410_v50 = vadd.f32 %v7968_v18, %v1425_v47 }
 0x171   :  { %7274 = vrot.lane.b32.xlu1 %v7273_v42, %s7842_s10  ;;  %v1036_v42 = vadd.f32 %v7968_v18, %v7962_v17  ;;  %v1376_v17 = vadd.f32 %v7968_v18, %v1375_v20 }
 0x172   :  { %v8405_v53 = vpop.f32.mrf.mxu0  ;;  %11790 = vst [vmem:[#allocation34_spill] sm:$0xff] %v8410_v50  ;;  %v11658_v11 = vmax.f32 %v8410_v50, 0.0 }
 0x173   :  { %v8416_v35 = vpop.permute.xlu0 %7214  ;;  %v1525_v59 = vmax.f32 %v1036_v42, 0.0  ;;  %v1661_v14 = vmax.f32 %v1376_v17, 0.0 }
 0x174   :  { %v8421_v39 = vunpack.i.l.bf16 %v8416_v35  ;;  %v8425_v47 = vpack.i.bf16 %v11658_v11, %v1679_v25  ;;  %v11793_v11 = vunpack.i.h.bf16 %v8416_v35 }
 0x175   :  { %6018 = vmatmul.msk.bf16.gmra.mxu0 %vm731_vm0, %v6941_v21  ;;  %v2705_v21 = vsel %vm2567_vm1, %v1525_v59, %v7211_v46  ;;  %v8437_v42 = vpack.i.bf16 %v1661_v14, %v1659_v1  ;;  %v7232_v1 = vunpack.i.h.bf16 %v7230_v8 }
 0x176   :  { %11791 = vst [vmem:[#allocation35_spill] sm:$0xff] %v8425_v47  ;;  %v2755_v47 = vsel %vm2611_vm2, %v2706_v54, %v11793_v11  ;;  %v2754_v20 = vsel %vm2611_vm2, %v2705_v21, %v8421_v39 }
 0x177   :  { %v8430_v12 = vpop.f32.mrf.mxu2  ;;  %11794 = vst [vmem:[#allocation37_spill] sm:$0xff] %v8437_v42  ;;  %v8441_v59 = vpop.f32.mrf.mxu1 }
 0x178   :  { %11792 = vst [vmem:[#allocation36_spill] sm:$0xff] %v8430_v12 }
 0x179   :  { %11795 = vst [vmem:[#allocation38_spill] sm:$0xff] %v8441_v59 }
 0x17a   :  { %v1112_v62 = vpop.f32.mrf.mxu0 }
 0x17b   :  { %v7220_v37 = vpop.permute.xlu1 %7219 }
 0x17c   :  { %v7222_v57 = vunpack.i.h.bf16 %v7220_v37  ;;  %v7221_v5 = vunpack.i.l.bf16 %v7220_v37  ;;  %v6942_v37 = vld [vmem:[%s11644_s0 + $0xc0] sm:$0xff] }
 0x17e   :  { %v2803_v31 = vsel %vm2655_vm3, %v2754_v20, %v7221_v5  ;;  %v2804_v17 = vsel %vm2655_vm3, %v2755_v47, %v7222_v57  ;;  %v8449_v5 = vunpack.i.l.bf16 %v7230_v8  ;;  %v8452_v47 = vpop.permute.xlu2 %7234 }
 0x17f   :  { %v2853_v26 = vpack.c.bf16 %v2804_v17, %v2803_v31  ;;  %v1430_v21 = vpop.f32.mrf.mxu2 }
 0x181   :  { %3291 = vmatmul.bf16.vlgmr.msrb.gmra.mxu2 %v2853_v26  ;;  %v1380_v26 = vpop.f32.mrf.mxu1 }
 0x182   :  { %v8446_v46 = vpop.f32.mrf.mxu0 }
 0x183   :  { %v7225_v11 = vpop.permute.xlu1 %7224 }
 0x184   :  { %v7226_v54 = vunpack.i.l.bf16 %v7225_v11 }
 0x185   :  { %6019 = vmatmul.msk.bf16.gmra.mxu0 %vm731_vm0, %v6942_v37  ;;  %v8464_v37 = vadd.f32 %v7968_v18, %v1112_v62 }
 0x186   :  { %v2568_v57 = vsel %vm2567_vm1, 0.0, %v7226_v54  ;;  %v1381_v54 = vadd.f32 %v7968_v18, %v1380_v26  ;;  %v8490_v26 = vadd.f32 %v7968_v18, %v1430_v21 }
 0x187   :  { %v8456_v20 = vsel %vm2611_vm2, %v2568_v57, %v8421_v39  ;;  %v8470_v38 = vpop.f32.mrf.mxu2  ;;  %v11661_v45 = vmax.f32 %v8464_v37, 0.0 }
 0x188   :  { %v2656_v31 = vsel %vm2655_vm3, %v8456_v20, %v8449_v5  ;;  %v2657_v17 = vsel %vm2655_vm3, %v8456_v20, %v7232_v1  ;;  %v1663_v57 = vmax.f32 %v1381_v54, 0.0  ;;  %11796 = vst [vmem:[#allocation39_spill] sm:$0xff] %v8470_v38  ;;  %v1046_v54 = vadd.f32 %v7968_v18, %v7996_v34 }
 0x189   :  { %v2852_v8 = vpack.c.bf16 %v2657_v17, %v2656_v31  ;;  %v6943_v31 = vld [vmem:[%s11644_s0 + $0xc8] sm:$0xff]  ;;  %v1066_v34 = vadd.f32 %v7968_v18, %v8093_v9 }
 0x18a   :  { %v1117_v22 = vpop.f32.mrf.mxu0  ;;  %v8474_v1 = vpack.i.bf16 %v1679_v25, %v1663_v57  ;;  %v8476_v55 = vpack.i.bf16 %v1663_v57, %v1661_v14  ;;  %v1051_v57 = vadd.f32 %v7968_v18, %v8014_v41  ;;  %v7227_v41 = vunpack.i.h.bf16 %v7225_v11 }
 0x18b   :  { %v8468_v43 = vadd.f32 %v7968_v18, %v1117_v22  ;;  %3158 = vmatmul.bf16.vlgmr.msrb.gmra.mxu1 %v2852_v8  ;;  %v7250_v22 = vpop.permute.xlu2 %7249  ;;  %v1537_v23 = vmax.f32 %v1066_v34, 0.0 }
 0x18c   :  { %11797 = vst [vmem:[#allocation40_spill] sm:$0xff] %v8474_v1  ;;  %v7252_v14 = vunpack.i.h.bf16 %v7250_v22  ;;  %v7251_v8 = vunpack.i.l.bf16 %v7250_v22  ;;  %v7236_v22 = vunpack.i.l.bf16 %v8452_v47  ;;  %v1531_v6 = vmax.f32 %v1051_v57, 0.0  ;;  %v8513_v1 = vpop.f32.mrf.mxu1 }
 0x18d   :  { %v11660_v50 = vmax.f32 %v8468_v43, 0.0  ;;  %11798 = vst [vmem:[#allocation41_spill] sm:$0xff] %v8476_v55 }
 0x18e   :  { %v2659_v21 = vsel %vm2655_vm3, %v8456_v20, %v7252_v14  ;;  %v1529_v14 = vmax.f32 %v1046_v54, 0.0  ;;  %11800 = vst [vmem:[#allocation43_spill] sm:$0xff] %v8513_v1  ;;  %v2708_v11 = vsel %vm2567_vm1, %v1531_v6, %v7236_v22 }
 0x18f   :  { %v8482_v62 = vpack.i.bf16 %v11660_v50, %v11661_v45  ;;  %v1435_v50 = vpop.f32.mrf.mxu2  ;;  %v2658_v45 = vsel %vm2655_vm3, %v8456_v20, %v7251_v8 }
 0x190   :  { %v8505_v55 = vadd.f32 %v7968_v18, %v1435_v50  ;;  %v2855_v33 = vpack.c.bf16 %v2659_v21, %v2658_v45  ;;  %v11801_v50 = vmax.f32 %v8490_v26, 0.0  ;;  %v2707_v48 = vsel %vm2567_vm1, %v1529_v14, %v7227_v41 }
 0x192   :  { %v8487_v17 = vpop.f32.mrf.mxu0  ;;  %11799 = vst [vmem:[#allocation42_spill] sm:$0xff] %v8505_v55 }
 0x193   :  { %v8492_v25 = vpop.permute.xlu0 %7239 }
 0x194   :  { %v11803_v21 = vunpack.i.l.bf16 %v8492_v25  ;;  %v11804_v42 = vunpack.i.h.bf16 %v8492_v25 }
 0x195   :  { %6020 = vmatmul.msk.bf16.gmra.mxu0 %vm731_vm0, %v6943_v31  ;;  %v11663_v31 = vmax.f32 %v8505_v55, 0.0 }
 0x196   :  { %v2756_v12 = vsel %vm2611_vm2, %v2707_v48, %v11803_v21 }
 0x197   :  { %v8519_v9 = vpack.i.bf16 %v11663_v31, %v11801_v50  ;;  %v2757_v50 = vsel %vm2611_vm2, %v2708_v11, %v11804_v42  ;;  %v8539_v31 = vpop.f32.mrf.mxu1 }
 0x198   :  { %11805 = vst [vmem:[#allocation45_spill] sm:$0xff] %v8539_v31 }
 0x199   :  { %11802 = vst [vmem:[#allocation44_spill] sm:$0xff] %v8519_v9 }
 0x19a   :  { %v1122_v30 = vpop.f32.mrf.mxu0 }
 0x19b   :  { %v7245_v38 = vpop.permute.xlu1 %7244  ;;  %v7255_v57 = vpop.permute.xlu0 %7254  ;;  %3163 = vmatmul.bf16.gmra.mxu1 %v2855_v33  ;;  %v8547_v42 = vadd.f32 %v7968_v18, %v1122_v30 }
 0x19c   :  { %v7247_v8 = vunpack.i.h.bf16 %v7245_v38  ;;  %v7246_v45 = vunpack.i.l.bf16 %v7245_v38  ;;  %v7257_v54 = vunpack.i.h.bf16 %v7255_v57  ;;  %v6944_v38 = vld [vmem:[%s11644_s0 + $0xd0] sm:$0xff] }
 0x19e   :  { %v8530_v34 = vsel %vm2567_vm1, %v1537_v23, %v7257_v54  ;;  %v2805_v6 = vsel %vm2655_vm3, %v2756_v12, %v7246_v45  ;;  %v2806_v33 = vsel %vm2655_vm3, %v2757_v50, %v7247_v8  ;;  %v11665_v54 = vmax.f32 %v8547_v42, 0.0 }
 0x19f   :  { %v2856_v22 = vpack.c.bf16 %v2806_v33, %v2805_v6  ;;  %v8554_v6 = vpop.f32.mrf.mxu1  ;;  %v1056_v33 = vadd.f32 %v7968_v18, %v8036_v49 }
 0x1a1   :  { %3296 = vmatmul.bf16.gmra.mxu2 %v2856_v22  ;;  %v1061_v22 = vadd.f32 %v7968_v18, %v8067_v63 }
 0x1a2   :  { %v8537_v41 = vpop.f32.mrf.mxu0 }
 0x1a3   :  { %v7270_v48 = vpop.permute.xlu0 %7269  ;;  %v1535_v63 = vmax.f32 %v1061_v22, 0.0 }
 0x1a4   :  { %v7272_v14 = vunpack.i.h.bf16 %v7270_v48  ;;  %v7271_v21 = vunpack.i.l.bf16 %v7270_v48  ;;  %v7237_v48 = vunpack.i.h.bf16 %v8452_v47 }
 0x1a5   :  { %6021 = vmatmul.msk.bf16.gmra.mxu0 %vm731_vm0, %v6944_v38  ;;  %v8566_v38 = vpop.f32.mrf.mxu2 }
 0x1a6   :  { %v2660_v23 = vsel %vm2655_vm3, %v8456_v20, %v7271_v21  ;;  %v2661_v12 = vsel %vm2655_vm3, %v8456_v20, %v7272_v14  ;;  %11806 = vst [vmem:[#allocation46_spill] sm:$0xff] %v8566_v38  ;;  %v7256_v14 = vunpack.i.l.bf16 %v7255_v57  ;;  %v6945_v21 = vld [vmem:[%s11644_s0 + $0xd8] sm:$0xff] }
 0x1a7   :  { %v2858_v8 = vpack.c.bf16 %v2661_v12, %v2660_v23  ;;  %v7265_v23 = vpop.permute.xlu2 %7264  ;;  %v1533_v12 = vmax.f32 %v1056_v33, 0.0 }
 0x1a8   :  { %v2710_v47 = vsel %vm2567_vm1, %v1535_v63, %v7256_v14  ;;  %v7267_v57 = vunpack.i.h.bf16 %v7265_v23  ;;  %v7266_v31 = vunpack.i.l.bf16 %v7265_v23 }
 0x1aa   :  { %v1127_v11 = vpop.f32.mrf.mxu0 }
 0x1ab   :  { %v8550_v45 = vadd.f32 %v7968_v18, %v1127_v11  ;;  %3168 = vmatmul.bf16.gmra.mxu1 %v2858_v8 }
 0x1ad   :  { %v11664_v50 = vmax.f32 %v8550_v45, 0.0  ;;  %v8593_v23 = vpop.f32.mrf.mxu2 }
 0x1ae   :  { %11808 = vst [vmem:[#allocation48_spill] sm:$0xff] %v8593_v23 }
 0x1af   :  { %v8564_v30 = vpack.i.bf16 %v11664_v50, %v11665_v54  ;;  %v2709_v54 = vsel %vm2567_vm1, %v1533_v12, %v7237_v48  ;;  %v8589_v48 = vpop.f32.mrf.mxu1 }
 0x1b0   :  { %11807 = vst [vmem:[#allocation47_spill] sm:$0xff] %v8589_v48 }
 0x1b2   :  { %v8572_v49 = vpop.f32.mrf.mxu0 }
 0x1b3   :  { %v8574_v8 = vpop.permute.xlu1 %7259 }
 0x1b4   :  { %v11667_v11 = vunpack.i.h.bf16 %v8574_v8  ;;  %v11668_v50 = vunpack.i.l.bf16 %v8574_v8 }
 0x1b5   :  { %6022 = vmatmul.msk.bf16.gmra.mxu0 %vm731_vm0, %v6945_v21  ;;  %v8602_v63 = vpop.f32.mrf.mxu2 }
 0x1b6   :  { %v2758_v9 = vsel %vm2611_vm2, %v2709_v54, %v11668_v50  ;;  %v2759_v33 = vsel %vm2611_vm2, %v2710_v47, %v11667_v11  ;;  %v6946_v54 = vld [vmem:[%s11644_s0 + $0xe0] sm:$0xff]  ;;  %11810 = vst [vmem:[#allocation50_spill] sm:$0xff] %v8602_v63  ;;  %v6947_v47 = vld [vmem:[%s11644_s0 + $0xe8] sm:$0xff] }
 0x1b7   :  { %v2807_v22 = vsel %vm2655_vm3, %v2758_v9, %v7266_v31  ;;  %v2808_v55 = vsel %vm2655_vm3, %v2759_v33, %v7267_v57  ;;  %v8600_v12 = vpop.f32.mrf.mxu1 }
 0x1b8   :  { %v2859_v38 = vpack.c.bf16 %v2808_v55, %v2807_v22  ;;  %11809 = vst [vmem:[#allocation49_spill] sm:$0xff] %v8600_v12 }
 0x1ba   :  { %v8591_v14 = vpop.f32.mrf.mxu0  ;;  %3301 = vmatmul.bf16.gmra.mxu2 %v2859_v38  ;;  %v8613_v38 = vadd.f32 %v7968_v18, %v8321_v58  ;;  %v8629_v58 = vadd.f32 %v7968_v18, %v8348_v19  ;;  %v6948_v19 = vld [vmem:[%s11644_s0 + $0xf0] sm:$0xff] }
 0x1bc   :  { %v11669_v22 = vmax.f32 %v8613_v38, 0.0 }
 0x1bd   :  { %v8609_v9 = vpop.f32.mrf.mxu2 }
 0x1be   :  { %11812 = vst [vmem:[#allocation52_spill] sm:$0xff] %v8609_v9 }
 0x1bf   :  { %v8607_v31 = vpop.f32.mrf.mxu1 }
 0x1c0   :  { %11811 = vst [vmem:[#allocation51_spill] sm:$0xff] %v8607_v31 }
 0x1c2   :  { %v8598_v21 = vpop.f32.mrf.mxu0 }
 0x1c5   :  { %6023 = vmatmul.msk.bf16.gmra.mxu0 %vm731_vm0, %v6946_v54  ;;  %v8625_v31 = vpop.f32.mrf.mxu2 }
 0x1c6   :  { %11814 = vst [vmem:[#allocation54_spill] sm:$0xff] %v8625_v31 }
 0x1c7   :  { %v8621_v11 = vpop.f32.mrf.mxu1 }
 0x1c8   :  { %11813 = vst [vmem:[#allocation53_spill] sm:$0xff] %v8621_v11 }
 0x1ca   :  { %v8605_v55 = vpop.f32.mrf.mxu0 }
 0x1cf   :  { %v8641_v31 = vpop.f32.mrf.mxu1 }
 0x1d0   :  { %11815 = vst [vmem:[#allocation55_spill] sm:$0xff] %v8641_v31  ;;  %v11817_v31 = vmax.f32 %v8198_v16, 0.0 }
 0x1d2   :  { %v1140_v57 = vpop.f32.mrf.mxu0 }
 0x1d3   :  { %v1141_v33 = vadd.f32 %v7968_v18, %v1140_v57 }
 0x1d5   :  { %v1567_v54 = vmax.f32 %v1141_v33, 0.0  ;;  %6024 = vmatmul.msk.bf16.gmra.mxu0 %vm731_vm0, %v6947_v47  ;;  %v11670_v33 = vmax.f32 %v8629_v58, 0.0 }
 0x1d7   :  { %v7283_v50 = vpack.i.bf16 %v1567_v54, %v11669_v22 }
 0x1d9   :  { %7284 = vrot.lane.b32.xlu0 %v7283_v50, %s7841_s24 }
 0x1da   :  { %v1142_v48 = vpop.f32.mrf.mxu0 }
 0x1db   :  { %v1143_v57 = vadd.f32 %v7968_v18, %v1142_v48  ;;  %v8648_v48 = vpop.f32.mrf.mxu2 }
 0x1dc   :  { %11816 = vst [vmem:[#allocation56_spill] sm:$0xff] %v8648_v48 }
 0x1dd   :  { %v8634_v9 = vmax.f32 %v1143_v57, 0.0 }
 0x1df   :  { %v2863_v47 = vpack.c.bf16 %v8634_v9, %v11670_v33  ;;  %v7278_v22 = vpack.i.bf16 %v8634_v9, %v8302_v24 }
 0x1e1   :  { %6168 = vmatmul.msk.bf16.gmra.mxu3 %vm2567_vm1, %v2863_v47  ;;  %7279 = vrot.lane.b32.xlu2 %v7278_v22, %s7843_s1  ;;  %v8659_v47 = vpop.f32.mrf.mxu1 }
 0x1e2   :  { %v1145_v50 = vpop.f32.mrf.mxu0  ;;  %11818 = vst [vmem:[#allocation57_spill] sm:$0xff] %v8659_v47 }
 0x1e3   :  { %v1146_v57 = vadd.f32 %v7968_v18, %v1145_v50  ;;  %v8661_v63 = vpop.f32.mrf.mxu2 }
 0x1e4   :  { %11819 = vst [vmem:[#allocation58_spill] sm:$0xff] %v8661_v63 }
 0x1e5   :  { %v1569_v11 = vmax.f32 %v1146_v57, 0.0  ;;  %6025 = vmatmul.msk.bf16.gmra.mxu0 %vm731_vm0, %v6948_v19 }
 0x1e7   :  { %v8652_v33 = vpack.i.bf16 %v1569_v11, %v1567_v54  ;;  %v7288_v23 = vpack.i.bf16 %v1569_v11, %v11817_v31  ;;  %v6949_v54 = vld [vmem:[%s11644_s0 + $0xf8] sm:$0xff]  ;;  %v11822_v31 = vmax.f32 %v8385_v27, 0.0 }
 0x1e9   :  { %7289 = vrot.lane.b32.xlu1 %v7288_v23, %s7841_s24  ;;  %7294 = vrot.lane.b32.xlu2 %v8482_v62, %s7842_s10  ;;  %v8669_v11 = vpop.f32.mrf.mxu1 }
 0x1ea   :  { %v1147_v22 = vpop.f32.mrf.mxu0  ;;  %11820 = vst [vmem:[#allocation59_spill] sm:$0xff] %v8669_v11 }
 0x1eb   :  { %v8672_v62 = vpop.f32.mrf.mxu2  ;;  %v1148_v57 = vadd.f32 %v7968_v18, %v1147_v22  ;;  %v8701_v22 = vld [vmem:[%s11645_s2] ss:$0 sm:$0xff] }
 0x1ec   :  { %11821 = vst [vmem:[#allocation60_spill] sm:$0xff] %v8672_v62 }
 0x1ed   :  { %v8679_v47 = vmax.f32 %v1148_v57, 0.0 }
 0x1f1   :  { %7304 = vrot.lane.b32.xlu2 %v8175_v60, %s7842_s10  ;;  %v8683_v11 = vpop.f32.mrf.mxu1 }
 0x1f2   :  { %v1150_v19 = vpop.f32.mrf.mxu0  ;;  %11823 = vst [vmem:[#allocation61_spill] sm:$0xff] %v8683_v11 }
 0x1f3   :  { %v1151_v16 = vadd.f32 %v7968_v18, %v1150_v19 }
 0x1f5   :  { %v1571_v23 = vmax.f32 %v1151_v16, 0.0  ;;  %6026 = vmatmul.msk.bf16.gmra.mxu0 %vm731_vm0, %v6949_v54  ;;  %v8689_v16 = vpop.f32.mrf.mxu2 }
 0x1f6   :  { %11824 = vst [vmem:[#allocation62_spill] sm:$0xff] %v8689_v16 }
 0x1f7   :  { %v7298_v50 = vpack.i.bf16 %v11822_v31, %v1571_v23 }
 0x1f9   :  { %7299 = vrot.lane.b32.xlu1 %v7298_v50, %s7841_s24 }
 0x1fa   :  { %v1152_v60 = vpop.f32.mrf.mxu0 }
 0x1fb   :  { %v1153_v48 = vadd.f32 %v7968_v18, %v1152_v60  ;;  %v6950_v18 = vld [vmem:[%s11644_s0 + $0x100] sm:$0xff]  ;;  %v11825_v60 = vmax.f32 %v8464_v37, 0.0 }
 0x1fd   :  { %v8681_v19 = vmax.f32 %v1153_v48, 0.0 }
 0x1ff   :  { %v2866_v54 = vpack.c.bf16 %v8681_v19, %v8679_v47  ;;  %v7308_v27 = vpack.i.bf16 %v8681_v19, %v8679_v47 }
 0x201   :  { %6169 = vmatmul.msk.bf16.gmra.mxu3 %vm2567_vm1, %v2866_v54  ;;  %7319 = vrot.lane.b32.xlu1 %v8564_v30, %s7842_s10  ;;  %v8708_v30 = vld [vmem:[%s11647_s4] ss:$0 sm:$0xff] }
 0x202   :  { %7309 = vrot.lane.b32.xlu0 %v7308_v27, %s7843_s1  ;;  %v1155_v48 = vpop.f32.mrf.mxu0 }
 0x203   :  { %v1156_v31 = vadd.f32 %v8701_v22, %v1155_v48 }
 0x204   :  { %v3292_v48 = vpop.f32.mrf.mxu2 }
 0x205   :  { %v1573_v50 = vmax.f32 %v1156_v31, 0.0  ;;  %6027 = vmatmul.msk.bf16.gmra.mxu0 %vm731_vm0, %v6950_v18 }
 0x207   :  { %v8710_v57 = vpack.i.bf16 %v1573_v50, %v1571_v23  ;;  %v7313_v54 = vpack.i.bf16 %v1573_v50, %v11825_v60  ;;  %v6951_v23 = vld [vmem:[%s11644_s0 + $0x108] sm:$0xff] }
 0x208   :  { %v3159_v27 = vpop.f32.mrf.mxu1 }
 0x209   :  { %v3160_v62 = vadd.f32 %v8708_v30, %v3159_v27  ;;  %7329 = vrot.lane.b32.xlu1 %v8240_v0, %s7842_s10  ;;  %v11828_v0 = vmax.f32 %v8468_v43, 0.0 }
 0x20a   :  { %7314 = vrot.lane.b32.xlu0 %v7313_v54, %s7841_s24  ;;  %v1157_v18 = vpop.f32.mrf.mxu0  ;;  %v1138_v54 = vadd.f32 %v8701_v22, %v8605_v55 }
 0x20b   :  { %v8718_v31 = vadd.f32 %v3292_v48, %v3160_v62  ;;  %v1158_v62 = vadd.f32 %v8701_v22, %v1157_v18  ;;  %v8735_v48 = vadd.f32 %v8701_v22, %v8591_v14 }
 0x20d   :  { %11826 = vst [vmem:[#allocation63_spill] sm:$0xff] %v8718_v31  ;;  %v8738_v31 = vpop.f32.mrf.mxu2  ;;  %v11671_v55 = vmax.f32 %v8735_v48, 0.0 }
 0x20e   :  { %11829 = vst [vmem:[#allocation65_spill] sm:$0xff] %v8738_v31 }
 0x210   :  { %v8725_v60 = vpop.f32.mrf.mxu1 }
 0x211   :  { %11827 = vst [vmem:[#allocation64_spill] sm:$0xff] %v8725_v60  ;;  %v8740_v60 = vmax.f32 %v1158_v62, 0.0 }
 0x212   :  { %v1160_v16 = vpop.f32.mrf.mxu0 }
 0x213   :  { %v1161_v37 = vadd.f32 %v8701_v22, %v1160_v16 }
 0x215   :  { %v1575_v50 = vmax.f32 %v1161_v37, 0.0  ;;  %6028 = vmatmul.msk.bf16.gmra.mxu0 %vm731_vm0, %v6951_v23  ;;  %v1566_v23 = vmax.f32 %v1138_v54, 0.0  ;;  %v6952_v54 = vld [vmem:[%s11644_s0 + $0x110] sm:$0xff] }
 0x217   :  { %v7323_v27 = vpack.i.bf16 %v11828_v0, %v1575_v50 }
 0x218   :  { %v3164_v14 = vpop.f32.mrf.mxu1 }
 0x219   :  { %7324 = vrot.lane.b32.xlu0 %v7323_v27, %s7841_s24  ;;  %v7343_v27 = vpack.i.bf16 %v1566_v23, %v11671_v55  ;;  %v11832_v55 = vmax.f32 %v8272_v40, 0.0  ;;  %v6953_v40 = vld [vmem:[%s11644_s0 + $0x118] sm:$0xff] }
 0x21a   :  { %v1162_v16 = vpop.f32.mrf.mxu0 }
 0x21b   :  { %v1163_v37 = vadd.f32 %v8701_v22, %v1162_v16  ;;  %v3165_v16 = vadd.f32 %v8708_v30, %v3164_v14 }
 0x21d   :  { %v8742_v43 = vmax.f32 %v1163_v37, 0.0 }
 0x21f   :  { %v2869_v18 = vpack.c.bf16 %v8742_v43, %v8740_v60  ;;  %v7333_v0 = vpack.i.bf16 %v8742_v43, %v8740_v60 }
 0x221   :  { %6170 = vmatmul.msk.bf16.gmra.mxu3 %vm2567_vm1, %v2869_v18  ;;  %7334 = vrot.lane.b32.xlu2 %v7333_v0, %s7843_s1  ;;  %v11831_v18 = vmax.f32 %v8547_v42, 0.0  ;;  %v11835_v42 = vmax.f32 %v8629_v58, 0.0  ;;  %v11837_v58 = vmax.f32 %v8550_v45, 0.0  ;;  %v6954_v45 = vld [vmem:[%s11644_s0 + $0x120] sm:$0xff] }
 0x222   :  { %7344 = vrot.lane.b32.xlu0 %v7343_v27, %s7842_s10  ;;  %v1165_v62 = vpop.f32.mrf.mxu0  ;;  %v11833_v27 = vmax.f32 %v8613_v38, 0.0 }
 0x223   :  { %v1166_v37 = vadd.f32 %v8701_v22, %v1165_v62 }
 0x224   :  { %v3297_v31 = vpop.f32.mrf.mxu2  ;;  %v7358_v12 = vpack.i.bf16 %v11833_v27, %v11832_v55 }
 0x225   :  { %v1577_v11 = vmax.f32 %v1166_v37, 0.0  ;;  %v8759_v63 = vadd.f32 %v3297_v31, %v3165_v16  ;;  %6029 = vmatmul.msk.bf16.gmra.mxu0 %vm731_vm0, %v6952_v54  ;;  %v8775_v54 = vpop.f32.mrf.mxu1 }
 0x226   :  { %11834 = vst [vmem:[#allocation67_spill] sm:$0xff] %v8775_v54 }
 0x227   :  { %11830 = vst [vmem:[#allocation66_spill] sm:$0xff] %v8759_v63  ;;  %v8762_v23 = vpack.i.bf16 %v1577_v11, %v1575_v50  ;;  %v7338_v0 = vpack.i.bf16 %v1577_v11, %v11831_v18 }
 0x229   :  { %7339 = vrot.lane.b32.xlu2 %v7338_v0, %s7841_s24 }
 0x22a   :  { %7359 = vrot.lane.b32.xlu0 %v7358_v12, %s7842_s10  ;;  %v1167_v14 = vpop.f32.mrf.mxu0 }
 0x22b   :  { %v1168_v31 = vadd.f32 %v8701_v22, %v1167_v14 }
 0x22c   :  { %v8787_v50 = vpop.f32.mrf.mxu2 }
 0x22d   :  { %v8773_v62 = vmax.f32 %v1168_v31, 0.0  ;;  %11836 = vst [vmem:[#allocation68_spill] sm:$0xff] %v8787_v50  ;;  %v3169_v37 = vpop.f32.mrf.mxu1 }
 0x22e   :  { %v3170_v27 = vadd.f32 %v8708_v30, %v3169_v37 }
 0x22f   :  { %v7348_v11 = vpack.i.bf16 %v11835_v42, %v8773_v62 }
 0x231   :  { %7349 = vrot.lane.b32.xlu1 %v7348_v11, %s7843_s1 }
 0x232   :  { %v1170_v38 = vpop.f32.mrf.mxu0 }
 0x233   :  { %v8785_v12 = vadd.f32 %v8701_v22, %v1170_v38  ;;  %v7275_v38 = vpop.permute.xlu1 %7274 }
 0x235   :  { %v11673_v55 = vmax.f32 %v8785_v12, 0.0  ;;  %6030 = vmatmul.msk.bf16.gmra.mxu0 %vm731_vm0, %v6953_v40 }
 0x237   :  { %v7353_v16 = vpack.i.bf16 %v11837_v58, %v11673_v55  ;;  %v1106_v58 = vadd.f32 %v8701_v22, %v8374_v2 }
 0x239   :  { %7354 = vrot.lane.b32.xlu2 %v7353_v16, %s7841_s24  ;;  %v7276_v16 = vunpack.i.l.bf16 %v7275_v38 }
 0x23a   :  { %v1172_v18 = vpop.f32.mrf.mxu0 }
 0x23b   :  { %v8797_v0 = vadd.f32 %v8701_v22, %v1172_v18  ;;  %v8815_v37 = vpop.permute.xlu2 %7279  ;;  %v1553_v18 = vmax.f32 %v1106_v58, 0.0 }
 0x23d   :  { %v11672_v14 = vmax.f32 %v8797_v0, 0.0  ;;  %v3302_v31 = vpop.f32.mrf.mxu2 }
 0x23e   :  { %v8801_v42 = vadd.f32 %v3302_v31, %v3170_v27  ;;  %v11674_v27 = vunpack.i.l.bf16 %v8815_v37  ;;  %v2712_v31 = vsel %vm2567_vm1, %v1553_v18, %v7276_v16  ;;  %v6955_v16 = vld [vmem:[%s11644_s0 + $0x128] sm:$0xff] }
 0x23f   :  { %v2872_v11 = vpack.c.bf16 %v11672_v14, %v8773_v62  ;;  %v2761_v2 = vsel %vm2611_vm2, %v2712_v31, %v8421_v39 }
 0x240   :  { %11838 = vst [vmem:[#allocation69_spill] sm:$0xff] %v8801_v42  ;;  %v2760_v63 = vsel %vm2611_vm2, %v8530_v34, %v11674_v27 }
 0x241   :  { %6171 = vmatmul.msk.bf16.gmra.mxu3 %vm2567_vm1, %v2872_v11 }
 0x242   :  { %v8810_v40 = vpop.f32.mrf.mxu0 }
 0x245   :  { %6031 = vmatmul.msk.bf16.gmra.mxu0 %vm731_vm0, %v6954_v45 }
 0x24a   :  { %v1177_v11 = vpop.f32.mrf.mxu0 }
 0x24b   :  { %v7285_v14 = vpop.permute.xlu0 %7284  ;;  %v8835_v27 = vadd.f32 %v8701_v22, %v1177_v11 }
 0x24c   :  { %v7287_v55 = vunpack.i.h.bf16 %v7285_v14  ;;  %v7286_v42 = vunpack.i.l.bf16 %v7285_v14  ;;  %v7277_v14 = vunpack.i.h.bf16 %v7275_v38 }
 0x24e   :  { %v2809_v45 = vsel %vm2655_vm3, %v2760_v63, %v7286_v42  ;;  %v2810_v58 = vsel %vm2655_vm3, %v2761_v2, %v7287_v55  ;;  %v2569_v34 = vsel %vm2567_vm1, 0.0, %v7277_v14  ;;  %v11839_v63 = vunpack.i.h.bf16 %v8416_v35  ;;  %v6956_v35 = vld [vmem:[%s11644_s0 + $0x130] sm:$0xff] }
 0x24f   :  { %v2862_v50 = vpack.c.bf16 %v2810_v58, %v2809_v45  ;;  %v11675_v45 = vmax.f32 %v8835_v27, 0.0 }
 0x250   :  { %v2613_v55 = vsel %vm2611_vm2, %v2569_v34, %v11839_v63 }
 0x251   :  { %3306 = vmatmul.bf16.gmra.mxu2 %v2862_v50 }
 0x252   :  { %v8830_v18 = vpop.f32.mrf.mxu0 }
 0x255   :  { %6032 = vmatmul.msk.bf16.gmra.mxu0 %vm731_vm0, %v6955_v16  ;;  %v2663_v16 = vsel %vm2655_vm3, %v2613_v55, %v8449_v5 }
 0x25a   :  { %v1182_v31 = vpop.f32.mrf.mxu0 }
 0x25b   :  { %v1183_v50 = vadd.f32 %v8701_v22, %v1182_v31  ;;  %v7290_v42 = vpop.permute.xlu1 %7289 }
 0x25c   :  { %v7291_v2 = vunpack.i.l.bf16 %v7290_v42 }
 0x25d   :  { %v1584_v58 = vmax.f32 %v1183_v50, 0.0  ;;  %v1111_v50 = vadd.f32 %v8701_v22, %v8405_v53  ;;  %v7292_v53 = vunpack.i.h.bf16 %v7290_v42 }
 0x25e   :  { %v2662_v38 = vsel %vm2655_vm3, %v8456_v20, %v7291_v2  ;;  %v7295_v20 = vpop.permute.xlu2 %7294 }
 0x25f   :  { %v7368_v11 = vpack.i.bf16 %v1584_v58, %v11675_v45  ;;  %v2861_v14 = vpack.c.bf16 %v2663_v16, %v2662_v38  ;;  %v1116_v16 = vadd.f32 %v8701_v22, %v8446_v46 }
 0x261   :  { %7369 = vrot.lane.b32.xlu2 %v7368_v11, %s7842_s10  ;;  %3173 = vmatmul.bf16.gmra.mxu1 %v2861_v14  ;;  %v7296_v11 = vunpack.i.l.bf16 %v7295_v20  ;;  %v6957_v14 = vld [vmem:[%s11644_s0 + $0x138] sm:$0xff] }
 0x262   :  { %v8852_v34 = vpop.f32.mrf.mxu0 }
 0x265   :  { %6033 = vmatmul.msk.bf16.gmra.mxu0 %vm731_vm0, %v6956_v35  ;;  %v7297_v35 = vunpack.i.h.bf16 %v7295_v20 }
 0x266   :  { %v7305_v54 = vpop.permute.xlu2 %7304 }
 0x267   :  { %v7306_v20 = vunpack.i.l.bf16 %v7305_v54 }
 0x269   :  { %7384 = vrot.lane.b32.xlu2 %v8652_v33, %s7842_s10  ;;  %v1555_v33 = vmax.f32 %v1111_v50, 0.0  ;;  %v7307_v50 = vunpack.i.h.bf16 %v7305_v54  ;;  %v2570_v54 = vsel %vm2567_vm1, %v8127_v28, %v7306_v20 }
 0x26a   :  { %v1187_v31 = vpop.f32.mrf.mxu0 }
 0x26b   :  { %v1188_v63 = vadd.f32 %v8701_v22, %v1187_v31  ;;  %v7300_v2 = vpop.permute.xlu1 %7299  ;;  %v1557_v31 = vmax.f32 %v1116_v16, 0.0 }
 0x26c   :  { %v7301_v10 = vunpack.i.l.bf16 %v7300_v2 }
 0x26d   :  { %v1586_v55 = vmax.f32 %v1188_v63, 0.0  ;;  %v2713_v63 = vsel %vm2567_vm1, %v1555_v33, %v7296_v11  ;;  %v2714_v1 = vsel %vm2567_vm1, %v1557_v31, %v7297_v35  ;;  %v2571_v35 = vsel %vm2567_vm1, %v8157_v51, %v7307_v50 }
 0x26e   :  { %v7302_v31 = vunpack.i.h.bf16 %v7300_v2 }
 0x26f   :  { %v8860_v38 = vpack.i.bf16 %v1586_v55, %v1584_v58  ;;  %v11682_v58 = vunpack.i.h.bf16 %v8815_v37 }
 0x271   :  { %v2762_v42 = vsel %vm2611_vm2, %v2713_v63, %v11682_v58 }
 0x272   :  { %v8867_v45 = vpop.f32.mrf.mxu0  ;;  %v2811_v11 = vsel %vm2655_vm3, %v2762_v42, %v7292_v53  ;;  %v11841_v42 = vunpack.i.h.bf16 %v8492_v25 }
 0x273   :  { %v7320_v29 = vpop.permute.xlu1 %7319 }
 0x274   :  { %v8870_v15 = vpop.permute.xlu0 %7309  ;;  %v2615_v51 = vsel %vm2611_vm2, %v2571_v35, %v11841_v42  ;;  %v7321_v35 = vunpack.i.l.bf16 %v7320_v29 }
 0x275   :  { %v11676_v46 = vunpack.i.l.bf16 %v8870_v15  ;;  %6034 = vmatmul.msk.bf16.gmra.mxu0 %vm731_vm0, %v6957_v14 }
 0x277   :  { %v2763_v16 = vsel %vm2611_vm2, %v2714_v1, %v11676_v46 }
 0x278   :  { %v2812_v33 = vsel %vm2655_vm3, %v2763_v16, %v7301_v10  ;;  %v11840_v10 = vunpack.i.l.bf16 %v8492_v25 }
 0x279   :  { %v2865_v59 = vpack.c.bf16 %v2812_v33, %v2811_v11  ;;  %v1121_v33 = vadd.f32 %v8701_v22, %v8487_v17 }
 0x27a   :  { %v1192_v14 = vpop.f32.mrf.mxu0  ;;  %v2614_v16 = vsel %vm2611_vm2, %v2570_v54, %v11840_v10  ;;  %v11681_v10 = vunpack.i.h.bf16 %v8870_v15 }
 0x27b   :  { %v1193_v1 = vadd.f32 %v8701_v22, %v1192_v14  ;;  %3311 = vmatmul.bf16.gmra.mxu2 %v2865_v59  ;;  %v8889_v63 = vpop.permute.xlu2 %7334  ;;  %v2664_v50 = vsel %vm2655_vm3, %v2614_v16, %v7302_v31  ;;  %v6958_v59 = vld [vmem:[%s11644_s0 + $0x140] sm:$0xff]  ;;  %v7330_v25 = vpop.permute.xlu1 %7329  ;;  %v1126_v14 = vadd.f32 %v8701_v22, %v8537_v41  ;;  %v1559_v31 = vmax.f32 %v1121_v33, 0.0 }
 0x27c   :  { %v7315_v46 = vpop.permute.xlu0 %7314  ;;  %v7332_v54 = vunpack.i.h.bf16 %v7330_v25 }
 0x27d   :  { %v1588_v61 = vmax.f32 %v1193_v1, 0.0  ;;  %v7316_v53 = vunpack.i.l.bf16 %v7315_v46  ;;  %v1561_v16 = vmax.f32 %v1126_v14, 0.0  ;;  %v2715_v42 = vsel %vm2567_vm1, %v1559_v31, %v7321_v35 }
 0x27e   :  { %v2573_v17 = vsel %vm2567_vm1, %v8221_v44, %v7332_v54 }
 0x27f   :  { %v2665_v28 = vsel %vm2655_vm3, %v2615_v51, %v7316_v53  ;;  %v8899_v20 = vpack.i.bf16 %v1588_v61, %v1586_v55  ;;  %v7331_v55 = vunpack.i.l.bf16 %v7330_v25  ;;  %v7322_v53 = vunpack.i.h.bf16 %v7320_v29 }
 0x280   :  { %v2864_v2 = vpack.c.bf16 %v2665_v28, %v2664_v50  ;;  %v11677_v51 = vunpack.i.l.bf16 %v8889_v63  ;;  %v7317_v50 = vunpack.i.h.bf16 %v7315_v46  ;;  %v2764_v25 = vsel %vm2611_vm2, %v2715_v42, %v11681_v10 }
 0x281   :  { %v2572_v41 = vsel %vm2567_vm1, %v8186_v7, %v7331_v55  ;;  %v2716_v33 = vsel %vm2567_vm1, %v1561_v16, %v7322_v53  ;;  %v11842_v46 = vunpack.i.l.bf16 %v8574_v8  ;;  %v11843_v55 = vunpack.i.h.bf16 %v8574_v8  ;;  %v6959_v8 = vld [vmem:[%s11644_s0 + $0x148] sm:$0xff] }
 0x282   :  { %3178 = vmatmul.bf16.gmra.mxu1 %v2864_v2  ;;  %v8904_v11 = vpop.f32.mrf.mxu0  ;;  %v2765_v44 = vsel %vm2611_vm2, %v2716_v33, %v11677_v51  ;;  %v2813_v42 = vsel %vm2655_vm3, %v2764_v25, %v7317_v50 }
 0x283   :  { %v7340_v1 = vpop.permute.xlu2 %7339  ;;  %v2616_v54 = vsel %vm2611_vm2, %v2572_v41, %v11842_v46  ;;  %v2617_v31 = vsel %vm2611_vm2, %v2573_v17, %v11843_v55  ;;  %v6960_v46 = vld [vmem:[%s11644_s0 + $0x150] sm:$0xff] }
 0x284   :  { %v7341_v28 = vunpack.i.l.bf16 %v7340_v1 }
 0x285   :  { %6035 = vmatmul.msk.bf16.gmra.mxu0 %vm731_vm0, %v6958_v59 }
 0x286   :  { %v2667_v16 = vsel %vm2655_vm3, %v2617_v31, %v7341_v28  ;;  %v1131_v28 = vadd.f32 %v8701_v22, %v8572_v49 }
 0x28a   :  { %v1197_v2 = vpop.f32.mrf.mxu0 }
 0x28b   :  { %v8919_v59 = vadd.f32 %v8701_v22, %v1197_v2  ;;  %v7325_v29 = vpop.permute.xlu0 %7324 }
 0x28c   :  { %v7327_v14 = vunpack.i.h.bf16 %v7325_v29  ;;  %v7326_v35 = vunpack.i.l.bf16 %v7325_v29 }
 0x28d   :  { %v1590_v7 = vmax.f32 %v8919_v59, 0.0 }
 0x28e   :  { %v2666_v53 = vsel %vm2655_vm3, %v2616_v54, %v7327_v14  ;;  %v2814_v2 = vsel %vm2655_vm3, %v2765_v44, %v7326_v35  ;;  %v1563_v14 = vmax.f32 %v1131_v28, 0.0  ;;  %v11679_v54 = vunpack.i.h.bf16 %v8889_v63 }
 0x28f   :  { %v2867_v29 = vpack.c.bf16 %v2667_v16, %v2666_v53  ;;  %v2868_v33 = vpack.c.bf16 %v2814_v2, %v2813_v42  ;;  %v8941_v51 = vpack.i.bf16 %v1590_v7, %v1588_v61  ;;  %v1136_v61 = vadd.f32 %v8701_v22, %v8598_v21 }
 0x290   :  { %v7342_v42 = vunpack.i.h.bf16 %v7340_v1  ;;  %v6961_v1 = vld [vmem:[%s11644_s0 + $0x158] sm:$0xff] }
 0x291   :  { %3316 = vmatmul.bf16.gmra.mxu2 %v2868_v33  ;;  %v1565_v53 = vmax.f32 %v1136_v61, 0.0 }
 0x292   :  { %3183 = vmatmul.bf16.gmra.mxu1 %v2867_v29  ;;  %v8946_v17 = vpop.f32.mrf.mxu0 }
 0x293   :  { %v8960_v55 = vpop.permute.xlu2 %7354 }
 0x294   :  { %v7345_v41 = vpop.permute.xlu0 %7344  ;;  %v7356_v2 = vunpack.i.l.bf16 %v8960_v55 }
 0x295   :  { %6036 = vmatmul.msk.bf16.gmra.mxu0 %vm731_vm0, %v6959_v8  ;;  %v7346_v25 = vunpack.i.l.bf16 %v7345_v41  ;;  %v7347_v35 = vunpack.i.h.bf16 %v7345_v41 }
 0x297   :  { %v2717_v44 = vsel %vm2567_vm1, %v1563_v14, %v7346_v25  ;;  %v2718_v29 = vsel %vm2567_vm1, %v1565_v53, %v7347_v35 }
 0x298   :  { %v2766_v21 = vsel %vm2611_vm2, %v2717_v44, %v11679_v54  ;;  %v11844_v44 = vmax.f32 %v8735_v48, 0.0 }
 0x299   :  { %v2815_v8 = vsel %vm2655_vm3, %v2766_v21, %v7342_v42  ;;  %v6962_v21 = vld [vmem:[%s11644_s0 + $0x160] sm:$0xff] }
 0x29a   :  { %v8949_v50 = vpop.f32.mrf.mxu0 }
 0x2a2   :  { %v8962_v31 = vpop.f32.mrf.mxu0 }
 0x2a3   :  { %v8964_v49 = vpop.permute.xlu1 %7349 }
 0x2a4   :  { %v11678_v16 = vunpack.i.l.bf16 %v8964_v49 }
 0x2a5   :  { %6037 = vmatmul.msk.bf16.gmra.mxu0 %vm731_vm0, %v6960_v46 }
 0x2a6   :  { %v2767_v33 = vsel %vm2611_vm2, %v2718_v29, %v11678_v16 }
 0x2a7   :  { %v2816_v41 = vsel %vm2655_vm3, %v2767_v33, %v7356_v2  ;;  %v11845_v33 = vmax.f32 %v8835_v27, 0.0  ;;  %v6963_v27 = vld [vmem:[%s11644_s0 + $0x168] sm:$0xff] }
 0x2a8   :  { %v2871_v28 = vpack.c.bf16 %v2816_v41, %v2815_v8 }
 0x2aa   :  { %v8978_v25 = vpop.f32.mrf.mxu0  ;;  %3321 = vmatmul.bf16.gmra.mxu2 %v2871_v28 }
 0x2b2   :  { %v1210_v14 = vpop.f32.mrf.mxu0 }
 0x2b3   :  { %v8984_v61 = vadd.f32 %v8701_v22, %v1210_v14 }
 0x2b5   :  { %v11684_v35 = vmax.f32 %v8984_v61, 0.0  ;;  %6038 = vmatmul.msk.bf16.gmra.mxu0 %vm731_vm0, %v6961_v1 }
 0x2b7   :  { %v7363_v46 = vpack.i.bf16 %v11684_v35, %v11844_v44 }
 0x2b9   :  { %7364 = vrot.lane.b32.xlu1 %v7363_v46, %s7841_s24 }
 0x2ba   :  { %v1212_v53 = vpop.f32.mrf.mxu0 }
 0x2bb   :  { %v1213_v48 = vadd.f32 %v8701_v22, %v1212_v53 }
 0x2bd   :  { %v9003_v1 = vmax.f32 %v1213_v48, 0.0 }
 0x2c2   :  { %v1215_v42 = vpop.f32.mrf.mxu0 }
 0x2c3   :  { %v1216_v2 = vadd.f32 %v8701_v22, %v1215_v42 }
 0x2c5   :  { %v1597_v29 = vmax.f32 %v1216_v2, 0.0  ;;  %6039 = vmatmul.msk.bf16.gmra.mxu0 %vm731_vm0, %v6962_v21  ;;  %v9018_v2 = vpop.f32.mrf.mxu1 }
 0x2c6   :  { %11846 = vst [vmem:[#allocation70_spill] sm:$0xff] %v9018_v2 }
 0x2c7   :  { %v7378_v8 = vpack.i.bf16 %v11845_v33, %v1597_v29 }
 0x2c9   :  { %7379 = vrot.lane.b32.xlu1 %v7378_v8, %s7841_s24  ;;  %v9022_v8 = vpop.f32.mrf.mxu2 }
 0x2ca   :  { %v1217_v41 = vpop.f32.mrf.mxu0  ;;  %11847 = vst [vmem:[#allocation71_spill] sm:$0xff] %v9022_v8 }
 0x2cb   :  { %v1218_v28 = vadd.f32 %v8701_v22, %v1217_v41 }
 0x2cd   :  { %v9005_v14 = vmax.f32 %v1218_v28, 0.0 }
 0x2cf   :  { %v2875_v44 = vpack.c.bf16 %v9005_v14, %v9003_v1  ;;  %v7373_v46 = vpack.i.bf16 %v9005_v14, %v9003_v1 }
 0x2d1   :  { %6172 = vmatmul.msk.bf16.gmra.mxu3 %vm2567_vm1, %v2875_v44  ;;  %7374 = vrot.lane.b32.xlu0 %v7373_v46, %s7843_s1 }
 0x2d2   :  { %v1220_v53 = vpop.f32.mrf.mxu0 }
 0x2d3   :  { %v1221_v21 = vadd.f32 %v8701_v22, %v1220_v53 }
 0x2d4   :  { %v3307_v44 = vpop.f32.mrf.mxu2 }
 0x2d5   :  { %v1599_v42 = vmax.f32 %v1221_v21, 0.0  ;;  %6040 = vmatmul.msk.bf16.gmra.mxu0 %vm731_vm0, %v6963_v27 }
 0x2d7   :  { %v9020_v33 = vpack.i.bf16 %v1599_v42, %v1597_v29  ;;  %v6964_v29 = vld [vmem:[%s11644_s0 + $0x170] sm:$0xff] }
 0x2d9   :  { %7389 = vrot.lane.b32.xlu0 %v8899_v20, %s7842_s10 }
 0x2da   :  { %v1222_v48 = vpop.f32.mrf.mxu0 }
 0x2de   :  { %v3174_v41 = vpop.f32.mrf.mxu1 }
 0x2df   :  { %v3175_v28 = vadd.f32 %v8708_v30, %v3174_v41  ;;  %v9038_v41 = vadd.f32 %v8701_v22, %v8949_v50 }
 0x2e1   :  { %v9027_v46 = vadd.f32 %v3307_v44, %v3175_v28  ;;  %7399 = vrot.lane.b32.xlu0 %v8710_v57, %s7842_s10  ;;  %v1223_v28 = vadd.f32 %v8701_v22, %v1222_v48  ;;  %v11680_v16 = vmax.f32 %v9038_v41, 0.0 }
 0x2e2   :  { %v1225_v27 = vpop.f32.mrf.mxu0 }
 0x2e3   :  { %11848 = vst [vmem:[#allocation72_spill] sm:$0xff] %v9027_v46  ;;  %v1226_v53 = vadd.f32 %v8701_v22, %v1225_v27  ;;  %v9044_v54 = vmax.f32 %v1223_v28, 0.0  ;;  %v7413_v48 = vpack.i.bf16 %v11680_v16, %v1590_v7  ;;  %v9068_v7 = vpop.f32.mrf.mxu2 }
 0x2e4   :  { %11850 = vst [vmem:[#allocation74_spill] sm:$0xff] %v9068_v7 }
 0x2e5   :  { %v1601_v21 = vmax.f32 %v1226_v53, 0.0  ;;  %6041 = vmatmul.msk.bf16.gmra.mxu0 %vm731_vm0, %v6964_v29  ;;  %v6965_v29 = vld [vmem:[%s11644_s0 + $0x178] sm:$0xff] }
 0x2e6   :  { %v9064_v59 = vpop.f32.mrf.mxu1 }
 0x2e7   :  { %v7393_v20 = vpack.i.bf16 %v1601_v21, %v1599_v42  ;;  %11849 = vst [vmem:[#allocation73_spill] sm:$0xff] %v9064_v59 }
 0x2e9   :  { %7394 = vrot.lane.b32.xlu2 %v7393_v20, %s7841_s24 }
 0x2ea   :  { %v1227_v57 = vpop.f32.mrf.mxu0 }
 0x2eb   :  { %v1228_v44 = vadd.f32 %v8701_v22, %v1227_v57 }
 0x2ed   :  { %v9046_v27 = vmax.f32 %v1228_v44, 0.0 }
 0x2ef   :  { %v2878_v42 = vpack.c.bf16 %v9046_v27, %v9044_v54  ;;  %v7403_v50 = vpack.i.bf16 %v9046_v27, %v9044_v54 }
 0x2f1   :  { %6173 = vmatmul.msk.bf16.gmra.mxu3 %vm2567_vm1, %v2878_v42  ;;  %7404 = vrot.lane.b32.xlu1 %v7403_v50, %s7843_s1 }
 0x2f2   :  { %7414 = vrot.lane.b32.xlu2 %v7413_v48, %s7842_s10  ;;  %v1230_v53 = vpop.f32.mrf.mxu0 }
 0x2f3   :  { %v1231_v20 = vadd.f32 %v8701_v22, %v1230_v53 }
 0x2f5   :  { %v1603_v28 = vmax.f32 %v1231_v20, 0.0  ;;  %6042 = vmatmul.msk.bf16.gmra.mxu0 %vm731_vm0, %v6965_v29  ;;  %v6966_v29 = vld [vmem:[%s11644_s0 + $0x180] sm:$0xff] }
 0x2f7   :  { %v9066_v57 = vpack.i.bf16 %v1603_v28, %v1601_v21 }
 0x2f9   :  { %7409 = vrot.lane.b32.xlu1 %v8860_v38, %s7841_s24 }
 0x2fa   :  { %7424 = vrot.lane.b32.xlu2 %v8762_v23, %s7842_s10  ;;  %v1232_v44 = vpop.f32.mrf.mxu0 }
 0x2fe   :  { %v3312_v48 = vpop.f32.mrf.mxu2 }
 0x2ff   :  { %v3179_v42 = vpop.f32.mrf.mxu1 }
 0x300   :  { %v3180_v50 = vadd.f32 %v8708_v30, %v3179_v42  ;;  %v1233_v42 = vadd.f32 %v8701_v22, %v1232_v44 }
 0x302   :  { %v9078_v53 = vadd.f32 %v3312_v48, %v3180_v50  ;;  %v1235_v21 = vpop.f32.mrf.mxu0 }
 0x303   :  { %v9081_v20 = vadd.f32 %v8701_v22, %v1235_v21  ;;  %v9094_v21 = vmax.f32 %v1233_v42, 0.0 }
 0x304   :  { %11851 = vst [vmem:[#allocation75_spill] sm:$0xff] %v9078_v53  ;;  %v7360_v53 = vpop.permute.xlu0 %7359 }
 0x305   :  { %v11683_v38 = vmax.f32 %v9081_v20, 0.0  ;;  %6043 = vmatmul.msk.bf16.gmra.mxu0 %vm731_vm0, %v6966_v29  ;;  %11854 = vst [vmem:[#allocation78_spill] sm:$0xff] %v9094_v21 }
 0x306   :  { %v9092_v48 = vpop.f32.mrf.mxu2 }
 0x307   :  { %v7418_v23 = vpack.i.bf16 %v11683_v38, %v1603_v28  ;;  %v9087_v16 = vpop.f32.mrf.mxu1  ;;  %11853 = vst [vmem:[#allocation77_spill] sm:$0xff] %v9092_v48 }
 0x308   :  { %11852 = vst [vmem:[#allocation76_spill] sm:$0xff] %v9087_v16 }
 0x309   :  { %7419 = vrot.lane.b32.xlu1 %v7418_v23, %s7841_s24 }
 0x30a   :  { %v1237_v10 = vpop.f32.mrf.mxu0 }
 0x30b   :  { %v1238_v50 = vadd.f32 %v8701_v22, %v1237_v10  ;;  %v6967_v10 = vld [vmem:[%s11644_s0 + $0x188] sm:$0xff] }
 0x30d   :  { %v9096_v58 = vmax.f32 %v1238_v50, 0.0 }
 0x30f   :  { %v2881_v29 = vpack.c.bf16 %v9096_v58, %v9094_v21  ;;  %v7428_v28 = vpack.i.bf16 %v9096_v58, %v9094_v21  ;;  %v3184_v38 = vpop.f32.mrf.mxu1 }
 0x310   :  { %v3185_v23 = vadd.f32 %v8708_v30, %v3184_v38  ;;  %v6968_v30 = vld [vmem:[%s11644_s0 + $0x190] sm:$0xff] }
 0x311   :  { %6174 = vmatmul.msk.bf16.gmra.mxu3 %vm2567_vm1, %v2881_v29  ;;  %7429 = vrot.lane.b32.xlu0 %v7428_v28, %s7843_s1  ;;  %v11856_v29 = vmax.f32 %v8785_v12, 0.0  ;;  %v11857_v28 = vmax.f32 %v8984_v61, 0.0  ;;  %v7352_v61 = vunpack.i.h.bf16 %v8964_v49 }
 0x312   :  { %v9107_v44 = vpop.f32.mrf.mxu0 }
 0x313   :  { %v7438_v46 = vpack.i.bf16 %v11857_v28, %v11856_v29 }
 0x314   :  { %v3317_v42 = vpop.f32.mrf.mxu2 }
 0x315   :  { %v9110_v50 = vadd.f32 %v3317_v42, %v3185_v23  ;;  %6044 = vmatmul.msk.bf16.gmra.mxu0 %vm731_vm0, %v6967_v10  ;;  %v7361_v10 = vunpack.i.l.bf16 %v7360_v53  ;;  %v7362_v23 = vunpack.i.h.bf16 %v7360_v53  ;;  %v1208_v42 = vadd.f32 %v8701_v22, %v8978_v25 }
 0x317   :  { %11855 = vst [vmem:[#allocation79_spill] sm:$0xff] %v9110_v50  ;;  %v2574_v12 = vsel %vm2567_vm1, %v8254_v13, %v7361_v10  ;;  %v11858_v50 = vunpack.i.l.bf16 %v8815_v37  ;;  %v2575_v53 = vsel %vm2567_vm1, %v8302_v24, %v7362_v23  ;;  %v1594_v2 = vmax.f32 %v1208_v42, 0.0  ;;  %v6969_v24 = vld [vmem:[%s11644_s0 + $0x198] sm:$0xff] }
 0x318   :  { %v2619_v10 = vsel %vm2611_vm2, %v2575_v53, %v7352_v61  ;;  %v11859_v61 = vunpack.i.h.bf16 %v8815_v37  ;;  %v11860_v53 = vunpack.i.l.bf16 %v8870_v15 }
 0x319   :  { %7434 = vrot.lane.b32.xlu0 %v8941_v51, %s7841_s24  ;;  %v7370_v51 = vpop.permute.xlu2 %7369  ;;  %v2618_v8 = vsel %vm2611_vm2, %v2574_v12, %v11858_v50 }
 0x31a   :  { %v9115_v35 = vpop.f32.mrf.mxu0  ;;  %v7371_v37 = vunpack.i.l.bf16 %v7370_v51 }
 0x321   :  { %7439 = vrot.lane.b32.xlu0 %v7438_v46, %s7842_s10  ;;  %v7385_v50 = vpop.permute.xlu2 %7384 }
 0x322   :  { %v9125_v38 = vpop.f32.mrf.mxu0  ;;  %v7386_v23 = vunpack.i.l.bf16 %v7385_v50 }
 0x324   :  { %v2576_v12 = vsel %vm2567_vm1, 0.0, %v7386_v23  ;;  %v7372_v23 = vunpack.i.h.bf16 %v7370_v51 }
 0x325   :  { %6045 = vmatmul.msk.bf16.gmra.mxu0 %vm731_vm0, %v6968_v30  ;;  %v7357_v30 = vunpack.i.h.bf16 %v8960_v55 }
 0x327   :  { %v2668_v7 = vsel %vm2655_vm3, %v2618_v8, %v7357_v30  ;;  %v7387_v8 = vunpack.i.h.bf16 %v7385_v50  ;;  %v1176_v30 = vadd.f32 %v8701_v22, %v8810_v40  ;;  %v6970_v40 = vld [vmem:[%s11644_s0 + $0x1a0] sm:$0xff] }
 0x32a   :  { %v1247_v46 = vpop.f32.mrf.mxu0 }
 0x32b   :  { %v9134_v29 = vadd.f32 %v8701_v22, %v1247_v46  ;;  %v7365_v28 = vpop.permute.xlu1 %7364 }
 0x32c   :  { %v7366_v13 = vunpack.i.l.bf16 %v7365_v28 }
 0x32d   :  { %v11688_v25 = vmax.f32 %v9134_v29, 0.0 }
 0x32e   :  { %v2669_v46 = vsel %vm2655_vm3, %v2619_v10, %v7366_v13 }
 0x32f   :  { %v7443_v48 = vpack.i.bf16 %v11688_v25, %v1594_v2  ;;  %v2870_v59 = vpack.c.bf16 %v2669_v46, %v2668_v7  ;;  %v2577_v2 = vsel %vm2567_vm1, %v8634_v9, %v7387_v8  ;;  %v1181_v9 = vadd.f32 %v8701_v22, %v8830_v18 }
 0x330   :  { %v2621_v13 = vsel %vm2611_vm2, %v2577_v2, %v11860_v53 }
 0x331   :  { %7444 = vrot.lane.b32.xlu1 %v7443_v48, %s7842_s10  ;;  %3188 = vmatmul.bf16.gmra.mxu1 %v2870_v59  ;;  %v2620_v59 = vsel %vm2611_vm2, %v2576_v12, %v11859_v61  ;;  %v1583_v12 = vmax.f32 %v1181_v9, 0.0  ;;  %v7367_v61 = vunpack.i.h.bf16 %v7365_v28 }
 0x332   :  { %v9152_v55 = vpop.f32.mrf.mxu0  ;;  %v2670_v10 = vsel %vm2655_vm3, %v2620_v59, %v8449_v5 }
 0x333   :  { %v2720_v18 = vsel %vm2567_vm1, %v1583_v12, %v7372_v23 }
 0x335   :  { %6046 = vmatmul.msk.bf16.gmra.mxu0 %vm731_vm0, %v6969_v24  ;;  %v1581_v24 = vmax.f32 %v1176_v30, 0.0 }
 0x337   :  { %v2719_v2 = vsel %vm2567_vm1, %v1581_v24, %v7371_v37 }
 0x338   :  { %v2768_v30 = vsel %vm2611_vm2, %v2719_v2, %v8421_v39  ;;  %v1186_v2 = vadd.f32 %v8701_v22, %v8852_v34 }
 0x33a   :  { %v1252_v7 = vpop.f32.mrf.mxu0 }
 0x33b   :  { %v7380_v48 = vpop.permute.xlu1 %7379 }
 0x33c   :  { %v7382_v42 = vunpack.i.h.bf16 %v7380_v48  ;;  %v7381_v53 = vunpack.i.l.bf16 %v7380_v48 }
 0x33e   :  { %v2671_v46 = vsel %vm2655_vm3, %v2621_v13, %v7382_v42  ;;  %v2817_v13 = vsel %vm2655_vm3, %v2768_v30, %v7367_v61 }
 0x33f   :  { %v2873_v50 = vpack.c.bf16 %v2671_v46, %v2670_v10  ;;  %v9190_v46 = vadd.f32 %v8701_v22, %v1252_v7  ;;  %v6971_v7 = vld [vmem:[%s11644_s0 + $0x1a8] sm:$0xff] }
 0x341   :  { %3193 = vmatmul.bf16.gmra.mxu1 %v2873_v50  ;;  %v11687_v37 = vmax.f32 %v9190_v46, 0.0 }
 0x342   :  { %v9174_v8 = vpop.f32.mrf.mxu0 }
 0x343   :  { %v9177_v59 = vpop.permute.xlu0 %7374 }
 0x344   :  { %v11685_v42 = vunpack.i.l.bf16 %v9177_v59 }
 0x345   :  { %6047 = vmatmul.msk.bf16.gmra.mxu0 %vm731_vm0, %v6970_v40 }
 0x346   :  { %v2769_v51 = vsel %vm2611_vm2, %v2720_v18, %v11685_v42  ;;  %v1585_v18 = vmax.f32 %v1186_v2, 0.0 }
 0x347   :  { %v2818_v28 = vsel %vm2655_vm3, %v2769_v51, %v7381_v53  ;;  %v1191_v53 = vadd.f32 %v8701_v22, %v8867_v45 }
 0x348   :  { %v2874_v10 = vpack.c.bf16 %v2818_v28, %v2817_v13  ;;  %v6972_v13 = vld [vmem:[%s11644_s0 + $0x1b0] sm:$0xff]  ;;  %v7395_v28 = vpop.permute.xlu2 %7394 }
 0x349   :  { %v7396_v2 = vunpack.i.l.bf16 %v7395_v28 }
 0x34a   :  { %v1257_v9 = vpop.f32.mrf.mxu0  ;;  %3326 = vmatmul.bf16.gmra.mxu2 %v2874_v10  ;;  %v11690_v10 = vunpack.i.h.bf16 %v9177_v59 }
 0x34b   :  { %v9193_v48 = vadd.f32 %v8701_v22, %v1257_v9  ;;  %v7390_v40 = vpop.permute.xlu0 %7389  ;;  %v1587_v9 = vmax.f32 %v1191_v53, 0.0 }
 0x34c   :  { %v7391_v61 = vunpack.i.l.bf16 %v7390_v40  ;;  %v7392_v51 = vunpack.i.h.bf16 %v7390_v40  ;;  %v7397_v40 = vunpack.i.h.bf16 %v7395_v28 }
 0x34d   :  { %v11686_v50 = vmax.f32 %v9193_v48, 0.0 }
 0x34e   :  { %v2721_v30 = vsel %vm2567_vm1, %v1585_v18, %v7391_v61  ;;  %v2722_v61 = vsel %vm2567_vm1, %v1587_v9, %v7392_v51 }
 0x34f   :  { %v7463_v24 = vpack.i.bf16 %v11686_v50, %v11687_v37  ;;  %v2770_v45 = vsel %vm2611_vm2, %v2721_v30, %v11690_v10 }
 0x350   :  { %v2819_v50 = vsel %vm2655_vm3, %v2770_v45, %v7396_v2 }
 0x351   :  { %7464 = vrot.lane.b32.xlu0 %v7463_v24, %s7842_s10 }
 0x352   :  { %v9205_v23 = vpop.f32.mrf.mxu0 }
 0x353   :  { %v7400_v24 = vpop.permute.xlu0 %7399 }
 0x354   :  { %v7402_v18 = vunpack.i.h.bf16 %v7400_v24  ;;  %v7401_v42 = vunpack.i.l.bf16 %v7400_v24 }
 0x355   :  { %6048 = vmatmul.msk.bf16.gmra.mxu0 %vm731_vm0, %v6971_v7 }
 0x356   :  { %v2579_v30 = vsel %vm2567_vm1, %v8681_v19, %v7402_v18  ;;  %v2578_v51 = vsel %vm2567_vm1, %v8679_v47, %v7401_v42  ;;  %v11862_v19 = vunpack.i.l.bf16 %v8889_v63 }
 0x358   :  { %v2623_v47 = vsel %vm2611_vm2, %v2579_v30, %v11862_v19 }
 0x359   :  { %7474 = vrot.lane.b32.xlu0 %v9020_v33, %s7842_s10 }
 0x35a   :  { %v1262_v12 = vpop.f32.mrf.mxu0 }
 0x35b   :  { %v9235_v16 = vadd.f32 %v8701_v22, %v1262_v12 }
 0x362   :  { %v9219_v33 = vpop.f32.mrf.mxu0 }
 0x363   :  { %v9221_v34 = vpop.permute.xlu1 %7404 }
 0x364   :  { %v11689_v7 = vunpack.i.l.bf16 %v9221_v34 }
 0x365   :  { %6049 = vmatmul.msk.bf16.gmra.mxu0 %vm731_vm0, %v6972_v13 }
 0x366   :  { %v2771_v53 = vsel %vm2611_vm2, %v2722_v61, %v11689_v7 }
 0x367   :  { %v2820_v37 = vsel %vm2655_vm3, %v2771_v53, %v7397_v40  ;;  %v11692_v40 = vmax.f32 %v9235_v16, 0.0  ;;  %v7415_v53 = vpop.permute.xlu2 %7414 }
 0x368   :  { %v2877_v25 = vpack.c.bf16 %v2820_v37, %v2819_v50  ;;  %v11861_v50 = vunpack.i.h.bf16 %v8870_v15  ;;  %v6973_v15 = vld [vmem:[%s11644_s0 + $0x1b8] sm:$0xff] }
 0x36a   :  { %v1267_v13 = vpop.f32.mrf.mxu0  ;;  %3331 = vmatmul.bf16.gmra.mxu2 %v2877_v25  ;;  %v2622_v12 = vsel %vm2611_vm2, %v2578_v51, %v11861_v50  ;;  %v9266_v51 = vpop.f32.mrf.mxu3  ;;  %v7416_v50 = vunpack.i.l.bf16 %v7415_v53 }
 0x36b   :  { %v9242_v28 = vadd.f32 %v8701_v22, %v1267_v13  ;;  %v7410_v9 = vpop.permute.xlu1 %7409  ;;  %11863 = vst [vmem:[#allocation80_spill] sm:$0xff] %v9266_v51  ;;  %v1196_v13 = vadd.f32 %v8701_v22, %v8904_v11 }
 0x36c   :  { %v7412_v24 = vunpack.i.h.bf16 %v7410_v9  ;;  %v7411_v45 = vunpack.i.l.bf16 %v7410_v9  ;;  %v1201_v9 = vadd.f32 %v8701_v22, %v8946_v17 }
 0x36d   :  { %v11691_v37 = vmax.f32 %v9242_v28, 0.0 }
 0x36e   :  { %v2672_v25 = vsel %vm2655_vm3, %v2622_v12, %v7411_v45  ;;  %v2673_v42 = vsel %vm2655_vm3, %v2623_v47, %v7412_v24  ;;  %v7417_v45 = vunpack.i.h.bf16 %v7415_v53  ;;  %v6974_v12 = vld [vmem:[%s11644_s0 + $0x1c0] sm:$0xff] }
 0x36f   :  { %v2876_v2 = vpack.c.bf16 %v2673_v42, %v2672_v25  ;;  %v9258_v61 = vpack.i.bf16 %v11691_v37, %v11692_v40  ;;  %v1589_v25 = vmax.f32 %v1196_v13, 0.0  ;;  %v1591_v42 = vmax.f32 %v1201_v9, 0.0 }
 0x370   :  { %v11865_v13 = vunpack.i.h.bf16 %v9221_v34 }
 0x371   :  { %3198 = vmatmul.bf16.gmra.mxu1 %v2876_v2  ;;  %v7425_v2 = vpop.permute.xlu2 %7424  ;;  %v2724_v17 = vsel %vm2567_vm1, %v1591_v42, %v7417_v45  ;;  %v2723_v53 = vsel %vm2567_vm1, %v1589_v25, %v7416_v50 }
 0x372   :  { %v9263_v18 = vpop.f32.mrf.mxu0  ;;  %v9284_v37 = vpop.f32.mrf.mxu3  ;;  %v7427_v40 = vunpack.i.h.bf16 %v7425_v2  ;;  %v7426_v19 = vunpack.i.l.bf16 %v7425_v2  ;;  %v2772_v9 = vsel %vm2611_vm2, %v2723_v53, %v11865_v13 }
 0x373   :  { %11864 = vst [vmem:[#allocation81_spill] sm:$0xff] %v9284_v37 }
 0x374   :  { %v2580_v25 = vsel %vm2567_vm1, %v8740_v60, %v7426_v19 }
 0x375   :  { %6050 = vmatmul.msk.bf16.gmra.mxu0 %vm731_vm0, %v6973_v15 }
 0x37a   :  { %v1272_v30 = vpop.f32.mrf.mxu0 }
 0x37b   :  { %v7420_v24 = vpop.permute.xlu1 %7419 }
 0x37c   :  { %v7421_v15 = vunpack.i.l.bf16 %v7420_v24  ;;  %v7422_v10 = vunpack.i.h.bf16 %v7420_v24  ;;  %v9295_v24 = vadd.f32 %v8701_v22, %v1272_v30 }
 0x37e   :  { %v2821_v21 = vsel %vm2655_vm3, %v2772_v9, %v7421_v15  ;;  %v11695_v15 = vmax.f32 %v9295_v24, 0.0 }
 0x382   :  { %v9276_v47 = vpop.f32.mrf.mxu0 }
 0x383   :  { %v9278_v7 = vpop.permute.xlu0 %7429 }
 0x384   :  { %v11694_v11 = vunpack.i.l.bf16 %v9278_v7 }
 0x385   :  { %6051 = vmatmul.msk.bf16.gmra.mxu0 %vm731_vm0, %v6974_v12  ;;  %v2581_v12 = vsel %vm2567_vm1, %v8742_v43, %v7427_v40 }
 0x386   :  { %v2773_v51 = vsel %vm2611_vm2, %v2724_v17, %v11694_v11 }
 0x387   :  { %v2822_v45 = vsel %vm2655_vm3, %v2773_v51, %v7422_v10  ;;  %v11867_v51 = vunpack.i.l.bf16 %v8964_v49  ;;  %v6975_v49 = vld [vmem:[%s11644_s0 + $0x1c8] sm:$0xff] }
 0x388   :  { %v2880_v50 = vpack.c.bf16 %v2822_v45, %v2821_v21  ;;  %v11866_v21 = vunpack.i.h.bf16 %v8889_v63  ;;  %v9315_v45 = vpop.f32.mrf.mxu3  ;;  %v9319_v63 = vadd.f32 %v8701_v22, %v9107_v44  ;;  %v9332_v44 = vld [vmem:[%s11645_s2] ss:$0 sm:$0xff] }
 0x389   :  { %v2625_v43 = vsel %vm2611_vm2, %v2581_v12, %v11867_v51  ;;  %v11869_v51 = vmax.f32 %v8797_v0, 0.0  ;;  %v11871_v0 = vmax.f32 %v9038_v41, 0.0 }
 0x38a   :  { %v1277_v42 = vpop.f32.mrf.mxu0  ;;  %3336 = vmatmul.bf16.gmra.mxu2 %v2880_v50  ;;  %v2624_v30 = vsel %vm2611_vm2, %v2580_v25, %v11866_v21  ;;  %v11697_v25 = vmax.f32 %v9319_v63, 0.0 }
 0x38b   :  { %v1278_v2 = vadd.f32 %v8701_v22, %v1277_v42  ;;  %v7435_v53 = vpop.permute.xlu0 %7434 }
 0x38c   :  { %v7437_v17 = vunpack.i.h.bf16 %v7435_v53  ;;  %v7436_v13 = vunpack.i.l.bf16 %v7435_v53  ;;  %v9336_v53 = vadd.f32 %v9332_v44, %v9115_v35 }
 0x38d   :  { %v1622_v10 = vmax.f32 %v1278_v2, 0.0 }
 0x38e   :  { %v2674_v60 = vsel %vm2655_vm3, %v2624_v30, %v7436_v13  ;;  %v2675_v40 = vsel %vm2655_vm3, %v2625_v43, %v7437_v17  ;;  %v6976_v43 = vld [vmem:[%s11644_s0 + $0x1d0] sm:$0xff] }
 0x38f   :  { %v2879_v19 = vpack.c.bf16 %v2675_v40, %v2674_v60  ;;  %v9313_v9 = vpack.i.bf16 %v1622_v10, %v11695_v15  ;;  %v11696_v10 = vmax.f32 %v9336_v53, 0.0 }
 0x391   :  { %3203 = vmatmul.bf16.gmra.mxu1 %v2879_v19 }
 0x392   :  { %v1280_v50 = vpop.f32.mrf.mxu0 }
 0x393   :  { %v1281_v12 = vadd.f32 %v8701_v22, %v1280_v50  ;;  %v9339_v22 = vpop.f32.mrf.mxu3 }
 0x394   :  { %11868 = vst [vmem:[#allocation82_spill] sm:$0xff] %v9339_v22 }
 0x395   :  { %v1623_v42 = vmax.f32 %v1281_v12, 0.0  ;;  %6052 = vmatmul.msk.bf16.gmra.mxu0 %vm731_vm0, %v6975_v49 }
 0x397   :  { %v7448_v2 = vpack.i.bf16 %v1623_v42, %v11697_v25 }
 0x399   :  { %7449 = vrot.lane.b32.xlu2 %v7448_v2, %s7841_s24 }
 0x39a   :  { %v1282_v17 = vpop.f32.mrf.mxu0 }
 0x39b   :  { %v1283_v13 = vadd.f32 %v9332_v44, %v1282_v17  ;;  %v9357_v19 = vpop.f32.mrf.mxu3 }
 0x39c   :  { %11870 = vst [vmem:[#allocation83_spill] sm:$0xff] %v9357_v19 }
 0x39d   :  { %v9343_v21 = vmax.f32 %v1283_v13, 0.0  ;;  %v9367_v13 = vpop.f32.mrf.mxu1 }
 0x39f   :  { %v2884_v30 = vpack.c.bf16 %v9343_v21, %v11696_v10  ;;  %v7453_v35 = vpack.i.bf16 %v9343_v21, %v11869_v51 }
 0x3a1   :  { %6175 = vmatmul.msk.bf16.gmra.mxu3 %vm2567_vm1, %v2884_v30  ;;  %7454 = vrot.lane.b32.xlu1 %v7453_v35, %s7843_s1  ;;  %v6977_v30 = vld [vmem:[%s11644_s0 + $0x1d8] sm:$0xff]  ;;  %v9372_v35 = vpop.f32.mrf.mxu2 }
 0x3a2   :  { %v1285_v60 = vpop.f32.mrf.mxu0  ;;  %11873 = vst [vmem:[#allocation85_spill] sm:$0xff] %v9372_v35 }
 0x3a3   :  { %v1286_v40 = vadd.f32 %v9332_v44, %v1285_v60  ;;  %v9365_v17 = vpop.f32.mrf.mxu3 }
 0x3a4   :  { %11872 = vst [vmem:[#allocation84_spill] sm:$0xff] %v9365_v17 }
 0x3a5   :  { %v1625_v49 = vmax.f32 %v1286_v40, 0.0  ;;  %6053 = vmatmul.msk.bf16.gmra.mxu0 %vm731_vm0, %v6976_v43  ;;  %v11875_v40 = vmax.f32 %v9134_v29, 0.0 }
 0x3a7   :  { %v9360_v50 = vpack.i.bf16 %v1625_v49, %v1623_v42  ;;  %v7458_v12 = vpack.i.bf16 %v1625_v49, %v11871_v0 }
 0x3a9   :  { %7459 = vrot.lane.b32.xlu2 %v7458_v12, %s7841_s24  ;;  %v9384_v11 = vpop.f32.mrf.mxu2 }
 0x3aa   :  { %v1287_v2 = vpop.f32.mrf.mxu0  ;;  %11876 = vst [vmem:[#allocation87_spill] sm:$0xff] %v9384_v11  ;;  %v11884_v11 = vmax.f32 %v9193_v48, 0.0 }
 0x3ab   :  { %v9378_v60 = vpop.f32.mrf.mxu3  ;;  %v1288_v0 = vadd.f32 %v9332_v44, %v1287_v2 }
 0x3ae   :  { %v9375_v43 = vpop.f32.mrf.mxu1 }
 0x3af   :  { %11874 = vst [vmem:[#allocation86_spill] sm:$0xff] %v9375_v43 }
 0x3b2   :  { %v1290_v51 = vpop.f32.mrf.mxu0 }
 0x3b3   :  { %v1291_v42 = vadd.f32 %v9332_v44, %v1290_v51  ;;  %v9387_v51 = vmax.f32 %v1288_v0, 0.0  ;;  %v9407_v0 = vpop.f32.mrf.mxu2 }
 0x3b4   :  { %11880 = vst [vmem:[#allocation91_spill] sm:$0xff] %v9407_v0 }
 0x3b5   :  { %v1627_v41 = vmax.f32 %v1291_v42, 0.0  ;;  %6054 = vmatmul.msk.bf16.gmra.mxu0 %vm731_vm0, %v6977_v30  ;;  %11877 = vst [vmem:[#allocation88_spill] sm:$0xff] %v9387_v51  ;;  %v9391_v42 = vpop.f32.mrf.mxu3 }
 0x3b6   :  { %11879 = vst [vmem:[#allocation90_spill] sm:$0xff] %v9391_v42  ;;  %v9393_v30 = vpop.f32.mrf.mxu1 }
 0x3b7   :  { %v7468_v49 = vpack.i.bf16 %v11875_v40, %v1627_v41  ;;  %v6978_v40 = vld [vmem:[%s11644_s0 + $0x1e0] sm:$0xff] }
 0x3b9   :  { %7469 = vrot.lane.b32.xlu2 %v7468_v49, %s7841_s24 }
 0x3ba   :  { %v1292_v12 = vpop.f32.mrf.mxu0 }
 0x3bb   :  { %v1293_v15 = vadd.f32 %v9332_v44, %v1292_v12 }
 0x3bd   :  { %v9389_v10 = vmax.f32 %v1293_v15, 0.0  ;;  %v9414_v37 = vpop.f32.mrf.mxu3 }
 0x3be   :  { %v3194_v22 = vpop.f32.mrf.mxu1 }
 0x3bf   :  { %11878 = vst [vmem:[#allocation89_spill] sm:$0xff] %v9389_v10  ;;  %v2887_v29 = vpack.c.bf16 %v9389_v10, %v9387_v51  ;;  %v7478_v2 = vpack.i.bf16 %v9389_v10, %v9387_v51  ;;  %v11918_v10 = vld [vmem:[#allocation43_spill] sm:$0xff] }
 0x3c0   :  { %v9658_v35 = vadd.f32 %v9332_v44, %v11918_v10 }
 0x3c1   :  { %6176 = vmatmul.msk.bf16.gmra.mxu3 %vm2567_vm1, %v2887_v29  ;;  %7479 = vrot.lane.b32.xlu1 %v7478_v2, %s7843_s1  ;;  %v11881_v29 = vmax.f32 %v9190_v46, 0.0 }
 0x3c2   :  { %7489 = vrot.lane.b32.xlu2 %v9258_v61, %s7842_s10  ;;  %v1295_v15 = vpop.f32.mrf.mxu0 }
 0x3c3   :  { %v1296_v49 = vadd.f32 %v9332_v44, %v1295_v15  ;;  %v9422_v15 = vld [vmem:[%s11647_s4] ss:$0 sm:$0xff] }
 0x3c5   :  { %v1629_v12 = vmax.f32 %v1296_v49, 0.0  ;;  %6055 = vmatmul.msk.bf16.gmra.mxu0 %vm731_vm0, %v6978_v40  ;;  %v9427_v46 = vpop.f32.mrf.mxu3 }
 0x3c6   :  { %11883 = vst [vmem:[#allocation93_spill] sm:$0xff] %v9427_v46 }
 0x3c7   :  { %v9410_v25 = vpack.i.bf16 %v1629_v12, %v1627_v41  ;;  %v7483_v2 = vpack.i.bf16 %v1629_v12, %v11881_v29  ;;  %v3195_v41 = vadd.f32 %v9422_v15, %v3194_v22  ;;  %v6979_v12 = vld [vmem:[%s11644_s0 + $0x1e8] sm:$0xff] }
 0x3c9   :  { %7484 = vrot.lane.b32.xlu1 %v7483_v2, %s7841_s24 }
 0x3ca   :  { %7499 = vrot.lane.b32.xlu2 %v9066_v57, %s7842_s10  ;;  %v1297_v61 = vpop.f32.mrf.mxu0 }
 0x3cb   :  { %v1298_v22 = vadd.f32 %v9332_v44, %v1297_v61  ;;  %v9457_v61 = vadd.f32 %v9332_v44, %v8554_v6 }
 0x3cd   :  { %v3327_v40 = vpop.f32.mrf.mxu2  ;;  %v9441_v42 = vmax.f32 %v1298_v22, 0.0  ;;  %v1358_v22 = vadd.f32 %v9332_v44, %v8261_v4 }
 0x3ce   :  { %v9425_v49 = vadd.f32 %v3327_v40, %v3195_v41  ;;  %v9438_v41 = vpop.f32.mrf.mxu3 }
 0x3cf   :  { %11885 = vst [vmem:[#allocation94_spill] sm:$0xff] %v9441_v42 }
 0x3d0   :  { %11882 = vst [vmem:[#allocation92_spill] sm:$0xff] %v9425_v49 }
 0x3d2   :  { %v1300_v29 = vpop.f32.mrf.mxu0 }
 0x3d3   :  { %v1301_v57 = vadd.f32 %v9332_v44, %v1300_v29 }
 0x3d5   :  { %v1631_v2 = vmax.f32 %v1301_v57, 0.0  ;;  %6056 = vmatmul.msk.bf16.gmra.mxu0 %vm731_vm0, %v6979_v12  ;;  %v1353_v57 = vadd.f32 %v9332_v44, %v8228_v52  ;;  %v11893_v52 = vmax.f32 %v8490_v26, 0.0  ;;  %v1246_v26 = vadd.f32 %v9332_v44, %v9125_v38 }
 0x3d7   :  { %v7493_v43 = vpack.i.bf16 %v11884_v11, %v1631_v2  ;;  %v9452_v11 = vpop.f32.mrf.mxu3  ;;  %v1609_v38 = vmax.f32 %v1246_v26, 0.0 }
 0x3d8   :  { %11887 = vst [vmem:[#allocation96_spill] sm:$0xff] %v9452_v11  ;;  %v9475_v11 = vpop.f32.mrf.mxu2 }
 0x3d9   :  { %7494 = vrot.lane.b32.xlu1 %v7493_v43, %s7841_s24  ;;  %11892 = vst [vmem:[#allocation98_spill] sm:$0xff] %v9475_v11 }
 0x3da   :  { %v1302_v40 = vpop.f32.mrf.mxu0 }
 0x3db   :  { %v1303_v49 = vadd.f32 %v9332_v44, %v1302_v40  ;;  %v9464_v40 = vpop.f32.mrf.mxu1 }
 0x3dc   :  { %11888 = vst [vmem:[#allocation97_spill] sm:$0xff] %v9464_v40  ;;  %v11701_v40 = vunpack.i.h.bf16 %v9278_v7 }
 0x3dd   :  { %v9443_v46 = vmax.f32 %v1303_v49, 0.0 }
 0x3df   :  { %11886 = vst [vmem:[#allocation95_spill] sm:$0xff] %v9443_v46  ;;  %v2890_v29 = vpack.c.bf16 %v9443_v46, %v9441_v42  ;;  %v7503_v48 = vpack.i.bf16 %v9443_v46, %v9441_v42 }
 0x3e1   :  { %6177 = vmatmul.msk.bf16.gmra.mxu3 %vm2567_vm1, %v2890_v29  ;;  %7514 = vrot.lane.b32.xlu1 %v9313_v9, %s7842_s10  ;;  %v11698_v9 = vmax.f32 %v9457_v61, 0.0  ;;  %v11889_v29 = vmax.f32 %v9081_v20, 0.0 }
 0x3e2   :  { %7504 = vrot.lane.b32.xlu0 %v7503_v48, %s7843_s1  ;;  %v1305_v43 = vpop.f32.mrf.mxu0  ;;  %v11890_v48 = vmax.f32 %v9319_v63, 0.0  ;;  %v9485_v63 = vmax.f32 %v1353_v57, 0.0  ;;  %v9500_v57 = vadd.f32 %v9332_v44, %v8210_v32 }
 0x3e3   :  { %v1306_v49 = vadd.f32 %v9332_v44, %v1305_v43  ;;  %v11891_v43 = vmax.f32 %v9235_v16, 0.0  ;;  %v9482_v4 = vpack.i.bf16 %v11698_v9, %v11893_v52 }
 0x3e4   :  { %v7528_v17 = vpack.i.bf16 %v11890_v48, %v11889_v29  ;;  %11894 = vst [vmem:[#allocation99_spill] sm:$0xff] %v9485_v63  ;;  %v7445_v29 = vpop.permute.xlu1 %7444  ;;  %v11702_v11 = vmax.f32 %v9500_v57, 0.0 }
 0x3e5   :  { %v1633_v12 = vmax.f32 %v1306_v49, 0.0 }
 0x3e7   :  { %v9471_v6 = vpack.i.bf16 %v1633_v12, %v1631_v2  ;;  %v7508_v49 = vpack.i.bf16 %v1633_v12, %v11891_v43  ;;  %v9487_v2 = vmax.f32 %v1358_v22, 0.0  ;;  %v9490_v12 = vpop.f32.mrf.mxu3  ;;  %v7447_v43 = vunpack.i.h.bf16 %v7445_v29 }
 0x3e9   :  { %7529 = vrot.lane.b32.xlu1 %v7528_v17, %s7842_s10  ;;  %11895 = vst [vmem:[#allocation100_spill] sm:$0xff] %v9487_v2  ;;  %v1206_v17 = vadd.f32 %v9332_v44, %v8962_v31  ;;  %v11897_v31 = vmax.f32 %v9336_v53, 0.0  ;;  %v2726_v32 = vsel %vm2567_vm1, %v1609_v38, %v7447_v43  ;;  %v11900_v38 = vmax.f32 %v9242_v28, 0.0 }
 0x3ea   :  { %7509 = vrot.lane.b32.xlu0 %v7508_v49, %s7841_s24  ;;  %v1307_v20 = vpop.f32.mrf.mxu0  ;;  %v7446_v49 = vunpack.i.l.bf16 %v7445_v29 }
 0x3eb   :  { %v1308_v16 = vadd.f32 %v9332_v44, %v1307_v20  ;;  %v7538_v20 = vpack.i.bf16 %v9487_v2, %v9485_v63  ;;  %v1593_v42 = vmax.f32 %v1206_v17, 0.0 }
 0x3ed   :  { %v9496_v48 = vmax.f32 %v1308_v16, 0.0  ;;  %v3332_v16 = vpop.f32.mrf.mxu2  ;;  %v2725_v29 = vsel %vm2567_vm1, %v1593_v42, %v7446_v49  ;;  %v2775_v42 = vsel %vm2611_vm2, %v2726_v32, %v8421_v39 }
 0x3ee   :  { %v3199_v52 = vpop.f32.mrf.mxu1 }
 0x3ef   :  { %11896 = vst [vmem:[#allocation101_spill] sm:$0xff] %v9496_v48  ;;  %v3200_v22 = vadd.f32 %v9422_v15, %v3199_v52  ;;  %v7518_v9 = vpack.i.bf16 %v11897_v31, %v9496_v48  ;;  %v9519_v26 = vpop.f32.mrf.mxu3 }
 0x3f0   :  { %11899 = vst [vmem:[#allocation103_spill] sm:$0xff] %v9519_v26 }
 0x3f1   :  { %v9508_v46 = vadd.f32 %v3332_v16, %v3200_v22  ;;  %7539 = vrot.lane.b32.xlu1 %v7538_v20, %s7843_s1  ;;  %7519 = vrot.lane.b32.xlu2 %v7518_v9, %s7843_s1  ;;  %v2774_v9 = vsel %vm2611_vm2, %v2725_v29, %v11701_v40 }
 0x3f2   :  { %v1310_v52 = vpop.f32.mrf.mxu0 }
 0x3f3   :  { %11898 = vst [vmem:[#allocation102_spill] sm:$0xff] %v9508_v46  ;;  %v9517_v53 = vadd.f32 %v9332_v44, %v1310_v52  ;;  %v7450_v17 = vpop.permute.xlu2 %7449  ;;  %v11901_v52 = vmax.f32 %v9295_v24, 0.0 }
 0x3f4   :  { %v7452_v22 = vunpack.i.h.bf16 %v7450_v17  ;;  %v7451_v31 = vunpack.i.l.bf16 %v7450_v17 }
 0x3f5   :  { %v11703_v20 = vmax.f32 %v9517_v53, 0.0  ;;  %v7533_v17 = vpack.i.bf16 %v11702_v11, %v11901_v52  ;;  %v1363_v11 = vadd.f32 %v9332_v44, %v8312_v36 }
 0x3f6   :  { %v2823_v43 = vsel %vm2655_vm3, %v2774_v9, %v7451_v31  ;;  %v2824_v49 = vsel %vm2655_vm3, %v2775_v42, %v7452_v22  ;;  %v9553_v42 = vpop.f32.mrf.mxu1 }
 0x3f7   :  { %v7523_v16 = vpack.i.bf16 %v11900_v38, %v11703_v20  ;;  %v2883_v26 = vpack.c.bf16 %v2824_v49, %v2823_v43  ;;  %v9543_v31 = vpop.f32.mrf.mxu3  ;;  %v9559_v43 = vadd.f32 %v9332_v44, %v8243_v3  ;;  %v7440_v49 = vpop.permute.xlu0 %7439  ;;  %v1368_v20 = vadd.f32 %v9332_v44, %v8369_v56 }
 0x3f8   :  { %11902 = vst [vmem:[#allocation104_spill] sm:$0xff] %v9543_v31  ;;  %v7441_v46 = vunpack.i.l.bf16 %v7440_v49 }
 0x3f9   :  { %7534 = vrot.lane.b32.xlu2 %v7533_v17, %s7841_s24  ;;  %7524 = vrot.lane.b32.xlu0 %v7523_v16, %s7841_s24  ;;  %v11707_v52 = vmax.f32 %v9559_v43, 0.0  ;;  %v7442_v17 = vunpack.i.h.bf16 %v7440_v49 }
 0x3fa   :  { %3341 = vmatmul.bf16.gmra.mxu2 %v2883_v26  ;;  %v1312_v32 = vpop.f32.mrf.mxu0  ;;  %v9555_v26 = vpop.f32.mrf.mxu2 }
 0x3fb   :  { %v9540_v29 = vadd.f32 %v9332_v44, %v1312_v32 }
 0x3fd   :  { %v11704_v22 = vmax.f32 %v9540_v29, 0.0 }
 0x3ff   :  { %v2893_v28 = vpack.c.bf16 %v11704_v22, %v9496_v48  ;;  %v9551_v9 = vpop.f32.mrf.mxu3 }
 0x400   :  { %11903 = vst [vmem:[#allocation105_spill] sm:$0xff] %v9551_v9 }
 0x401   :  { %6178 = vmatmul.msk.bf16.gmra.mxu3 %vm2567_vm1, %v2893_v28  ;;  %v2896_v28 = vpack.c.bf16 %v9487_v2, %v9485_v63  ;;  %v9583_v63 = vmax.f32 %v1363_v11, 0.0  ;;  %v11908_v2 = vunpack.i.l.bf16 %v9177_v59 }
 0x402   :  { %v9549_v24 = vpop.f32.mrf.mxu0 }
 0x403   :  { %v9579_v36 = vpop.permute.xlu2 %7459  ;;  %11906 = vst [vmem:[#allocation108_spill] sm:$0xff] %v9583_v63 }
 0x40a   :  { %v1317_v38 = vpop.f32.mrf.mxu0 }
 0x40b   :  { %v1318_v16 = vadd.f32 %v9332_v44, %v1317_v38  ;;  %v9572_v38 = vpop.f32.mrf.mxu3 }
 0x40c   :  { %11904 = vst [vmem:[#allocation106_spill] sm:$0xff] %v9572_v38 }
 0x40d   :  { %v1638_v32 = vmax.f32 %v1318_v16, 0.0  ;;  %v3337_v9 = vpop.f32.mrf.mxu2  ;;  %v2583_v16 = vsel %vm2567_vm1, 0.0, %v7442_v17  ;;  %v7461_v17 = vunpack.i.l.bf16 %v9579_v36 }
 0x40e   :  { %v3204_v40 = vpop.f32.mrf.mxu1  ;;  %v2627_v49 = vsel %vm2611_vm2, %v2583_v16, %v11908_v2 }
 0x40f   :  { %v7543_v3 = vpack.i.bf16 %v1638_v32, %v11707_v52  ;;  %v3205_v22 = vadd.f32 %v9422_v15, %v3204_v40  ;;  %v9585_v52 = vmax.f32 %v1368_v20, 0.0 }
 0x411   :  { %v9575_v48 = vadd.f32 %v3337_v9, %v3205_v22  ;;  %6179 = vmatmul.msk.bf16.gmra.mxu3 %vm2567_vm1, %v2896_v28  ;;  %7544 = vrot.lane.b32.xlu2 %v7543_v3, %s7841_s24  ;;  %11907 = vst [vmem:[#allocation109_spill] sm:$0xff] %v9585_v52  ;;  %v2582_v9 = vsel %vm2567_vm1, %v8773_v62, %v7441_v46 }
 0x412   :  { %v9581_v56 = vpop.f32.mrf.mxu0  ;;  %v7558_v11 = vpack.i.bf16 %v9585_v52, %v9583_v63  ;;  %v2677_v3 = vsel %vm2655_vm3, %v2627_v49, %v8449_v5 }
 0x413   :  { %11905 = vst [vmem:[#allocation107_spill] sm:$0xff] %v9575_v48  ;;  %v9587_v40 = vpop.permute.xlu1 %7454  ;;  %v9602_v48 = vpop.f32.mrf.mxu3 }
 0x414   :  { %v7456_v22 = vunpack.i.l.bf16 %v9587_v40  ;;  %11909 = vst [vmem:[#allocation110_spill] sm:$0xff] %v9602_v48  ;;  %v1251_v48 = vadd.f32 %v9332_v44, %v9152_v55  ;;  %v11916_v55 = vld [vmem:[#allocation30_spill] sm:$0xff] }
 0x416   :  { %v2626_v28 = vsel %vm2611_vm2, %v2582_v9, %v7456_v22  ;;  %v2899_v22 = vpack.c.bf16 %v9585_v52, %v9583_v63  ;;  %v1256_v52 = vadd.f32 %v9332_v44, %v9174_v8 }
 0x417   :  { %v2676_v20 = vsel %vm2655_vm3, %v2626_v28, %v7461_v17  ;;  %v11911_v28 = vld [vmem:[#allocation33_spill] sm:$0xff] }
 0x418   :  { %v2882_v2 = vpack.c.bf16 %v2677_v3, %v2676_v20  ;;  %v11912_v20 = vld [vmem:[#allocation38_spill] sm:$0xff] }
 0x419   :  { %7559 = vrot.lane.b32.xlu2 %v7558_v11, %s7843_s1  ;;  %v1373_v11 = vadd.f32 %v9332_v44, %v11911_v28  ;;  %v1378_v3 = vadd.f32 %v9332_v44, %v11912_v20 }
 0x41a   :  { %v1322_v16 = vpop.f32.mrf.mxu0  ;;  %3208 = vmatmul.bf16.gmra.mxu1 %v2882_v2  ;;  %v7465_v2 = vpop.permute.xlu0 %7464 }
 0x41b   :  { %v1323_v62 = vadd.f32 %v9332_v44, %v1322_v16  ;;  %v9610_v17 = vpop.f32.mrf.mxu3 }
 0x41c   :  { %11910 = vst [vmem:[#allocation111_spill] sm:$0xff] %v9610_v17  ;;  %v7467_v17 = vunpack.i.h.bf16 %v7465_v2 }
 0x41d   :  { %v1640_v46 = vmax.f32 %v1323_v62, 0.0  ;;  %v9622_v62 = vmax.f32 %v1373_v11, 0.0  ;;  %v1611_v11 = vmax.f32 %v1251_v48, 0.0 }
 0x41f   :  { %v7548_v9 = vpack.i.bf16 %v1640_v46, %v1638_v32  ;;  %11914 = vst [vmem:[#allocation38_spill] sm:$0xff] %v9622_v62 }
 0x421   :  { %6180 = vmatmul.msk.bf16.gmra.mxu3 %vm2567_vm1, %v2899_v22  ;;  %7549 = vrot.lane.b32.xlu0 %v7548_v9, %s7842_s10  ;;  %v9624_v22 = vmax.f32 %v1378_v3, 0.0  ;;  %v7470_v3 = vpop.permute.xlu2 %7469 }
 0x422   :  { %v9612_v49 = vpop.f32.mrf.mxu0  ;;  %v7475_v8 = vpop.permute.xlu0 %7474 }
 0x423   :  { %v9620_v16 = vpop.f32.mrf.mxu3  ;;  %11915 = vst [vmem:[#allocation112_spill] sm:$0xff] %v9624_v22  ;;  %v2902_v20 = vpack.c.bf16 %v9624_v22, %v9622_v62  ;;  %v7477_v38 = vunpack.i.h.bf16 %v7475_v8 }
 0x424   :  { %11913 = vst [vmem:[#allocation33_spill] sm:$0xff] %v9620_v16  ;;  %v11713_v16 = vunpack.i.h.bf16 %v9587_v40 }
 0x429   :  { %7554 = vrot.lane.b32.xlu0 %v9360_v50, %s7842_s10  ;;  %v7466_v50 = vunpack.i.l.bf16 %v7465_v2 }
 0x42a   :  { %v1327_v32 = vpop.f32.mrf.mxu0 }
 0x42b   :  { %v1328_v9 = vadd.f32 %v9332_v44, %v1327_v32  ;;  %v2727_v19 = vsel %vm2567_vm1, %v1611_v11, %v7466_v50  ;;  %v11917_v11 = vld [vmem:[#allocation31_spill] sm:$0xff] }
 0x42c   :  { %v2776_v48 = vsel %vm2611_vm2, %v2727_v19, %v11713_v16  ;;  %v1423_v51 = vadd.f32 %v9332_v44, %v11917_v11 }
 0x42d   :  { %v1642_v28 = vmax.f32 %v1328_v9, 0.0  ;;  %v1613_v9 = vmax.f32 %v1256_v52, 0.0  ;;  %v7476_v52 = vunpack.i.l.bf16 %v7475_v8  ;;  %v11920_v8 = vld [vmem:[#allocation37_spill] sm:$0xff] }
 0x42e   :  { %v9670_v0 = vmax.f32 %v1423_v51, 0.0 }
 0x42f   :  { %v7578_v63 = vpack.i.bf16 %v1642_v28, %v1640_v46  ;;  %v9643_v46 = vpop.f32.mrf.mxu3  ;;  %v2728_v2 = vsel %vm2567_vm1, %v1613_v9, %v7467_v17  ;;  %v11919_v9 = vld [vmem:[#allocation19_spill] sm:$0xff]  ;;  %v2584_v11 = vsel %vm2567_vm1, %v9003_v1, %v7476_v52 }
 0x430   :  { %11921 = vst [vmem:[#allocation30_spill] sm:$0xff] %v9670_v0 }
 0x431   :  { %6181 = vmatmul.msk.bf16.gmra.mxu3 %vm2567_vm1, %v2902_v20  ;;  %7579 = vrot.lane.b32.xlu2 %v7578_v63, %s7841_s24  ;;  %v7462_v20 = vunpack.i.h.bf16 %v9579_v36  ;;  %v1348_v36 = vadd.f32 %v9332_v44, %v11919_v9 }
 0x432   :  { %7564 = vrot.lane.b32.xlu0 %v11916_v55, %s7841_s24  ;;  %v9638_v32 = vpop.f32.mrf.mxu0  ;;  %v7471_v55 = vunpack.i.l.bf16 %v7470_v3 }
 0x433   :  { %v9641_v31 = vpop.permute.xlu1 %7479  ;;  %v2825_v19 = vsel %vm2655_vm3, %v2776_v48, %v7462_v20  ;;  %v11715_v48 = vmax.f32 %v9658_v35, 0.0 }
 0x434   :  { %v11714_v63 = vunpack.i.l.bf16 %v9641_v31 }
 0x435   :  { %v2905_v9 = vpack.c.bf16 %v9670_v0, %v11715_v48 }
 0x436   :  { %v2777_v50 = vsel %vm2611_vm2, %v2728_v2, %v11714_v63  ;;  %v2585_v2 = vsel %vm2567_vm1, %v9005_v14, %v7477_v38  ;;  %v7472_v63 = vunpack.i.h.bf16 %v7470_v3  ;;  %v11923_v38 = vunpack.i.h.bf16 %v9177_v59 }
 0x437   :  { %v2826_v17 = vsel %vm2655_vm3, %v2777_v50, %v7471_v55  ;;  %v1650_v50 = vmax.f32 %v1348_v36, 0.0 }
 0x438   :  { %v2886_v16 = vpack.c.bf16 %v2826_v17, %v2825_v19  ;;  %v9676_v19 = vpop.f32.mrf.mxu3  ;;  %v2628_v1 = vsel %vm2611_vm2, %v2584_v11, %v11923_v38  ;;  %v7490_v38 = vpop.permute.xlu2 %7489 }
 0x439   :  { %7589 = vrot.lane.b32.xlu2 %v11920_v8, %s7841_s24  ;;  %11922 = vst [vmem:[#allocation31_spill] sm:$0xff] %v9676_v19  ;;  %v2678_v3 = vsel %vm2655_vm3, %v2628_v1, %v7472_v63 }
 0x43a   :  { %v1332_v10 = vpop.f32.mrf.mxu0  ;;  %3346 = vmatmul.bf16.gmra.mxu2 %v2886_v16  ;;  %v11924_v16 = vunpack.i.l.bf16 %v9221_v34 }
 0x43b   :  { %v1333_v20 = vadd.f32 %v9332_v44, %v1332_v10  ;;  %v9674_v55 = vpop.permute.xlu1 %7484  ;;  %v11925_v10 = vmax.f32 %v9457_v61, 0.0  ;;  %v11929_v61 = vmax.f32 %v9540_v29, 0.0 }
 0x43c   :  { %v7486_v17 = vunpack.i.l.bf16 %v9674_v55  ;;  %v2629_v51 = vsel %vm2611_vm2, %v2585_v2, %v11924_v16  ;;  %v11927_v2 = vld [vmem:[#allocation36_spill] sm:$0xff]  ;;  %v7487_v48 = vunpack.i.h.bf16 %v9674_v55  ;;  %v11938_v55 = vunpack.i.h.bf16 %v9641_v31 }
 0x43d   :  { %v1644_v14 = vmax.f32 %v1333_v20, 0.0  ;;  %v7608_v20 = vpack.i.bf16 %v11925_v10, %v1650_v50  ;;  %v1428_v11 = vadd.f32 %v9332_v44, %v11927_v2  ;;  %v7623_v50 = vpack.i.bf16 %v9670_v0, %v11929_v61 }
 0x43e   :  { %v2679_v52 = vsel %vm2655_vm3, %v2629_v51, %v7486_v17  ;;  %v11928_v17 = vld [vmem:[#allocation39_spill] sm:$0xff]  ;;  %v1261_v10 = vadd.f32 %v9332_v44, %v9205_v23 }
 0x43f   :  { %v7568_v36 = vpack.i.bf16 %v1644_v14, %v1642_v28  ;;  %v2885_v8 = vpack.c.bf16 %v2679_v52, %v2678_v3  ;;  %v1433_v28 = vadd.f32 %v9332_v44, %v11928_v17  ;;  %v9709_v16 = vmax.f32 %v1428_v11, 0.0 }
 0x440   :  { %v9697_v63 = vpop.f32.mrf.mxu3  ;;  %v7492_v11 = vunpack.i.h.bf16 %v7490_v38  ;;  %v7491_v17 = vunpack.i.l.bf16 %v7490_v38  ;;  %v7500_v61 = vpop.permute.xlu2 %7499  ;;  %v11937_v38 = vld [vmem:[#allocation50_spill] sm:$0xff] }
 0x441   :  { %6182 = vmatmul.msk.bf16.gmra.mxu3 %vm2567_vm1, %v2905_v9  ;;  %7569 = vrot.lane.b32.xlu1 %v7568_v36, %s7842_s10  ;;  %11930 = vst [vmem:[#allocation19_spill] sm:$0xff] %v9709_v16  ;;  %v9711_v51 = vmax.f32 %v1433_v28, 0.0  ;;  %v7583_v36 = vpack.i.bf16 %v9624_v22, %v9622_v62 }
 0x442   :  { %7609 = vrot.lane.b32.xlu2 %v7608_v20, %s7842_s10  ;;  %3213 = vmatmul.bf16.gmra.mxu1 %v2885_v8  ;;  %v9695_v59 = vpop.f32.mrf.mxu0  ;;  %v1266_v20 = vadd.f32 %v9332_v44, %v9219_v33  ;;  %v1615_v33 = vmax.f32 %v1261_v10, 0.0 }
 0x443   :  { %11926 = vst [vmem:[#allocation43_spill] sm:$0xff] %v9695_v59  ;;  %v2908_v29 = vpack.c.bf16 %v9711_v51, %v9709_v16  ;;  %v7638_v2 = vpack.i.bf16 %v9711_v51, %v9709_v16  ;;  %v12000_v59 = vld [vmem:[#allocation45_spill] sm:$0xff] }
 0x444   :  { %11931 = vst [vmem:[#allocation37_spill] sm:$0xff] %v9711_v51 }
 0x448   :  { %v9715_v52 = vpop.f32.mrf.mxu3 }
 0x449   :  { %7574 = vrot.lane.b32.xlu1 %v9410_v25, %s7842_s10  ;;  %11932 = vst [vmem:[#allocation36_spill] sm:$0xff] %v9715_v52  ;;  %v11933_v25 = vld [vmem:[#allocation49_spill] sm:$0xff] }
 0x44a   :  { %7624 = vrot.lane.b32.xlu2 %v7623_v50, %s7843_s1  ;;  %v1337_v1 = vpop.f32.mrf.mxu0  ;;  %v9724_v8 = vadd.f32 %v9332_v44, %v11933_v25  ;;  %v1617_v25 = vmax.f32 %v1266_v20, 0.0  ;;  %v7502_v50 = vunpack.i.h.bf16 %v7500_v61  ;;  %v7501_v20 = vunpack.i.l.bf16 %v7500_v61  ;;  %v11942_v61 = vld [vmem:[#allocation42_spill] sm:$0xff] }
 0x44b   :  { %v9713_v3 = vpop.permute.xlu1 %7494  ;;  %v1338_v9 = vadd.f32 %v9332_v44, %v1337_v1 }
 0x44c   :  { %v2730_v22 = vsel %vm2567_vm1, %v1617_v25, %v7492_v11  ;;  %v7496_v10 = vunpack.i.l.bf16 %v9713_v3  ;;  %v11943_v25 = vmax.f32 %v11942_v61, 0.0 }
 0x44d   :  { %v1646_v23 = vmax.f32 %v1338_v9, 0.0  ;;  %v2729_v9 = vsel %vm2567_vm1, %v1615_v33, %v7491_v17  ;;  %v11941_v33 = vmax.f32 %v9724_v8, 0.0 }
 0x44e   :  { %v2778_v1 = vsel %vm2611_vm2, %v2729_v9, %v11938_v55 }
 0x44f   :  { %v7603_v0 = vpack.i.bf16 %v1646_v23, %v1644_v14  ;;  %v7653_v52 = vpack.i.bf16 %v11943_v25, %v11941_v33  ;;  %v2827_v9 = vsel %vm2655_vm3, %v2778_v1, %v7487_v48  ;;  %v2587_v33 = vsel %vm2567_vm1, %v9046_v27, %v7502_v50 }
 0x450   :  { %v9762_v17 = vpop.f32.mrf.mxu3  ;;  %v2586_v48 = vsel %vm2567_vm1, %v9044_v54, %v7501_v20  ;;  %v7497_v1 = vunpack.i.h.bf16 %v9713_v3  ;;  %v11948_v50 = vunpack.i.h.bf16 %v9221_v34  ;;  %v11950_v25 = vmax.f32 %v9517_v53, 0.0 }
 0x451   :  { %6183 = vmatmul.msk.bf16.gmra.mxu3 %vm2567_vm1, %v2908_v29  ;;  %7584 = vrot.lane.b32.xlu1 %v7583_v36, %s7843_s1  ;;  %v11936_v29 = vld [vmem:[#allocation46_spill] sm:$0xff] }
 0x452   :  { %7639 = vrot.lane.b32.xlu2 %v7638_v2, %s7843_s1  ;;  %v9735_v28 = vpop.f32.mrf.mxu0  ;;  %v1438_v36 = vadd.f32 %v9332_v44, %v11936_v29  ;;  %v1443_v2 = vadd.f32 %v9332_v44, %v11937_v38  ;;  %v11939_v38 = vld [vmem:[#allocation48_spill] sm:$0xff]  ;;  %11940 = vst [vmem:[#allocation46_spill] sm:$0xff] %v9762_v17  ;;  %v2630_v20 = vsel %vm2611_vm2, %v2586_v48, %v11948_v50 }
 0x453   :  { %11934 = vst [vmem:[#allocation39_spill] sm:$0xff] %v9735_v28  ;;  %v9753_v19 = vpop.permute.xlu1 %7514  ;;  %v9760_v11 = vadd.f32 %v9332_v44, %v11939_v38  ;;  %v11946_v38 = vld [vmem:[#allocation53_spill] sm:$0xff] }
 0x454   :  { %v9740_v51 = vpop.permute.xlu0 %7504  ;;  %v9771_v16 = vmax.f32 %v1438_v36, 0.0 }
 0x455   :  { %11935 = vst [vmem:[#allocation49_spill] sm:$0xff] %v9740_v51  ;;  %v11721_v62 = vunpack.i.l.bf16 %v9740_v51  ;;  %v11728_v36 = vmax.f32 %v9760_v11, 0.0 }
 0x456   :  { %11944 = vst [vmem:[#allocation50_spill] sm:$0xff] %v9771_v16 }
 0x457   :  { %v2779_v29 = vsel %vm2611_vm2, %v2730_v22, %v11721_v62  ;;  %v9773_v22 = vmax.f32 %v1443_v2, 0.0  ;;  %v1398_v62 = vadd.f32 %v9332_v44, %v11946_v38 }
 0x458   :  { %v2828_v14 = vsel %vm2655_vm3, %v2779_v29, %v7496_v10  ;;  %v11947_v10 = vld [vmem:[#allocation24_spill] sm:$0xff]  ;;  %v9815_v50 = vpop.f32.mrf.mxu3 }
 0x459   :  { %7604 = vrot.lane.b32.xlu1 %v7603_v0, %s7841_s24  ;;  %v2889_v55 = vpack.c.bf16 %v2828_v14, %v2827_v9  ;;  %11945 = vst [vmem:[#allocation48_spill] sm:$0xff] %v9773_v22  ;;  %v2911_v54 = vpack.c.bf16 %v9773_v22, %v9771_v16  ;;  %v1670_v3 = vmax.f32 %v1398_v62, 0.0  ;;  %v11951_v9 = vmax.f32 %v9500_v57, 0.0 }
 0x45a   :  { %7654 = vrot.lane.b32.xlu2 %v7653_v52, %s7841_s24  ;;  %v1342_v17 = vpop.f32.mrf.mxu0  ;;  %v9791_v52 = vadd.f32 %v9332_v44, %v11947_v10  ;;  %v2680_v62 = vsel %vm2655_vm3, %v2630_v20, %v7497_v1  ;;  %v11953_v10 = vld [vmem:[#allocation29_spill] sm:$0xff]  ;;  %11954 = vst [vmem:[#allocation53_spill] sm:$0xff] %v9815_v50  ;;  %v1276_v20 = vadd.f32 %v9332_v44, %v9276_v47 }
 0x45b   :  { %v9784_v0 = vadd.f32 %v9332_v44, %v1342_v17  ;;  %3351 = vmatmul.bf16.gmra.mxu2 %v2889_v55  ;;  %v11949_v17 = vunpack.i.l.bf16 %v9278_v7  ;;  %v7618_v14 = vpack.i.bf16 %v11951_v9, %v11950_v25  ;;  %v9807_v55 = vpop.permute.xlu2 %7519  ;;  %v1418_v48 = vadd.f32 %v9332_v44, %v11953_v10  ;;  %v7530_v57 = vpop.permute.xlu1 %7529  ;;  %v11955_v9 = vld [vmem:[#allocation58_spill] sm:$0xff] }
 0x45c   :  { %v9787_v2 = vpop.permute.xlu0 %7509  ;;  %11952 = vst [vmem:[#allocation42_spill] sm:$0xff] %v9807_v55  ;;  %v7668_v53 = vpack.i.bf16 %v1670_v3, %v11728_v36  ;;  %v7531_v25 = vunpack.i.l.bf16 %v7530_v57  ;;  %v1621_v10 = vmax.f32 %v1276_v20, 0.0 }
 0x45d   :  { %v1648_v29 = vmax.f32 %v9784_v0, 0.0  ;;  %v7511_v27 = vunpack.i.l.bf16 %v9787_v2  ;;  %v2631_v61 = vsel %vm2611_vm2, %v2587_v33, %v11949_v17  ;;  %v1678_v1 = vmax.f32 %v1418_v48, 0.0  ;;  %v11957_v48 = vld [vmem:[#allocation54_spill] sm:$0xff] }
 0x45e   :  { %v7532_v17 = vunpack.i.h.bf16 %v7530_v57  ;;  %v11722_v57 = vunpack.i.h.bf16 %v9740_v51  ;;  %v7512_v20 = vunpack.i.h.bf16 %v9787_v2 }
 0x45f   :  { %v7593_v38 = vpack.i.bf16 %v1648_v29, %v1646_v23  ;;  %v2681_v34 = vsel %vm2655_vm3, %v2631_v61, %v7511_v27  ;;  %v11729_v23 = vmax.f32 %v9791_v52, 0.0  ;;  %v1271_v27 = vadd.f32 %v9332_v44, %v9263_v18 }
 0x460   :  { %v2888_v33 = vpack.c.bf16 %v2681_v34, %v2680_v62  ;;  %v7517_v61 = vunpack.i.h.bf16 %v9753_v19  ;;  %v2589_v18 = vsel %vm2567_vm1, %v9096_v58, %v7532_v17  ;;  %v7042_v17 = vld [vmem:[%s11648_s5 + $0x38] sm:$0xff] }
 0x461   :  { %6184 = vmatmul.msk.bf16.gmra.mxu3 %vm2567_vm1, %v2911_v54  ;;  %7619 = vrot.lane.b32.xlu1 %v7618_v14, %s7842_s10  ;;  %v7516_v54 = vunpack.i.l.bf16 %v9753_v19  ;;  %v9832_v14 = vadd.f32 %v9332_v44, %v11955_v9  ;;  %v1619_v34 = vmax.f32 %v1271_v27, 0.0  ;;  %v7683_v47 = vpack.i.bf16 %v1678_v1, %v11729_v23  ;;  %v11959_v27 = vld [vmem:[#allocation78_spill] sm:$0xff]  ;;  %v10004_v23 = vpop.f32.mrf.mxu1 }
 0x462   :  { %7669 = vrot.lane.b32.xlu2 %v7668_v53, %s7841_s24  ;;  %7594 = vrot.lane.b32.xlu0 %v7593_v38, %s7842_s10  ;;  %v11956_v38 = vmax.f32 %v9724_v8, 0.0  ;;  %v1448_v53 = vadd.f32 %v9332_v44, %v11957_v48  ;;  %v7522_v19 = vunpack.i.h.bf16 %v9807_v55  ;;  %v9847_v8 = vpop.f32.mrf.mxu3  ;;  %v2588_v1 = vsel %vm2567_vm1, %v11959_v27, %v7531_v25 }
 0x463   :  { %3218 = vmatmul.bf16.gmra.mxu1 %v2888_v33  ;;  %v9843_v33 = vpop.permute.xlu2 %7534  ;;  %11958 = vst [vmem:[#allocation24_spill] sm:$0xff] %v9847_v8  ;;  %v2731_v58 = vsel %vm2567_vm1, %v1619_v34, %v7516_v54  ;;  %v11724_v9 = vmax.f32 %v9832_v14, 0.0  ;;  %4081 = vmatpush.bf16.msra.mxu3 %v7042_v17  ;;  %v11961_v17 = vmax.f32 %v9559_v43, 0.0 }
 0x464   :  { %v7633_v62 = vpack.i.bf16 %v1670_v3, %v11956_v38  ;;  %v2732_v3 = vsel %vm2567_vm1, %v1621_v10, %v7517_v61  ;;  %v11723_v61 = vunpack.i.l.bf16 %v9807_v55  ;;  %v2633_v54 = vsel %vm2611_vm2, %v2589_v18, %v7522_v19  ;;  %v11995_v55 = vld [vmem:[#allocation76_spill] sm:$0xff] }
 0x465   :  { %v7536_v25 = vunpack.i.l.bf16 %v9843_v33  ;;  %v9864_v34 = vmax.f32 %v1448_v53, 0.0  ;;  %v11960_v10 = vunpack.i.h.bf16 %v9278_v7 }
 0x466   :  { %v2781_v48 = vsel %vm2611_vm2, %v2732_v3, %v11723_v61  ;;  %v11964_v3 = vld [vmem:[#allocation15_spill] sm:$0xff] }
 0x467   :  { %v2683_v19 = vsel %vm2655_vm3, %v2633_v54, %v7536_v25  ;;  %v2914_v7 = vpack.c.bf16 %v11724_v9, %v9864_v34  ;;  %v11968_v25 = vld [vmem:[#allocation40_spill] sm:$0xff] }
 0x469   :  { %7634 = vrot.lane.b32.xlu1 %v7633_v62, %s7842_s10 }
 0x46a   :  { %7684 = vrot.lane.b32.xlu2 %v7683_v47, %s7842_s10  ;;  %7599 = vrot.lane.b32.xlu0 %v9471_v6, %s7842_s10  ;;  %v2780_v6 = vsel %vm2611_vm2, %v2731_v58, %v11722_v57  ;;  %v2632_v47 = vsel %vm2611_vm2, %v2588_v1, %v11960_v10  ;;  %v9892_v43 = vpop.f32.mrf.mxu3 }
 0x46b   :  { %v7525_v38 = vpop.permute.xlu0 %7524  ;;  %v2829_v27 = vsel %vm2655_vm3, %v2780_v6, %v7512_v20  ;;  %11966 = vst [vmem:[#allocation29_spill] sm:$0xff] %v9892_v43  ;;  %v11967_v20 = vld [vmem:[#allocation41_spill] sm:$0xff] }
 0x46c   :  { %v7527_v62 = vunpack.i.h.bf16 %v7525_v38  ;;  %v7526_v2 = vunpack.i.l.bf16 %v7525_v38  ;;  %v11962_v38 = vld [vmem:[#allocation27_spill] sm:$0xff] }
 0x46d   :  { %v11963_v58 = vmax.f32 %v11962_v38, 0.0 }
 0x46e   :  { %v2682_v18 = vsel %vm2655_vm3, %v2632_v47, %v7527_v62  ;;  %v2830_v53 = vsel %vm2655_vm3, %v2781_v48, %v7526_v2  ;;  %v1493_v62 = vadd.f32 %v9332_v44, %v11964_v3  ;;  %v11965_v47 = vld [vmem:[#allocation18_spill] sm:$0xff]  ;;  %v7050_v2 = vld [vmem:[%s11648_s5 + $0x78] sm:$0xff]  ;;  %v9917_v3 = vpop.permute.xlu2 %7544 }
 0x46f   :  { %v7648_v57 = vpack.i.bf16 %v11963_v58, %v11961_v17  ;;  %v2891_v1 = vpack.c.bf16 %v2683_v19, %v2682_v18  ;;  %v2892_v10 = vpack.c.bf16 %v2830_v53, %v2829_v27  ;;  %v1498_v54 = vadd.f32 %v9332_v44, %v11965_v47  ;;  %4130 = vmatpush.bf16.msra.mxu1 %v7050_v2  ;;  %v11969_v18 = vld [vmem:[#allocation57_spill] sm:$0xff]  ;;  %v11970_v27 = vld [vmem:[#allocation7_spill] sm:$0xff]  ;;  %v11971_v17 = vld [vmem:[#allocation34_spill] sm:$0xff] }
 0x470   :  { %v1708_v6 = vmax.f32 %v1493_v62, 0.0  ;;  %v7663_v19 = vpack.i.bf16 %v9773_v22, %v9771_v16  ;;  %v9907_v53 = vadd.f32 %v9332_v44, %v11970_v27  ;;  %v11972_v38 = vmax.f32 %v11971_v17, 0.0  ;;  %v11974_v62 = vld [vmem:[#allocation5_spill] sm:$0xff]  ;;  %v11993_v22 = vld [vmem:[#allocation14_spill] sm:$0xff] }
 0x471   :  { %6185 = vmatmul.msk.bf16.gmra.mxu3 %vm2567_vm1, %v2914_v7  ;;  %7649 = vrot.lane.b32.xlu1 %v7648_v57, %s7842_s10  ;;  %v1710_v48 = vmax.f32 %v1498_v54, 0.0  ;;  %v1403_v57 = vadd.f32 %v9332_v44, %v11969_v18  ;;  %v9922_v47 = vadd.f32 %v9332_v44, %v11974_v62  ;;  %v11976_v18 = vld [vmem:[#allocation56_spill] sm:$0xff]  ;;  %v11978_v17 = vld [vmem:[#allocation61_spill] sm:$0xff]  ;;  %v11980_v62 = vld [vmem:[#allocation3_spill] sm:$0xff] }
 0x472   :  { %7699 = vrot.lane.b32.xlu2 %v11967_v20, %s7842_s10  ;;  %7614 = vrot.lane.b32.xlu0 %v11968_v25, %s7841_s24  ;;  %v7628_v58 = vpack.i.bf16 %v11972_v38, %v1648_v29  ;;  %v11730_v29 = vmax.f32 %v9907_v53, 0.0  ;;  %v9927_v54 = vpop.f32.mrf.mxu3  ;;  %v1408_v38 = vadd.f32 %v9332_v44, %v11978_v17 }
 0x473   :  { %3223 = vmatmul.bf16.gmra.mxu1 %v2891_v1  ;;  %3356 = vmatmul.bf16.gmra.mxu2 %v2892_v10  ;;  %v7713_v7 = vpack.i.bf16 %v1710_v48, %v1708_v6  ;;  %v11973_v1 = vld [vmem:[#allocation52_spill] sm:$0xff]  ;;  %v1672_v0 = vmax.f32 %v1403_v57, 0.0  ;;  %11975 = vst [vmem:[#allocation58_spill] sm:$0xff] %v9927_v54  ;;  %v11725_v25 = vmax.f32 %v9922_v47, 0.0  ;;  %v2917_v2 = vpack.c.bf16 %v1710_v48, %v1708_v6  ;;  %v11994_v54 = vld [vmem:[#allocation17_spill] sm:$0xff] }
 0x474   :  { %v9915_v10 = vadd.f32 %v9332_v44, %v11973_v1  ;;  %v7041_v1 = vld [vmem:[%s11648_s5 + $0x30] sm:$0xff] }
 0x475   :  { %v7728_v57 = vpack.i.bf16 %v11730_v29, %v11725_v25  ;;  %4082 = vmatpush.bf16.msra.mxu3 %v7041_v1  ;;  %v1316_v29 = vadd.f32 %v9332_v44, %v9549_v24  ;;  %v7038_v24 = vld [vmem:[%s11648_s5 + $0x18] sm:$0xff] }
 0x476   :  { %v11727_v20 = vmax.f32 %v9915_v10, 0.0  ;;  %v9949_v48 = vpop.permute.xlu2 %7559 }
 0x477   :  { %v1637_v43 = vmax.f32 %v1316_v29, 0.0  ;;  %v7546_v29 = vunpack.i.l.bf16 %v9917_v3 }
 0x478   :  { %v7678_v27 = vpack.i.bf16 %v11727_v20, %v1672_v0 }
 0x479   :  { %7664 = vrot.lane.b32.xlu1 %v7663_v19, %s7843_s1  ;;  %v9933_v19 = vadd.f32 %v9332_v44, %v11976_v18  ;;  %v11981_v18 = vld [vmem:[#allocation20_spill] sm:$0xff] }
 0x47a   :  { %7714 = vrot.lane.b32.xlu2 %v7713_v7, %s7843_s1  ;;  %7629 = vrot.lane.b32.xlu0 %v7628_v58, %s7841_s24  ;;  %v1674_v58 = vmax.f32 %v1408_v38, 0.0 }
 0x47b   :  { %11977 = vst [vmem:[#allocation54_spill] sm:$0xff] %v9933_v19  ;;  %v11726_v6 = vmax.f32 %v9933_v19, 0.0 }
 0x47c   :  { %v7658_v9 = vpack.i.bf16 %v1674_v58, %v1672_v0 }
 0x47d   :  { %v7693_v61 = vpack.i.bf16 %v1674_v58, %v11726_v6  ;;  %v11987_v6 = vld [vmem:[#allocation9_spill] sm:$0xff] }
 0x47e   :  { %v9998_v20 = vadd.f32 %v9332_v44, %v11987_v6  ;;  %v1321_v6 = vadd.f32 %v9332_v44, %v9581_v56  ;;  %v1491_v56 = vadd.f32 %v9332_v44, %v11993_v22  ;;  %v7037_v22 = vld [vmem:[%s11648_s5 + $0x10] sm:$0xff] }
 0x480   :  { %v1639_v50 = vmax.f32 %v1321_v6, 0.0 }
 0x481   :  { %6186 = vmatmul.msk.bf16.gmra.mxu3 %vm2567_vm1, %v2917_v2  ;;  %7679 = vrot.lane.b32.xlu1 %v7678_v27, %s7841_s24  ;;  %v9958_v2 = vadd.f32 %v9332_v44, %v11980_v62  ;;  %v9962_v27 = vadd.f32 %v9332_v44, %v11981_v18  ;;  %v11984_v62 = vld [vmem:[#allocation44_spill] sm:$0xff]  ;;  %v7040_v18 = vld [vmem:[%s11648_s5 + $0x28] sm:$0xff] }
 0x482   :  { %7729 = vrot.lane.b32.xlu2 %v7728_v57, %s7842_s10  ;;  %7644 = vrot.lane.b32.xlu0 %v9482_v4, %s7841_s24  ;;  %v11982_v4 = vld [vmem:[#allocation22_spill] sm:$0xff] }
 0x483   :  { %v9966_v17 = vadd.f32 %v9332_v44, %v11982_v4  ;;  %v11983_v57 = vld [vmem:[#allocation62_spill] sm:$0xff]  ;;  %v11732_v4 = vmax.f32 %v9958_v2, 0.0  ;;  %4083 = vmatpush.bf16.msra.mxu3 %v7040_v18 }
 0x484   :  { %v9951_v7 = vpop.f32.mrf.mxu3  ;;  %v9970_v38 = vadd.f32 %v9332_v44, %v11983_v57  ;;  %v11733_v57 = vmax.f32 %v9962_v27, 0.0 }
 0x485   :  { %11979 = vst [vmem:[#allocation78_spill] sm:$0xff] %v9951_v7  ;;  %v11731_v25 = vmax.f32 %v9966_v17, 0.0  ;;  %v10015_v7 = vpop.f32.mrf.mxu2 }
 0x486   :  { %v11734_v1 = vmax.f32 %v9970_v38, 0.0 }
 0x487   :  { %v2920_v36 = vpack.c.bf16 %v11731_v25, %v11733_v57  ;;  %v10019_v25 = vpop.permute.xlu1 %7539 }
 0x488   :  { %v7708_v18 = vpack.i.bf16 %v11732_v4, %v11734_v1  ;;  %v11988_v4 = vld [vmem:[#allocation32_spill] sm:$0xff]  ;;  %v11998_v28 = vunpack.i.l.bf16 %v10019_v25 }
 0x489   :  { %7694 = vrot.lane.b32.xlu1 %v7693_v61, %s7841_s24  ;;  %v11985_v61 = vld [vmem:[#allocation25_spill] sm:$0xff] }
 0x48a   :  { %7744 = vrot.lane.b32.xlu2 %v11984_v62, %s7842_s10  ;;  %7659 = vrot.lane.b32.xlu0 %v7658_v9, %s7842_s10  ;;  %v9989_v58 = vadd.f32 %v9332_v44, %v11985_v61  ;;  %v7039_v9 = vld [vmem:[%s11648_s5 + $0x20] sm:$0xff] }
 0x48b   :  { %v9985_v0 = vpop.permute.xlu2 %7579  ;;  %4084 = vmatpush.bf16.msra.mxu3 %v7039_v9 }
 0x48c   :  { %v9991_v62 = vpop.f32.mrf.mxu3  ;;  %v1716_v61 = vmax.f32 %v9989_v58, 0.0  ;;  %v11989_v58 = vld [vmem:[#allocation11_spill] sm:$0xff] }
 0x48d   :  { %11986 = vst [vmem:[#allocation27_spill] sm:$0xff] %v9991_v62  ;;  %v10030_v9 = vadd.f32 %v9332_v44, %v11989_v58  ;;  %v1346_v58 = vadd.f32 %v9332_v44, %v11994_v54  ;;  %v3342_v19 = vpop.f32.mrf.mxu2 }
 0x48f   :  { %4085 = vmatpush.bf16.msra.mxu3 %v7038_v24 }
 0x491   :  { %6187 = vmatmul.msk.bf16.gmra.mxu3 %vm2567_vm1, %v2920_v36  ;;  %7709 = vrot.lane.b32.xlu1 %v7708_v18, %s7842_s10  ;;  %v11990_v36 = vld [vmem:[#allocation80_spill] sm:$0xff] }
 0x492   :  { %2403 = vrot.lane.b32.xlu2 %v1716_v61, %s7843_s1  ;;  %7674 = vrot.lane.b32.xlu0 %v11988_v4, %s7842_s10  ;;  %v10034_v18 = vadd.f32 %v9332_v44, %v11990_v36  ;;  %v3182_v36 = vadd.f32 %v9422_v15, %v11995_v55  ;;  %v11997_v55 = vmax.f32 %v9998_v20, 0.0 }
 0x493   :  { %v10036_v57 = vpop.permute.xlu2 %7589  ;;  %v7550_v1 = vpop.permute.xlu0 %7549  ;;  %4086 = vmatpush.bf16.msra.mxu3 %v7037_v22  ;;  %v12004_v22 = vld [vmem:[#allocation16_spill] sm:$0xff] }
 0x494   :  { %11991 = vst [vmem:[#allocation15_spill] sm:$0xff] %v10036_v57  ;;  %v7552_v4 = vunpack.i.h.bf16 %v7550_v1  ;;  %v7551_v62 = vunpack.i.l.bf16 %v7550_v1  ;;  %v10038_v16 = vpop.f32.mrf.mxu3  ;;  %v7537_v57 = vunpack.i.h.bf16 %v9843_v33 }
 0x495   :  { %11992 = vst [vmem:[#allocation18_spill] sm:$0xff] %v10038_v16  ;;  %v11996_v16 = vmax.f32 %v9907_v53, 0.0 }
 0x496   :  { %v2734_v1 = vsel %vm2567_vm1, %v1639_v50, %v7552_v4  ;;  %v2733_v6 = vsel %vm2567_vm1, %v1637_v43, %v7551_v62  ;;  %v11999_v62 = vmax.f32 %v9658_v35, 0.0 }
 0x497   :  { %v3209_v54 = vpop.f32.mrf.mxu1  ;;  %v7768_v8 = vpack.i.bf16 %v11997_v55, %v11996_v16  ;;  %v2782_v33 = vsel %vm2611_vm2, %v2733_v6, %v8421_v39  ;;  %v2783_v50 = vsel %vm2611_vm2, %v2734_v1, %v11998_v28  ;;  %v1386_v16 = vadd.f32 %v9332_v44, %v12000_v59  ;;  %v12001_v55 = vld [vmem:[#allocation73_spill] sm:$0xff]  ;;  %v12002_v28 = vld [vmem:[#allocation35_spill] sm:$0xff] }
 0x498   :  { %v3210_v43 = vadd.f32 %v9422_v15, %v3209_v54  ;;  %v7688_v4 = vpack.i.bf16 %v11999_v62, %v9864_v34  ;;  %v2831_v24 = vsel %vm2655_vm3, %v2782_v33, %v7537_v57  ;;  %v2832_v53 = vsel %vm2655_vm3, %v2783_v50, %v7546_v29  ;;  %v12003_v54 = vld [vmem:[#allocation77_spill] sm:$0xff]  ;;  %v7036_v44 = vld [vmem:[%s11648_s5 + $0x8] sm:$0xff]  ;;  %v10088_v29 = vld [vmem:[%s11645_s2] ss:$0 sm:$0xff] }
 0x499   :  { %v3177_v6 = vadd.f32 %v9422_v15, %v12001_v55  ;;  %7724 = vrot.lane.b32.xlu1 %v12002_v28, %s7842_s10  ;;  %v2895_v1 = vpack.c.bf16 %v2832_v53, %v2831_v24  ;;  %v3315_v51 = vadd.f32 %v12003_v54, %v3182_v36  ;;  %v1704_v59 = vmax.f32 %v10030_v9, 0.0  ;;  %4087 = vmatpush.bf16.msra.mxu3 %v7036_v44  ;;  %v12006_v9 = vld [vmem:[#allocation74_spill] sm:$0xff] }
 0x49a   :  { %v10077_v35 = vadd.f32 %v3342_v19, %v3210_v43  ;;  %7769 = vrot.lane.b32.xlu2 %v7768_v8, %s7841_s24  ;;  %7689 = vrot.lane.b32.xlu0 %v7688_v4, %s7843_s1  ;;  %v1707_v57 = vmax.f32 %v1491_v56, 0.0  ;;  %v1496_v19 = vadd.f32 %v10088_v29, %v12004_v22  ;;  %v1649_v8 = vmax.f32 %v1346_v58, 0.0 }
 0x49b   :  { %v7555_v36 = vpop.permute.xlu0 %7554  ;;  %3361 = vmatmul.bf16.gmra.mxu2 %v2895_v1  ;;  %v12005_v24 = vmax.f32 %v10034_v18, 0.0  ;;  %v1665_v56 = vmax.f32 %v1386_v16, 0.0  ;;  %v3310_v53 = vadd.f32 %v12006_v9, %v3177_v6  ;;  %v3448_v54 = vadd.f32 %v9490_v12, %v3315_v51  ;;  %v7035_v1 = vld [vmem:[%s11648_s5] sm:$0xff] }
 0x49c   :  { %v7610_v50 = vpop.permute.xlu2 %7609  ;;  %v7557_v43 = vunpack.i.h.bf16 %v7555_v36  ;;  %v7556_v62 = vunpack.i.l.bf16 %v7555_v36  ;;  %v10094_v4 = vpop.f32.mrf.mxu3  ;;  %v7547_v22 = vunpack.i.h.bf16 %v9917_v3  ;;  %v12007_v6 = vunpack.i.h.bf16 %v9587_v40  ;;  %v12010_v40 = vld [vmem:[#allocation21_spill] sm:$0xff] }
 0x49d   :  { %v2923_v33 = vpack.c.bf16 %v12005_v24, %v1716_v61  ;;  %v7612_v55 = vunpack.i.h.bf16 %v7610_v50  ;;  %v7611_v28 = vunpack.i.l.bf16 %v7610_v50  ;;  %v12008_v51 = vunpack.i.l.bf16 %v9641_v31  ;;  %4088 = vmatpush.bf16.msra.mxu3 %v7035_v1 }
 0x49e   :  { %v2591_v58 = vsel %vm2567_vm1, %v9343_v21, %v7557_v43  ;;  %v2590_v61 = vsel %vm2567_vm1, 0.0, %v7556_v62  ;;  %v3207_v3 = vadd.f32 %v9422_v15, %v10004_v23  ;;  %v12009_v36 = vmax.f32 %v9791_v52, 0.0 }
 0x49f   :  { %v10106_v44 = vsel %vm2567_vm1, %v1665_v56, %v7612_v55  ;;  %v10109_v16 = vsel %vm2567_vm1, %v1649_v8, %v7611_v28  ;;  %v2634_v12 = vsel %vm2611_vm2, %v2590_v61, %v12007_v6  ;;  %v2635_v21 = vsel %vm2611_vm2, %v2591_v58, %v12008_v51 }
 0x4a0   :  { %v7703_v24 = vpack.i.bf16 %v1707_v57, %v12009_v36  ;;  %v2684_v50 = vsel %vm2655_vm3, %v2634_v12, %v8449_v5  ;;  %v2685_v8 = vsel %vm2655_vm3, %v2635_v21, %v7547_v22  ;;  %v3443_v62 = vadd.f32 %v9438_v41, %v3310_v53 }
 0x4a1   :  { %6188 = vmatmul.msk.bf16.gmra.mxu3 %vm2567_vm1, %v2923_v33  ;;  %7739 = vrot.lane.b32.xlu1 %v12010_v40, %s7841_s24  ;;  %v2894_v43 = vpack.c.bf16 %v2685_v8, %v2684_v50  ;;  %v3202_v23 = vadd.f32 %v9422_v15, %v9553_v42  ;;  %v1709_v52 = vmax.f32 %v1496_v19, 0.0  ;;  %v3340_v57 = vadd.f32 %v10015_v7, %v3207_v3  ;;  %v7049_v19 = vld [vmem:[%s11648_s5 + $0x70] sm:$0xff] }
 0x4a2   :  { %2190 = vrot.lane.b32.xlu2 %v1704_v59, %s7841_s24  ;;  %7704 = vrot.lane.b32.xlu0 %v7703_v24, %s7841_s24  ;;  %v3558_v33 = vmax.f32 %v3448_v54, 0.0  ;;  %v3556_v28 = vmax.f32 %v3443_v62, 0.0  ;;  %v1523_v41 = vadd.f32 %v10088_v29, %v9315_v45  ;;  %v12011_v15 = vmax.f32 %v9998_v20, 0.0  ;;  %v10171_v24 = vld [vmem:[%s11647_s4] ss:$0 sm:$0xff] }
 0x4a3   :  { %3228 = vmatmul.bf16.gmra.mxu1 %v2894_v43  ;;  %v3335_v55 = vadd.f32 %v9555_v26, %v3202_v23  ;;  %v3473_v7 = vadd.f32 %v9697_v63, %v3340_v57  ;;  %v12012_v53 = vmax.f32 %v9970_v38, 0.0  ;;  %v12013_v38 = vmax.f32 %v9760_v11, 0.0  ;;  %v12017_v11 = vld [vmem:[#allocation70_spill] sm:$0xff]  ;;  %v12020_v57 = vld [vmem:[#allocation68_spill] sm:$0xff] }
 0x4a4   :  { %v10133_v56 = vpop.permute.xlu2 %7624  ;;  %v10135_v9 = vpop.f32.mrf.mxu3  ;;  %v7753_v42 = vpack.i.bf16 %v1704_v59, %v12011_v15  ;;  %v7778_v22 = vpack.i.bf16 %v3556_v28, %v3558_v33  ;;  %4131 = vmatpush.bf16.msra.mxu1 %v7049_v19  ;;  %v1720_v45 = vmax.f32 %v1523_v41, 0.0  ;;  %v12014_v1 = vmax.f32 %v9915_v10, 0.0 }
 0x4a5   :  { %v7718_v54 = vpack.i.bf16 %v12012_v53, %v1709_v52  ;;  %v3468_v26 = vadd.f32 %v9643_v46, %v3335_v55  ;;  %v3568_v59 = vmax.f32 %v3473_v7, 0.0  ;;  %v1326_v46 = vadd.f32 %v10088_v29, %v9612_v49  ;;  %v12018_v49 = vld [vmem:[#allocation67_spill] sm:$0xff]  ;;  %v7565_v50 = vpop.permute.xlu0 %7564 }
 0x4a6   :  { %v2926_v61 = vpack.c.bf16 %v1720_v45, %v1720_v45  ;;  %v7763_v6 = vpack.i.bf16 %v12014_v1, %v12013_v38  ;;  %v1331_v12 = vadd.f32 %v10088_v29, %v9638_v32  ;;  %v12015_v51 = vmax.f32 %v9962_v27, 0.0  ;;  %v12019_v27 = vld [vmem:[#allocation71_spill] sm:$0xff]  ;;  %v10209_v1 = vpop.f32.mrf.mxu2 }
 0x4a7   :  { %v3566_v63 = vmax.f32 %v3468_v26, 0.0  ;;  %v12016_v21 = vmax.f32 %v9966_v17, 0.0  ;;  %v3172_v10 = vadd.f32 %v10171_v24, %v12017_v11  ;;  %v3167_v32 = vadd.f32 %v10171_v24, %v12018_v49 }
 0x4a8   :  { %v1641_v40 = vmax.f32 %v1326_v46, 0.0  ;;  %v1643_v43 = vmax.f32 %v1331_v12, 0.0  ;;  %v11744_v55 = vunpack.i.h.bf16 %v10019_v25  ;;  %v11745_v28 = vunpack.i.l.bf16 %v9949_v48 }
 0x4a9   :  { %7754 = vrot.lane.b32.xlu1 %v7753_v42, %s7842_s10  ;;  %v7733_v3 = vpack.i.bf16 %v12016_v21, %v12015_v51  ;;  %v7788_v36 = vpack.i.bf16 %v3568_v59, %v3566_v63  ;;  %v3305_v17 = vadd.f32 %v12019_v27, %v3172_v10  ;;  %v3300_v33 = vadd.f32 %v12020_v57, %v3167_v32  ;;  %v12028_v10 = vld [vmem:[#allocation85_spill] sm:$0xff] }
 0x4aa   :  { %7719 = vrot.lane.b32.xlu0 %v7718_v54, %s7841_s24  ;;  %7779 = vrot.lane.b32.xlu2 %v7778_v22, %s7843_s1  ;;  %v7567_v15 = vunpack.i.h.bf16 %v7565_v50  ;;  %v7566_v42 = vunpack.i.l.bf16 %v7565_v50  ;;  %v3192_v54 = vadd.f32 %v10171_v24, %v9393_v30  ;;  %v10194_v22 = vpop.f32.mrf.mxu1  ;;  %v12022_v59 = vmax.f32 %v9958_v2, 0.0  ;;  %v12025_v2 = vld [vmem:[#allocation91_spill] sm:$0xff]  ;;  %v12030_v50 = vld [vmem:[#allocation89_spill] sm:$0xff] }
 0x4ab   :  { %v3438_v53 = vadd.f32 %v9414_v37, %v3305_v17  ;;  %v12023_v63 = vmax.f32 %v9922_v47, 0.0  ;;  %v3433_v30 = vadd.f32 %v9378_v60, %v3300_v33  ;;  %v3187_v47 = vadd.f32 %v10171_v24, %v9367_v13 }
 0x4ac   :  { %v10152_v20 = vpop.permute.xlu2 %7639  ;;  %v10154_v58 = vpop.f32.mrf.mxu3  ;;  %v3325_v51 = vadd.f32 %v12025_v2, %v3192_v54  ;;  %v10230_v13 = vpack.c.bf16 %v8421_v39, %v8421_v39  ;;  %v7582_v27 = vunpack.i.h.bf16 %v9985_v0  ;;  %v7581_v17 = vunpack.i.l.bf16 %v9985_v0  ;;  %v12038_v54 = vld [vmem:[#allocation23_spill] sm:$0xff] }
 0x4ad   :  { %v3554_v12 = vmax.f32 %v3438_v53, 0.0  ;;  %v3552_v11 = vmax.f32 %v3433_v30, 0.0  ;;  %v3320_v49 = vadd.f32 %v12028_v10, %v3187_v47 }
 0x4ae   :  { %12029 = vst [vmem:[#allocation40_spill] sm:$0xff] %v10230_v13 }
 0x4b1   :  { %6189 = vmatmul.msk.bf16.gmra.mxu3 %vm2567_vm1, %v2926_v61  ;;  %7764 = vrot.lane.b32.xlu1 %v7763_v6, %s7842_s10  ;;  %v7748_v61 = vpack.i.bf16 %v12023_v63, %v12022_v59  ;;  %v12024_v6 = vmax.f32 %v9832_v14, 0.0 }
 0x4b2   :  { %7734 = vrot.lane.b32.xlu0 %v7733_v3, %s7843_s1  ;;  %7789 = vrot.lane.b32.xlu2 %v7788_v36, %s7843_s1 }
 0x4b3   :  { %v7570_v8 = vpop.permute.xlu1 %7569 }
 0x4b4   :  { %v7572_v62 = vunpack.i.h.bf16 %v7570_v8  ;;  %v7571_v23 = vunpack.i.l.bf16 %v7570_v8  ;;  %v10182_v52 = vpop.permute.xlu2 %7654  ;;  %v10187_v41 = vpop.f32.mrf.mxu3 }
 0x4b5   :  { %12021 = vst [vmem:[#allocation41_spill] sm:$0xff] %v10187_v41 }
 0x4b6   :  { %v2736_v19 = vsel %vm2567_vm1, %v1643_v43, %v7572_v62  ;;  %v2735_v7 = vsel %vm2567_vm1, %v1641_v40, %v7571_v23  ;;  %v12031_v40 = vld [vmem:[#allocation88_spill] sm:$0xff]  ;;  %v12034_v23 = vld [vmem:[#allocation106_spill] sm:$0xff] }
 0x4b7   :  { %v2784_v26 = vsel %vm2611_vm2, %v2735_v7, %v11744_v55  ;;  %v2785_v45 = vsel %vm2611_vm2, %v2736_v19, %v11745_v28  ;;  %v3458_v57 = vadd.f32 %v12034_v23, %v3325_v51  ;;  %v12036_v19 = vld [vmem:[#allocation49_spill] sm:$0xff]  ;;  %v7075_v62 = vld [vmem:[%s11650_s7 + $0x20] sm:$0xff] }
 0x4b8   :  { %v2833_v37 = vsel %vm2655_vm3, %v2784_v26, %v7566_v42  ;;  %v2834_v38 = vsel %vm2655_vm3, %v2785_v45, %v7567_v15  ;;  %v7773_v15 = vpack.i.bf16 %v3554_v12, %v3552_v11  ;;  %v12035_v42 = vunpack.i.h.bf16 %v9641_v31  ;;  %v12041_v12 = vld [vmem:[#allocation28_spill] sm:$0xff] }
 0x4b9   :  { %2019 = vrot.lane.b32.xlu1 %v12024_v6, %s7843_s1  ;;  %v2898_v46 = vpack.c.bf16 %v2834_v38, %v2833_v37  ;;  %v12037_v7 = vunpack.i.l.bf16 %v12036_v19  ;;  %v1411_v26 = vadd.f32 %v10088_v29, %v12038_v54  ;;  %v12040_v38 = vld [vmem:[#allocation104_spill] sm:$0xff]  ;;  %v3562_v2 = vmax.f32 %v3458_v57, 0.0  ;;  %v12045_v57 = vld [vmem:[#allocation54_spill] sm:$0xff] }
 0x4ba   :  { %7749 = vrot.lane.b32.xlu0 %v7748_v61, %s7841_s24  ;;  %v12039_v61 = vld [vmem:[#allocation26_spill] sm:$0xff]  ;;  %v3453_v31 = vadd.f32 %v12040_v38, %v3320_v49 }
 0x4bb   :  { %v7575_v21 = vpop.permute.xlu1 %7574  ;;  %3366 = vmatmul.bf16.gmra.mxu2 %v2898_v46  ;;  %v1416_v37 = vadd.f32 %v10088_v29, %v12039_v61  ;;  %v1675_v51 = vmax.f32 %v1411_v26, 0.0  ;;  %v12048_v26 = vld [vmem:[#allocation97_spill] sm:$0xff]  ;;  %v12049_v61 = vld [vmem:[#allocation98_spill] sm:$0xff] }
 0x4bc   :  { %v7577_v3 = vunpack.i.h.bf16 %v7575_v21  ;;  %v7576_v36 = vunpack.i.l.bf16 %v7575_v21  ;;  %v10223_v14 = vpop.permute.xlu2 %7669  ;;  %v10226_v32 = vpop.f32.mrf.mxu3  ;;  %v12042_v21 = vld [vmem:[#allocation64_spill] sm:$0xff]  ;;  %v3560_v10 = vmax.f32 %v3453_v31, 0.0  ;;  %v12050_v31 = vld [vmem:[#allocation43_spill] sm:$0xff] }
 0x4bd   :  { %v3347_v30 = vpop.f32.mrf.mxu2  ;;  %v1677_v11 = vmax.f32 %v1416_v37, 0.0 }
 0x4be   :  { %v2593_v8 = vsel %vm2567_vm1, %v12030_v50, %v7577_v3  ;;  %v2592_v43 = vsel %vm2567_vm1, %v12031_v40, %v7576_v36  ;;  %v3162_v3 = vadd.f32 %v10171_v24, %v12042_v21  ;;  %v7783_v40 = vpack.i.bf16 %v3562_v2, %v3560_v10  ;;  %v12052_v21 = vld [vmem:[#allocation4_spill] sm:$0xff] }
 0x4bf   :  { %v3214_v33 = vpop.f32.mrf.mxu1  ;;  %v2636_v0 = vsel %vm2611_vm2, %v2592_v43, %v12035_v42  ;;  %v2637_v53 = vsel %vm2611_vm2, %v2593_v8, %v12037_v7  ;;  %v12044_v43 = vld [vmem:[#allocation65_spill] sm:$0xff]  ;;  %v12047_v7 = vld [vmem:[#allocation83_spill] sm:$0xff] }
 0x4c0   :  { %v3215_v45 = vadd.f32 %v10171_v24, %v3214_v33  ;;  %v2686_v59 = vsel %vm2655_vm3, %v2636_v0, %v7581_v17  ;;  %v2687_v63 = vsel %vm2655_vm3, %v2637_v53, %v7582_v27  ;;  %v3295_v23 = vadd.f32 %v12044_v43, %v3162_v3 }
 0x4c1   :  { %6338 = vmatmul.msk.bf16.vlgmr.msra.gmra.mxu3 %vm10241_vm5, %v10230_v13  ;;  %7774 = vrot.lane.b32.xlu1 %v7773_v15, %s7843_s1  ;;  %v2897_v6 = vpack.c.bf16 %v2687_v63, %v2686_v59  ;;  %v12046_v33 = vmax.f32 %v12045_v57, 0.0  ;;  %v3212_v63 = vadd.f32 %v10171_v24, %v10194_v22  ;;  %v1466_v22 = vadd.f32 %v10088_v29, %v12052_v21 }
 0x4c2   :  { %v10264_v46 = vadd.f32 %v3347_v30, %v3215_v45  ;;  %7759 = vrot.lane.b32.xlu0 %v12041_v12, %s7841_s24  ;;  %v3428_v53 = vadd.f32 %v12047_v7, %v3295_v23  ;;  %v3197_v45 = vadd.f32 %v10171_v24, %v12048_v26  ;;  %v1336_v30 = vadd.f32 %v10088_v29, %v12050_v31  ;;  %v12056_v23 = vld [vmem:[#allocation111_spill] sm:$0xff]  ;;  %v12059_v31 = vld [vmem:[#allocation24_spill] sm:$0xff] }
 0x4c3   :  { %v10268_v47 = vpop.permute.xlu1 %7584  ;;  %3233 = vmatmul.bf16.gmra.mxu1 %v2897_v6  ;;  %v12051_v6 = vld [vmem:[#allocation39_spill] sm:$0xff]  ;;  %v3345_v3 = vadd.f32 %v10209_v1, %v3212_v63 }
 0x4c4   :  { %v7685_v36 = vpop.permute.xlu2 %7684  ;;  %v10272_v17 = vpop.f32.mrf.mxu3  ;;  %v3330_v37 = vadd.f32 %v12049_v61, %v3197_v45  ;;  %v3550_v38 = vmax.f32 %v3428_v53, 0.0  ;;  %v1341_v12 = vadd.f32 %v10088_v29, %v12051_v6  ;;  %v1645_v7 = vmax.f32 %v1336_v30, 0.0  ;;  %v12058_v63 = vld [vmem:[#allocation15_spill] sm:$0xff] }
 0x4c5   :  { %v7687_v49 = vunpack.i.h.bf16 %v7685_v36  ;;  %v7686_v27 = vunpack.i.l.bf16 %v7685_v36  ;;  %12043 = vst [vmem:[#allocation57_spill] sm:$0xff] %v10272_v17  ;;  %v3349_v2 = vpop.f32.mrf.mxu2  ;;  %v7592_v61 = vunpack.i.h.bf16 %v12058_v63 }
 0x4c6   :  { %v3463_v57 = vadd.f32 %v12056_v23, %v3330_v37  ;;  %v1647_v53 = vmax.f32 %v1341_v12, 0.0  ;;  %v12060_v37 = vld [vmem:[#allocation46_spill] sm:$0xff]  ;;  %v1697_v23 = vmax.f32 %v1466_v22, 0.0  ;;  %v7048_v22 = vld [vmem:[%s11648_s5 + $0x68] sm:$0xff] }
 0x4c7   :  { %v10275_v50 = vsel %vm2567_vm1, %v1677_v11, %v7687_v49  ;;  %v10278_v8 = vsel %vm2567_vm1, %v1675_v51, %v7686_v27  ;;  %v3216_v15 = vpop.f32.mrf.mxu1  ;;  %v12053_v11 = vld [vmem:[#allocation6_spill] sm:$0xff]  ;;  %v12054_v49 = vld [vmem:[#allocation47_spill] sm:$0xff]  ;;  %v3478_v21 = vadd.f32 %v12060_v37, %v3345_v3  ;;  %4132 = vmatpush.bf16.msra.mxu1 %v7048_v22  ;;  %v12063_v22 = vunpack.i.h.bf16 %v12036_v19 }
 0x4c8   :  { %v3217_v59 = vadd.f32 %v10171_v24, %v3216_v15  ;;  %v1471_v10 = vadd.f32 %v10088_v29, %v12053_v11  ;;  %v1391_v27 = vadd.f32 %v10088_v29, %v12054_v49  ;;  %v3564_v12 = vmax.f32 %v3463_v57, 0.0 }
 0x4c9   :  { %7784 = vrot.lane.b32.xlu1 %v7783_v40, %s7843_s1  ;;  %v12055_v40 = vld [vmem:[#allocation51_spill] sm:$0xff]  ;;  %v3570_v37 = vmax.f32 %v3478_v21, 0.0 }
 0x4ca   :  { %1848 = vrot.lane.b32.xlu0 %v12046_v33, %s7842_s10  ;;  %v3350_v51 = vadd.f32 %v3349_v2, %v3217_v59  ;;  %v1396_v43 = vadd.f32 %v10088_v29, %v12055_v40  ;;  %v11743_v59 = vunpack.i.h.bf16 %v9949_v48  ;;  %v7591_v2 = vunpack.i.l.bf16 %v12058_v63 }
 0x4cb   :  { %v10285_v42 = vpop.permute.xlu1 %7604  ;;  %v1699_v63 = vmax.f32 %v1471_v10, 0.0  ;;  %v1667_v3 = vmax.f32 %v1391_v27, 0.0 }
 0x4cc   :  { %v10287_v0 = vpop.permute.xlu2 %7699  ;;  %v10290_v54 = vpop.f32.mrf.mxu3  ;;  %v3483_v6 = vadd.f32 %v12059_v31, %v3350_v51  ;;  %v1669_v57 = vmax.f32 %v1396_v43, 0.0  ;;  %v7606_v10 = vunpack.i.l.bf16 %v10285_v42 }
 0x4d1   :  { %6343 = vmatmul.msk.bf16.gmra.mxu3 %vm10241_vm5, %v10230_v13  ;;  %v12076_v13 = vld [vmem:[#allocation59_spill] sm:$0xff] }
 0x4d2   :  { %3658 = vrot.lane.b32.xlu0 %v3550_v38, %s7843_s1  ;;  %v11742_v38 = vunpack.i.l.bf16 %v10268_v47 }
 0x4d3   :  { %v10309_v36 = vpop.permute.xlu1 %7619 }
 0x4d4   :  { %v10318_v33 = vpop.permute.xlu2 %7714  ;;  %v7595_v15 = vpop.permute.xlu0 %7594 }
 0x4d5   :  { %v7597_v26 = vunpack.i.h.bf16 %v7595_v15  ;;  %v7596_v1 = vunpack.i.l.bf16 %v7595_v15  ;;  %v10320_v45 = vpop.f32.mrf.mxu3  ;;  %v7717_v21 = vunpack.i.h.bf16 %v10318_v33 }
 0x4d6   :  { %12057 = vst [vmem:[#allocation7_spill] sm:$0xff] %v10320_v45 }
 0x4d7   :  { %v2738_v11 = vsel %vm2567_vm1, %v1647_v53, %v7597_v26  ;;  %v2737_v30 = vsel %vm2567_vm1, %v1645_v7, %v7596_v1  ;;  %v3572_v7 = vmax.f32 %v3483_v6, 0.0  ;;  %v11748_v26 = vunpack.i.h.bf16 %v10133_v56 }
 0x4d8   :  { %v2786_v49 = vsel %vm2611_vm2, %v2737_v30, %v11743_v59  ;;  %v2787_v40 = vsel %vm2611_vm2, %v2738_v11, %v11742_v38  ;;  %v11747_v1 = vunpack.i.l.bf16 %v10152_v20  ;;  %v12062_v59 = vld [vmem:[#allocation94_spill] sm:$0xff] }
 0x4d9   :  { %v2835_v51 = vsel %vm2655_vm3, %v2786_v49, %v7591_v2  ;;  %v2836_v15 = vsel %vm2655_vm3, %v2787_v40, %v7592_v61  ;;  %v7607_v2 = vunpack.i.h.bf16 %v10285_v42  ;;  %v7793_v38 = vpack.i.bf16 %v3570_v37, %v3572_v7 }
 0x4da   :  { %3664 = vrot.lane.b32.xlu0 %v3564_v12, %s7843_s1  ;;  %v2901_v53 = vpack.c.bf16 %v2836_v15, %v2835_v51 }
 0x4db   :  { %v7635_v31 = vpop.permute.xlu1 %7634 }
 0x4dc   :  { %v7637_v27 = vunpack.i.h.bf16 %v7635_v31  ;;  %v7636_v61 = vunpack.i.l.bf16 %v7635_v31  ;;  %v7730_v11 = vpop.permute.xlu2 %7729  ;;  %v7600_v30 = vpop.permute.xlu0 %7599  ;;  %3371 = vmatmul.bf16.gmra.mxu2 %v2901_v53  ;;  %v12061_v53 = vld [vmem:[#allocation95_spill] sm:$0xff] }
 0x4dd   :  { %v7732_v43 = vunpack.i.h.bf16 %v7730_v11  ;;  %v7731_v6 = vunpack.i.l.bf16 %v7730_v11  ;;  %v7602_v12 = vunpack.i.h.bf16 %v7600_v30  ;;  %v7601_v49 = vunpack.i.l.bf16 %v7600_v30  ;;  %v10346_v40 = vpop.f32.mrf.mxu3 }
 0x4de   :  { %v2742_v51 = vsel %vm2567_vm1, %v1669_v57, %v7637_v27  ;;  %v2741_v15 = vsel %vm2567_vm1, %v1667_v3, %v7636_v61  ;;  %v12064_v57 = vld [vmem:[#allocation42_spill] sm:$0xff]  ;;  %v3352_v61 = vpop.f32.mrf.mxu2 }
 0x4df   :  { %v10352_v42 = vsel %vm2567_vm1, %v1699_v63, %v7732_v43  ;;  %v2749_v31 = vsel %vm2567_vm1, %v1697_v23, %v7731_v6  ;;  %v2595_v11 = vsel %vm2567_vm1, %v12061_v53, %v7602_v12  ;;  %v2594_v30 = vsel %vm2567_vm1, %v12062_v59, %v7601_v49 }
 0x4e0   :  { %v3219_v55 = vpop.f32.mrf.mxu1  ;;  %v2638_v28 = vsel %vm2611_vm2, %v2594_v30, %v12063_v22  ;;  %v12065_v27 = vunpack.i.l.bf16 %v12064_v57  ;;  %v10368_v63 = vsel %vm2611_vm2, %v2741_v15, %v11748_v26  ;;  %v10373_v23 = vsel %vm2611_vm2, %v2742_v51, %v11747_v1 }
 0x4e1   :  { %v3220_v59 = vadd.f32 %v10171_v24, %v3219_v55  ;;  %v2688_v19 = vsel %vm2655_vm3, %v2638_v28, %v7606_v10  ;;  %v10379_v37 = vsel %vm2611_vm2, %v2749_v31, %v7717_v21  ;;  %v11746_v6 = vunpack.i.h.bf16 %v10268_v47 }
 0x4e2   :  { %v2639_v3 = vsel %vm2611_vm2, %v2595_v11, %v12065_v27  ;;  %7794 = vrot.lane.b32.xlu0 %v7793_v38, %s7843_s1  ;;  %v7622_v28 = vunpack.i.h.bf16 %v10309_v36  ;;  %v2789_v38 = vsel %vm2611_vm2, %v10106_v44, %v8421_v39  ;;  %v11749_v31 = vunpack.i.h.bf16 %v10152_v20  ;;  %v12067_v11 = vld [vmem:[#allocation100_spill] sm:$0xff] }
 0x4e3   :  { %v2689_v7 = vsel %vm2655_vm3, %v2639_v3, %v7607_v2  ;;  %v10383_v12 = vadd.f32 %v3352_v61, %v3220_v59  ;;  %v7650_v49 = vpop.permute.xlu1 %7649  ;;  %v7656_v53 = vunpack.i.l.bf16 %v10182_v52  ;;  %v2788_v57 = vsel %vm2611_vm2, %v10109_v16, %v11746_v6  ;;  %v12068_v3 = vld [vmem:[#allocation19_spill] sm:$0xff] }
 0x4e4   :  { %v2900_v43 = vpack.c.bf16 %v2689_v7, %v2688_v19  ;;  %v7652_v51 = vunpack.i.h.bf16 %v7650_v49  ;;  %v10385_v15 = vpop.permute.xlu2 %7744  ;;  %v7615_v55 = vpop.permute.xlu0 %7614  ;;  %v7621_v27 = vunpack.i.l.bf16 %v10309_v36  ;;  %v12069_v61 = vunpack.i.l.bf16 %v9949_v48 }
 0x4e5   :  { %v7746_v2 = vunpack.i.l.bf16 %v10385_v15  ;;  %v7617_v10 = vunpack.i.h.bf16 %v7615_v55  ;;  %v10389_v21 = vpop.f32.mrf.mxu3  ;;  %v7616_v22 = vunpack.i.l.bf16 %v7615_v55 }
 0x4e6   :  { %3238 = vmatmul.bf16.gmra.mxu1 %v2900_v43  ;;  %12066 = vst [vmem:[#allocation34_spill] sm:$0xff] %v10389_v21  ;;  %v2599_v30 = vsel %vm2567_vm1, %v12067_v11, %v7652_v51  ;;  %v2597_v51 = vsel %vm2567_vm1, 0.0, %v7622_v28  ;;  %v7626_v28 = vunpack.i.l.bf16 %v10133_v56 }
 0x4e7   :  { %v2606_v59 = vsel %vm2567_vm1, %v12068_v3, %v7746_v2  ;;  %v2838_v44 = vsel %vm2655_vm3, %v2789_v38, %v7617_v10  ;;  %v2837_v7 = vsel %vm2655_vm3, %v2788_v57, %v7616_v22  ;;  %v2643_v43 = vsel %vm2611_vm2, %v2599_v30, %v12069_v61  ;;  %v7058_v2 = vld [vmem:[%s11648_s5 + $0xb8] sm:$0xff] }
 0x4e8   :  { %v10406_v19 = vpop.f32.mrf.mxu1  ;;  %v2904_v55 = vpack.c.bf16 %v2838_v44, %v2837_v7  ;;  %v10414_v16 = vsel %vm2655_vm3, %v2643_v43, %v7656_v53  ;;  %v10419_v36 = vsel %vm2611_vm2, %v2606_v59, %v11749_v31  ;;  %v12070_v10 = vld [vmem:[#allocation101_spill] sm:$0xff]  ;;  %v12071_v30 = vunpack.i.l.bf16 %v10019_v25  ;;  %4179 = vmatpush.bf16.msra.mxu2 %v7058_v2  ;;  %v10436_v44 = vpop.f32.mrf.mxu2 }
 0x4e9   :  { %v2596_v38 = vsel %vm2567_vm1, %v12070_v10, %v7621_v27  ;;  %v7651_v7 = vunpack.i.l.bf16 %v7650_v49 }
 0x4ea   :  { %v2641_v53 = vsel %vm2611_vm2, %v2597_v51, %v12071_v30  ;;  %v2640_v27 = vsel %vm2611_vm2, %v2596_v38, %v7626_v28  ;;  %v12072_v30 = vld [vmem:[#allocation99_spill] sm:$0xff] }
 0x4eb   :  { %v10426_v11 = vpop.permute.xlu1 %7664  ;;  %v2691_v43 = vsel %vm2655_vm3, %v2641_v53, %v8449_v5  ;;  %v2598_v6 = vsel %vm2567_vm1, %v12072_v30, %v7651_v7  ;;  %v12074_v53 = vunpack.i.h.bf16 %v10019_v25  ;;  %v1406_v25 = vadd.f32 %v10088_v29, %v12076_v13 }
 0x4ec   :  { %v10432_v22 = vpop.permute.xlu2 %2403  ;;  %v7630_v57 = vpop.permute.xlu0 %7629  ;;  %3376 = vmatmul.bf16.gmra.mxu2 %v2904_v55 }
 0x4ed   :  { %v7631_v3 = vunpack.i.l.bf16 %v7630_v57  ;;  %v10434_v59 = vpop.f32.mrf.mxu3  ;;  %v7632_v55 = vunpack.i.h.bf16 %v7630_v57 }
 0x4ef   :  { %v2690_v61 = vsel %vm2655_vm3, %v2640_v27, %v7631_v3  ;;  %v2839_v57 = vsel %vm2655_vm3, %v10368_v63, %v7632_v55  ;;  %v1673_v55 = vmax.f32 %v1406_v25, 0.0  ;;  %v12081_v25 = vunpack.i.h.bf16 %v10152_v20 }
 0x4f0   :  { %v2903_v10 = vpack.c.bf16 %v2691_v43, %v2690_v61  ;;  %v3224_v51 = vpop.f32.mrf.mxu1  ;;  %v2642_v61 = vsel %vm2611_vm2, %v2598_v6, %v12074_v53  ;;  %v7657_v53 = vunpack.i.h.bf16 %v10182_v52 }
 0x4f1   :  { %v3225_v38 = vadd.f32 %v10171_v24, %v3224_v51 }
 0x4f3   :  { %v10444_v1 = vpop.permute.xlu1 %7679 }
 0x4f4   :  { %v10446_v26 = vpop.permute.xlu2 %7769  ;;  %v7645_v2 = vpop.permute.xlu0 %7644 }
 0x4f5   :  { %v7647_v49 = vunpack.i.h.bf16 %v7645_v2  ;;  %v7646_v28 = vunpack.i.l.bf16 %v7645_v2  ;;  %v10449_v3 = vpop.f32.mrf.mxu3  ;;  %v12075_v2 = vld [vmem:[#allocation55_spill] sm:$0xff] }
 0x4f6   :  { %3243 = vmatmul.bf16.gmra.mxu1 %v2903_v10  ;;  %12073 = vst [vmem:[#allocation52_spill] sm:$0xff] %v10449_v3  ;;  %v3357_v27 = vpop.f32.mrf.mxu2  ;;  %v1401_v31 = vadd.f32 %v10088_v29, %v12075_v2 }
 0x4f7   :  { %v10454_v43 = vadd.f32 %v3357_v27, %v3225_v38  ;;  %v2840_v7 = vsel %vm2655_vm3, %v10373_v23, %v7646_v28  ;;  %v2692_v10 = vsel %vm2655_vm3, %v2642_v61, %v7647_v49  ;;  %v7671_v61 = vunpack.i.l.bf16 %v10223_v14 }
 0x4f8   :  { %v2907_v51 = vpack.c.bf16 %v2840_v7, %v2839_v57  ;;  %v2906_v30 = vpack.c.bf16 %v10414_v16, %v2692_v10  ;;  %v1671_v63 = vmax.f32 %v1401_v31, 0.0  ;;  %v11752_v16 = vunpack.i.l.bf16 %v10426_v11  ;;  %v12078_v7 = vld [vmem:[#allocation2_spill] sm:$0xff]  ;;  %v12080_v31 = vld [vmem:[#allocation96_spill] sm:$0xff] }
 0x4f9   :  { %v1461_v10 = vadd.f32 %v10088_v29, %v12078_v7 }
 0x4fb   :  { %v10466_v6 = vpop.permute.xlu1 %7694 }
 0x4fc   :  { %v10468_v38 = vpop.permute.xlu2 %2190  ;;  %v7660_v27 = vpop.permute.xlu0 %7659  ;;  %3381 = vmatmul.bf16.gmra.mxu2 %v2907_v51  ;;  %v12079_v51 = vld [vmem:[#allocation75_spill] sm:$0xff] }
 0x4fd   :  { %v7662_v23 = vunpack.i.h.bf16 %v7660_v27  ;;  %v7661_v28 = vunpack.i.l.bf16 %v7660_v27  ;;  %v10470_v49 = vpop.f32.mrf.mxu3  ;;  %v3446_v2 = vadd.f32 %v12080_v31, %v12079_v51 }
 0x4fe   :  { %12077 = vst [vmem:[#allocation5_spill] sm:$0xff] %v10470_v49 }
 0x4ff   :  { %v2744_v13 = vsel %vm2567_vm1, %v1673_v55, %v7662_v23  ;;  %v2743_v57 = vsel %vm2567_vm1, %v1671_v63, %v7661_v28  ;;  %v1695_v28 = vmax.f32 %v1461_v10, 0.0  ;;  %v10491_v7 = vmax.f32 %v3446_v2, 0.0  ;;  %v12083_v10 = vld [vmem:[#allocation108_spill] sm:$0xff] }
 0x500   :  { %v2792_v27 = vsel %vm2611_vm2, %v2743_v57, %v12081_v25  ;;  %v2793_v52 = vsel %vm2611_vm2, %v2744_v13, %v11752_v16 }
 0x501   :  { %v2841_v3 = vsel %vm2655_vm3, %v2792_v27, %v7657_v53  ;;  %v2842_v55 = vsel %vm2655_vm3, %v2793_v52, %v7671_v61  ;;  %v7716_v53 = vunpack.i.l.bf16 %v10318_v33  ;;  %v7672_v61 = vunpack.i.h.bf16 %v10223_v14  ;;  %v12086_v33 = vld [vmem:[#allocation36_spill] sm:$0xff] }
 0x502   :  { %v2910_v23 = vpack.c.bf16 %v2842_v55, %v2841_v3  ;;  %v12088_v14 = vunpack.i.h.bf16 %v9949_v48 }
 0x503   :  { %v10489_v63 = vpop.permute.xlu1 %7709 }
 0x504   :  { %v7712_v51 = vunpack.i.h.bf16 %v10489_v63  ;;  %v7675_v31 = vpop.permute.xlu0 %7674  ;;  %v7780_v21 = vpop.permute.xlu2 %7779 }
 0x505   :  { %v7677_v57 = vunpack.i.h.bf16 %v7675_v31  ;;  %v7676_v25 = vunpack.i.l.bf16 %v7675_v31  ;;  %v7782_v45 = vunpack.i.h.bf16 %v7780_v21  ;;  %v7781_v41 = vunpack.i.l.bf16 %v7780_v21  ;;  %v10494_v13 = vpop.f32.mrf.mxu3 }
 0x506   :  { %3248 = vmatmul.bf16.gmra.mxu1 %v2906_v30  ;;  %12082 = vst [vmem:[#allocation56_spill] sm:$0xff] %v10494_v13  ;;  %v2748_v3 = vsel %vm2567_vm1, %v1695_v28, %v7712_v51  ;;  %v3476_v30 = vadd.f32 %v12086_v33, %v10077_v35  ;;  %v12092_v35 = vld [vmem:[#allocation107_spill] sm:$0xff] }
 0x507   :  { %v2600_v2 = vsel %vm2567_vm1, %v12083_v10, %v7676_v25  ;;  %v3696_v27 = vsel %vm2611_vm2, %v10491_v7, %v7781_v41  ;;  %v10518_v28 = vsel %vm2611_vm2, %v2748_v3, %v7716_v53  ;;  %v12089_v41 = vld [vmem:[#allocation109_spill] sm:$0xff]  ;;  %v12090_v25 = vld [vmem:[#allocation102_spill] sm:$0xff]  ;;  %v7682_v3 = vunpack.i.h.bf16 %v10444_v1 }
 0x508   :  { %v10512_v52 = vpack.c.bf16 %v3696_v27, %v7782_v45  ;;  %v2644_v55 = vsel %vm2611_vm2, %v2600_v2, %v12088_v14  ;;  %v2601_v51 = vsel %vm2567_vm1, %v12089_v41, %v7677_v57  ;;  %v12091_v10 = vld [vmem:[#allocation33_spill] sm:$0xff]  ;;  %v12093_v45 = vld [vmem:[#allocation31_spill] sm:$0xff]  ;;  %v3569_v53 = vmax.f32 %v3476_v30, 0.0 }
 0x509   :  { %v2694_v31 = vsel %vm2655_vm3, %v2644_v55, %v7672_v61  ;;  %v3466_v16 = vadd.f32 %v12091_v10, %v12090_v25  ;;  %v3471_v48 = vadd.f32 %v12093_v45, %v12092_v35  ;;  %v12094_v61 = vunpack.i.l.bf16 %v10268_v47 }
 0x50a   :  { %12087 = vst [vmem:[#allocation61_spill] sm:$0xff] %v10512_v52  ;;  %6347 = vmatmul.msk.bf16.gmra.mxu3 %vm10506_vm7, %v10512_v52  ;;  %v7681_v55 = vunpack.i.l.bf16 %v10444_v1  ;;  %v7696_v45 = vunpack.i.l.bf16 %v10466_v6 }
 0x50b   :  { %v7725_v27 = vpop.permute.xlu1 %7724  ;;  %v2645_v14 = vsel %vm2611_vm2, %v2601_v51, %v12094_v61  ;;  %v3565_v35 = vmax.f32 %v3466_v16, 0.0  ;;  %v3567_v2 = vmax.f32 %v3471_v48, 0.0  ;;  %v12096_v51 = vunpack.i.h.bf16 %v10426_v11 }
 0x50c   :  { %v10532_v33 = vpop.permute.xlu0 %7689  ;;  %3386 = vmatmul.bf16.gmra.mxu2 %v2910_v23  ;;  %v10534_v57 = vpop.permute.xlu2 %7789  ;;  %v7047_v23 = vld [vmem:[%s11648_s5 + $0x60] sm:$0xff]  ;;  %v2695_v25 = vsel %vm2655_vm3, %v2645_v14, %v7681_v55 }
 0x50d   :  { %v11754_v41 = vunpack.i.l.bf16 %v10532_v33  ;;  %v10543_v30 = vpop.f32.mrf.mxu3  ;;  %v2794_v1 = vsel %vm2611_vm2, %v10278_v8, %v12096_v51  ;;  %4133 = vmatpush.bf16.msra.mxu1 %v7047_v23  ;;  %v12097_v48 = vunpack.i.l.bf16 %v10534_v57  ;;  %v12098_v8 = vunpack.i.h.bf16 %v10534_v57 }
 0x50e   :  { %12095 = vst [vmem:[#allocation3_spill] sm:$0xff] %v10543_v30  ;;  %v2843_v10 = vsel %vm2655_vm3, %v2794_v1, %v7682_v3  ;;  %v2909_v14 = vpack.c.bf16 %v2695_v25, %v2694_v31  ;;  %v12103_v31 = vld [vmem:[#allocation10_spill] sm:$0xff]  ;;  %v12106_v30 = vld [vmem:[#allocation112_spill] sm:$0xff] }
 0x50f   :  { %v2795_v61 = vsel %vm2611_vm2, %v10275_v50, %v11754_v41  ;;  %v10563_v52 = vsel %vm2611_vm2, %v3565_v35, %v12097_v48  ;;  %v10568_v51 = vsel %vm2611_vm2, %v3567_v2, %v12098_v8  ;;  %v10572_v50 = vsel %vm2611_vm2, %v3569_v53, %v8421_v39  ;;  %v7057_v53 = vld [vmem:[%s11648_s5 + $0xb0] sm:$0xff] }
 0x510   :  { %v2844_v16 = vsel %vm2655_vm3, %v2795_v61, %v7696_v45  ;;  %12099 = vst [vmem:[#allocation20_spill] sm:$0xff] %v10568_v51  ;;  %v7726_v35 = vunpack.i.l.bf16 %v7725_v27  ;;  %v7711_v2 = vunpack.i.l.bf16 %v10489_v63  ;;  %v1481_v25 = vadd.f32 %v10088_v29, %v12103_v31  ;;  %4180 = vmatpush.bf16.msra.mxu2 %v7057_v53  ;;  %v12104_v31 = vld [vmem:[#allocation30_spill] sm:$0xff] }
 0x511   :  { %v2913_v13 = vpack.c.bf16 %v2844_v16, %v2843_v10  ;;  %12100 = vst [vmem:[#allocation22_spill] sm:$0xff] %v10572_v50  ;;  %v12101_v10 = vld [vmem:[#allocation60_spill] sm:$0xff]  ;;  %v7727_v61 = vunpack.i.h.bf16 %v7725_v27  ;;  %v7702_v48 = vunpack.i.h.bf16 %v10287_v0  ;;  %v7701_v8 = vunpack.i.l.bf16 %v10287_v0  ;;  %v12107_v53 = vld [vmem:[#allocation38_spill] sm:$0xff] }
 0x512   :  { %v1456_v23 = vadd.f32 %v10088_v29, %v12101_v10  ;;  %v10590_v10 = vpop.f32.mrf.mxu1  ;;  %v2604_v3 = vsel %vm2567_vm1, 0.0, %v7726_v35  ;;  %v7692_v63 = vunpack.i.h.bf16 %v10532_v33  ;;  %v1703_v51 = vmax.f32 %v1481_v25, 0.0 }
 0x513   :  { %v10576_v55 = vpop.permute.xlu1 %7739  ;;  %v2605_v27 = vsel %vm2567_vm1, %v12104_v31, %v7727_v61  ;;  %v2603_v35 = vsel %vm2567_vm1, %v12106_v30, %v7702_v48  ;;  %v2602_v49 = vsel %vm2567_vm1, %v12107_v53, %v7701_v8  ;;  %v12108_v8 = vunpack.i.l.bf16 %v10152_v20 }
 0x514   :  { %v7705_v45 = vpop.permute.xlu0 %7704  ;;  %v1693_v16 = vmax.f32 %v1456_v23, 0.0  ;;  %v12105_v23 = vunpack.i.h.bf16 %v10133_v56  ;;  %v2647_v61 = vsel %vm2611_vm2, %v2603_v35, %v7692_v63  ;;  %v12109_v20 = vunpack.i.h.bf16 %v10268_v47 }
 0x515   :  { %v10580_v1 = vpop.f32.mrf.mxu3  ;;  %v7707_v50 = vunpack.i.h.bf16 %v7705_v45 }
 0x516   :  { %3253 = vmatmul.bf16.gmra.mxu1 %v2909_v14  ;;  %12102 = vst [vmem:[#allocation62_spill] sm:$0xff] %v10580_v1  ;;  %v10592_v14 = vpop.f32.mrf.mxu2  ;;  %v2747_v41 = vsel %vm2567_vm1, %v1693_v16, %v7711_v2  ;;  %v7706_v1 = vunpack.i.l.bf16 %v7705_v45  ;;  %v2648_v0 = vsel %vm2611_vm2, %v2604_v3, %v12105_v23  ;;  %v7697_v2 = vunpack.i.h.bf16 %v10466_v6 }
 0x517   :  { %v2796_v45 = vsel %vm2611_vm2, %v2747_v41, %v8421_v39  ;;  %v2649_v6 = vsel %vm2611_vm2, %v2605_v27, %v12108_v8  ;;  %v2646_v27 = vsel %vm2611_vm2, %v2602_v49, %v12109_v20  ;;  %v7747_v8 = vunpack.i.h.bf16 %v10385_v15 }
 0x518   :  { %v2697_v48 = vsel %vm2655_vm3, %v2647_v61, %v7706_v1  ;;  %v2845_v63 = vsel %vm2655_vm3, %v2796_v45, %v7707_v50  ;;  %v7741_v61 = vunpack.i.l.bf16 %v10576_v55 }
 0x51b   :  { %v10602_v17 = vpop.permute.xlu1 %7754 }
 0x51c   :  { %v7757_v25 = vunpack.i.h.bf16 %v10602_v17  ;;  %v7720_v16 = vpop.permute.xlu0 %7719  ;;  %3391 = vmatmul.bf16.gmra.mxu2 %v2913_v13  ;;  %v10622_v13 = vsel %vm2655_vm3, %v2648_v0, %v8449_v5  ;;  %v2696_v0 = vsel %vm2655_vm3, %v2646_v27, %v7697_v2 }
 0x51d   :  { %v7722_v56 = vunpack.i.h.bf16 %v7720_v16  ;;  %v7721_v31 = vunpack.i.l.bf16 %v7720_v16  ;;  %v10611_v3 = vpop.f32.mrf.mxu3 }
 0x51e   :  { %v2752_v30 = vsel %vm2567_vm1, %v1703_v51, %v7757_v25  ;;  %v3362_v51 = vpop.f32.mrf.mxu2  ;;  %v3222_v25 = vadd.f32 %v10171_v24, %v10406_v19  ;;  %v10653_v19 = vsel %vm2655_vm3, %v10379_v37, %v7741_v61 }
 0x51f   :  { %v2846_v23 = vsel %vm2655_vm3, %v10518_v28, %v7721_v31  ;;  %v2699_v35 = vsel %vm2655_vm3, %v2649_v6, %v7722_v56  ;;  %v10630_v41 = vsel %vm2611_vm2, %v2752_v30, %v10432_v22  ;;  %v2912_v28 = vpack.c.bf16 %v2697_v48, %v2696_v0 }
 0x520   :  { %v3229_v1 = vpop.f32.mrf.mxu1  ;;  %v2916_v53 = vpack.c.bf16 %v2846_v23, %v2845_v63  ;;  %v2915_v5 = vpack.c.bf16 %v2699_v35, %v10622_v13  ;;  %v7742_v31 = vunpack.i.h.bf16 %v10576_v55  ;;  %v3355_v45 = vadd.f32 %v10436_v44, %v3222_v25  ;;  %v12110_v55 = vld [vmem:[#allocation58_spill] sm:$0xff]  ;;  %v12114_v25 = vld [vmem:[#allocation84_spill] sm:$0xff] }
 0x521   :  { %v3230_v50 = vadd.f32 %v10171_v24, %v3229_v1 }
 0x522   :  { %v3488_v23 = vadd.f32 %v12110_v55, %v3355_v45  ;;  %v12120_v55 = vld [vmem:[#allocation86_spill] sm:$0xff] }
 0x523   :  { %v10640_v16 = vadd.f32 %v3362_v51, %v3230_v50  ;;  %v10642_v22 = vpop.permute.xlu1 %7764  ;;  %v12111_v51 = vld [vmem:[#allocation37_spill] sm:$0xff]  ;;  %v12112_v50 = vld [vmem:[#allocation8_spill] sm:$0xff] }
 0x524   :  { %v7735_v47 = vpop.permute.xlu0 %7734  ;;  %v2607_v37 = vsel %vm2567_vm1, %v12111_v51, %v7747_v8  ;;  %v1476_v0 = vadd.f32 %v10088_v29, %v12112_v50  ;;  %v12118_v8 = vld [vmem:[#allocation69_spill] sm:$0xff]  ;;  %v7756_v51 = vunpack.i.l.bf16 %v10602_v17 }
 0x525   :  { %v7736_v49 = vunpack.i.l.bf16 %v7735_v47  ;;  %v10645_v56 = vpop.f32.mrf.mxu3 }
 0x526   :  { %3258 = vmatmul.bf16.gmra.mxu1 %v2912_v28  ;;  %v3364_v63 = vpop.f32.mrf.mxu2  ;;  %v12113_v28 = vld [vmem:[#allocation66_spill] sm:$0xff] }
 0x527   :  { %v2799_v2 = vsel %vm2611_vm2, %v10352_v42, %v7736_v49  ;;  %v3431_v61 = vadd.f32 %v12114_v25, %v12113_v28  ;;  %v12115_v49 = vld [vmem:[#allocation72_spill] sm:$0xff]  ;;  %v7737_v25 = vunpack.i.h.bf16 %v7735_v47 }
 0x528   :  { %v3231_v30 = vpop.f32.mrf.mxu1  ;;  %v2848_v48 = vsel %vm2655_vm3, %v2799_v2, %v7742_v31  ;;  %v12116_v31 = vld [vmem:[#allocation93_spill] sm:$0xff] }
 0x529   :  { %v3232_v6 = vadd.f32 %v10171_v24, %v3231_v30  ;;  %v2919_v13 = vpack.c.bf16 %v2848_v48, %v10653_v19  ;;  %v3441_v45 = vadd.f32 %v12116_v31, %v12115_v49  ;;  %v3574_v30 = vmax.f32 %v3488_v23, 0.0 }
 0x52a   :  { %v3551_v23 = vmax.f32 %v3431_v61, 0.0 }
 0x52b   :  { %v3365_v44 = vadd.f32 %v3364_v63, %v3232_v6  ;;  %v10660_v35 = vpop.permute.xlu1 %2019  ;;  %v12119_v6 = vld [vmem:[#allocation90_spill] sm:$0xff]  ;;  %v3555_v28 = vmax.f32 %v3441_v45, 0.0 }
 0x52c   :  { %v7750_v42 = vpop.permute.xlu0 %7749  ;;  %3396 = vmatmul.bf16.gmra.mxu2 %v2916_v53  ;;  %v12117_v53 = vunpack.i.l.bf16 %v10426_v11  ;;  %v3436_v63 = vadd.f32 %v12119_v6, %v12118_v8  ;;  %v12123_v6 = vld [vmem:[#allocation79_spill] sm:$0xff] }
 0x52d   :  { %v3498_v1 = vadd.f32 %v10094_v4, %v3365_v44  ;;  %v7752_v20 = vunpack.i.h.bf16 %v7750_v42  ;;  %v7751_v27 = vunpack.i.l.bf16 %v7750_v42  ;;  %v10665_v15 = vpop.f32.mrf.mxu3  ;;  %v3190_v44 = vadd.f32 %v10171_v24, %v12120_v55 }
 0x52e   :  { %v2651_v2 = vsel %vm2611_vm2, %v2607_v37, %v12117_v53  ;;  %v1701_v37 = vmax.f32 %v1476_v0, 0.0 }
 0x52f   :  { %v3578_v19 = vmax.f32 %v3498_v1, 0.0  ;;  %v2700_v4 = vsel %vm2655_vm3, %v10419_v36, %v7751_v27  ;;  %v2701_v48 = vsel %vm2655_vm3, %v2651_v2, %v7752_v20  ;;  %v3553_v36 = vmax.f32 %v3436_v63, 0.0  ;;  %v12121_v20 = vld [vmem:[#allocation87_spill] sm:$0xff]  ;;  %v12122_v2 = vld [vmem:[#allocation13_spill] sm:$0xff] }
 0x530   :  { %v2918_v42 = vpack.c.bf16 %v2701_v48, %v2700_v4  ;;  %v3323_v27 = vadd.f32 %v12121_v20, %v3190_v44  ;;  %v1488_v17 = vadd.f32 %v10088_v29, %v12122_v2  ;;  %v2751_v47 = vsel %vm2567_vm1, %v1701_v37, %v7756_v51  ;;  %v12124_v63 = vld [vmem:[#allocation103_spill] sm:$0xff]  ;;  %v12125_v44 = vld [vmem:[#allocation105_spill] sm:$0xff] }
 0x531   :  { %v7798_v50 = vpack.i.bf16 %v3574_v30, %v3578_v19  ;;  %v2800_v30 = vsel %vm2611_vm2, %v2751_v47, %v7737_v25  ;;  %v10708_v29 = vsel %vm2611_vm2, %v3555_v28, %v8421_v39  ;;  %v3451_v55 = vadd.f32 %v12124_v63, %v12123_v6  ;;  %v7046_v28 = vld [vmem:[%s11648_s5 + $0x58] sm:$0xff]  ;;  %v12126_v47 = vld [vmem:[#allocation63_spill] sm:$0xff] }
 0x532   :  { %v3456_v51 = vadd.f32 %v12125_v44, %v3323_v27  ;;  %v1706_v25 = vmax.f32 %v1488_v17, 0.0  ;;  %4134 = vmatpush.bf16.msra.mxu1 %v7046_v28  ;;  %v3227_v44 = vadd.f32 %v10171_v24, %v10590_v10 }
 0x533   :  { %7799 = vrot.lane.b32.xlu1 %v7798_v50, %s7843_s1  ;;  %v10685_v1 = vpop.permute.xlu1 %7774 }
 0x534   :  { %v7760_v49 = vpop.permute.xlu0 %7759  ;;  %v7777_v31 = vunpack.i.h.bf16 %v10685_v1  ;;  %v7776_v53 = vunpack.i.l.bf16 %v10685_v1 }
 0x535   :  { %v7762_v0 = vunpack.i.h.bf16 %v7760_v49  ;;  %v7761_v61 = vunpack.i.l.bf16 %v7760_v49  ;;  %v10693_v45 = vpop.f32.mrf.mxu3 }
 0x536   :  { %3263 = vmatmul.bf16.gmra.mxu1 %v2915_v5  ;;  %v10699_v19 = vsel %vm2611_vm2, %v3551_v23, %v7776_v53  ;;  %v10704_v5 = vsel %vm2611_vm2, %v3553_v36, %v7777_v31  ;;  %v10722_v23 = vmax.f32 %v3451_v55, 0.0 }
 0x537   :  { %v2849_v4 = vsel %vm2655_vm3, %v2800_v30, %v7761_v61  ;;  %v2850_v48 = vsel %vm2655_vm3, %v10630_v41, %v7762_v0  ;;  %v3744_v8 = vpack.c.bf16 %v10708_v29, %v10704_v5  ;;  %v10724_v41 = vmax.f32 %v3456_v51, 0.0  ;;  %v12127_v0 = vld [vmem:[#allocation82_spill] sm:$0xff]  ;;  %v7069_v5 = vld [vmem:[%s11648_s5 + $0x110] sm:$0xff] }
 0x538   :  { %v2922_v50 = vpack.c.bf16 %v2850_v48, %v2849_v4  ;;  %v3426_v61 = vadd.f32 %v12127_v0, %v12126_v47  ;;  %v7767_v51 = vunpack.i.h.bf16 %v10642_v22  ;;  %v12131_v47 = vld [vmem:[#allocation50_spill] sm:$0xff] }
 0x53b   :  { %2338 = vrot.lane.b32.xlu1 %v1706_v25, %s7842_s10  ;;  %v7785_v37 = vpop.permute.xlu1 %7784  ;;  %v7766_v25 = vunpack.i.l.bf16 %v10642_v22 }
 0x53c   :  { %v10726_v36 = vpop.permute.xlu0 %1848  ;;  %3401 = vmatmul.bf16.gmra.mxu2 %v2919_v13  ;;  %v7787_v20 = vunpack.i.h.bf16 %v7785_v37  ;;  %v7786_v49 = vunpack.i.l.bf16 %v7785_v37  ;;  %v3549_v13 = vmax.f32 %v3426_v61, 0.0  ;;  %v7045_v61 = vld [vmem:[%s11648_s5 + $0x50] sm:$0xff] }
 0x53d   :  { %v3547_v27 = vpop.f32.mrf.mxu3  ;;  %v2608_v0 = vsel %vm2567_vm1, %v12131_v47, %v7766_v25  ;;  %4135 = vmatpush.bf16.msra.mxu1 %v7045_v61  ;;  %v12134_v25 = vunpack.i.l.bf16 %v10532_v33  ;;  %v7056_v33 = vld [vmem:[%s11648_s5 + $0xa8] sm:$0xff]  ;;  %v12135_v47 = vld [vmem:[#allocation53_spill] sm:$0xff]  ;;  %v7043_v61 = vld [vmem:[%s11648_s5 + $0x40] sm:$0xff] }
 0x53e   :  { %v3697_v2 = vsel %vm2611_vm2, %v10722_v23, %v7786_v49  ;;  %v3698_v17 = vsel %vm2611_vm2, %v10724_v41, %v7787_v20  ;;  %v3367_v4 = vpop.f32.mrf.mxu2  ;;  %v12128_v20 = vld [vmem:[#allocation92_spill] sm:$0xff]  ;;  %v12129_v49 = vld [vmem:[#allocation110_spill] sm:$0xff]  ;;  %4181 = vmatpush.bf16.msra.mxu2 %v7056_v33 }
 0x53f   :  { %v10734_v30 = vpack.c.bf16 %v3698_v17, %v3697_v2  ;;  %v3461_v27 = vadd.f32 %v12129_v49, %v12128_v20  ;;  %v12130_v17 = vld [vmem:[#allocation48_spill] sm:$0xff]  ;;  %v7772_v49 = vunpack.i.h.bf16 %v10446_v26 }
 0x540   :  { %v3234_v48 = vpop.f32.mrf.mxu1  ;;  %v2609_v10 = vsel %vm2567_vm1, %v12130_v17, %v7767_v51 }
 0x541   :  { %v3235_v6 = vadd.f32 %v10171_v24, %v3234_v48  ;;  %4104 = vmatmul.bf16.gmra.mxu3 %v10734_v30  ;;  %v3563_v48 = vmax.f32 %v3461_v27, 0.0 }
 0x543   :  { %v10738_v63 = vadd.f32 %v3367_v4, %v3235_v6  ;;  %v12132_v6 = vld [vmem:[#allocation27_spill] sm:$0xff] }
 0x544   :  { %v10740_v55 = vpop.permute.xlu0 %3658 }
 0x545   :  { %v10748_v28 = vsel %vm2611_vm2, %v3549_v13, %v10740_v55 }
 0x546   :  { %3268 = vmatmul.bf16.gmra.mxu1 %v2918_v42  ;;  %v3740_v37 = vpack.c.bf16 %v10699_v19, %v10748_v28  ;;  %v3360_v42 = vadd.f32 %v10592_v14, %v3227_v44  ;;  %v3369_v4 = vpop.f32.mrf.mxu2  ;;  %v12133_v44 = vunpack.i.h.bf16 %v10426_v11  ;;  %v7044_v11 = vld [vmem:[%s11648_s5 + $0x48] sm:$0xff] }
 0x547   :  { %4136 = vmatpush.bf16.msra.mxu1 %v7044_v11 }
 0x548   :  { %v3236_v2 = vpop.f32.mrf.mxu1  ;;  %v3493_v13 = vadd.f32 %v12132_v6, %v3360_v42  ;;  %v2652_v51 = vsel %vm2611_vm2, %v2608_v0, %v12133_v44  ;;  %v3481_v0 = vadd.f32 %v12135_v47, %v10264_v46  ;;  %v2610_v46 = vsel %vm2567_vm1, %v9864_v34, %v10726_v36 }
 0x549   :  { %v3237_v22 = vadd.f32 %v10171_v24, %v3236_v2  ;;  %v2653_v24 = vsel %vm2611_vm2, %v2609_v10, %v12134_v25  ;;  %v7771_v2 = vunpack.i.l.bf16 %v10446_v26  ;;  %v2654_v25 = vsel %vm2611_vm2, %v2610_v46, %v10660_v35 }
 0x54a   :  { %v3576_v17 = vmax.f32 %v3493_v13, 0.0  ;;  %v10795_v6 = vmax.f32 %v3481_v0, 0.0  ;;  %v6359_v0 = vpack.c.bf16 %v10740_v55, %v8421_v39 }
 0x54b   :  { %v3370_v20 = vadd.f32 %v3369_v4, %v3237_v22  ;;  %v2702_v26 = vsel %vm2655_vm3, %v2652_v51, %v7771_v2  ;;  %4137 = vmatpush.bf16.msra.mxu1 %v7043_v61  ;;  %v12136_v61 = vmax.f32 %v10034_v18, 0.0 }
 0x54c   :  { %3406 = vmatmul.bf16.gmra.mxu2 %v2922_v50  ;;  %v10764_v14 = vpop.permute.xlu0 %3664 }
 0x54d   :  { %v3503_v27 = vadd.f32 %v10154_v58, %v3370_v20  ;;  %v10777_v42 = vsel %vm2611_vm2, %v3563_v48, %v10764_v14  ;;  %v2703_v58 = vsel %vm2655_vm3, %v2653_v24, %v7772_v49  ;;  %v2704_v49 = vsel %vm2655_vm3, %v2654_v25, %v10468_v38  ;;  %v7055_v25 = vld [vmem:[%s11648_s5 + $0xa0] sm:$0xff] }
 0x54e   :  { %v3748_v50 = vpack.c.bf16 %v10563_v52, %v10777_v42  ;;  %v2921_v4 = vpack.c.bf16 %v2703_v58, %v2702_v26  ;;  %v2924_v34 = vpack.c.bf16 %v2704_v49, %v2704_v49  ;;  %4182 = vmatpush.bf16.msra.mxu2 %v7055_v25  ;;  %v6364_v49 = vpack.c.bf16 %v7777_v31, %v7776_v53  ;;  %v12154_v52 = vld [vmem:[#allocation22_spill] sm:$0xff]  ;;  %v12155_v42 = vld [vmem:[#allocation20_spill] sm:$0xff] }
 0x54f   :  { %v3580_v10 = vmax.f32 %v3503_v27, 0.0  ;;  %v10814_v27 = vld [vmem:[%s11647_s4] ss:$0 sm:$0xff]  ;;  %v3711_v31 = vsel %vm2611_vm2, %v10722_v23, %v10764_v14  ;;  %v12138_v14 = vunpack.i.l.bf16 %v10534_v57  ;;  %v12141_v25 = vunpack.i.h.bf16 %v10534_v57 }
 0x551   :  { %v7803_v22 = vpack.i.bf16 %v3580_v10, %v3576_v17 }
 0x553   :  { %7804 = vrot.lane.b32.xlu2 %v7803_v22, %s7843_s1 }
 0x554   :  { %v7795_v48 = vpop.permute.xlu0 %7794 }
 0x555   :  { %v7797_v13 = vunpack.i.h.bf16 %v7795_v48  ;;  %v7796_v20 = vunpack.i.l.bf16 %v7795_v48 }
 0x556   :  { %3273 = vmatmul.bf16.gmra.mxu1 %v2921_v4 }
 0x557   :  { %v3700_v44 = vsel %vm2611_vm2, %v10795_v6, %v7796_v20 }
 0x558   :  { %v10799_v51 = vpack.c.bf16 %v3700_v44, %v7797_v13  ;;  %v12137_v13 = vld [vmem:[#allocation81_spill] sm:$0xff] }
 0x55a   :  { %6351 = vmatmul.msk.bf16.gmra.mxu3 %vm10506_vm7, %v10799_v51 }
 0x55f   :  { %v3372_v24 = vpop.f32.mrf.mxu2 }
 0x563   :  { %v3239_v2 = vpop.f32.mrf.mxu1 }
 0x564   :  { %v3240_v11 = vadd.f32 %v10814_v27, %v3239_v2 }
 0x566   :  { %v10817_v36 = vadd.f32 %v3372_v24, %v3240_v11  ;;  %3278 = vmatmul.bf16.gmra.mxu1 %v2924_v34 }
 0x567   :  { %v3374_v33 = vpop.f32.mrf.mxu2 }
 0x56b   :  { %v3241_v17 = vpop.f32.mrf.mxu1 }
 0x56c   :  { %v3242_v35 = vadd.f32 %v10814_v27, %v3241_v17 }
 0x56e   :  { %v3375_v26 = vadd.f32 %v3374_v33, %v3242_v35 }
 0x56f   :  { %v3377_v38 = vpop.f32.mrf.mxu2 }
 0x570   :  { %v3508_v58 = vadd.f32 %v10226_v32, %v3375_v26  ;;  %v10834_v32 = vld [vmem:[%s11645_s2] ss:$0 sm:$0xff] }
 0x571   :  { %v1521_v55 = vadd.f32 %v10834_v32, %v12137_v13 }
 0x572   :  { %v3582_v10 = vmax.f32 %v3508_v58, 0.0 }
 0x573   :  { %v3244_v47 = vpop.f32.mrf.mxu1  ;;  %v1719_v46 = vmax.f32 %v1521_v55, 0.0 }
 0x574   :  { %v3245_v22 = vadd.f32 %v10814_v27, %v3244_v47  ;;  %v7808_v4 = vpack.i.bf16 %v12136_v61, %v3582_v10 }
 0x576   :  { %v10826_v48 = vadd.f32 %v3377_v38, %v3245_v22  ;;  %7809 = vrot.lane.b32.xlu0 %v7808_v4, %s7843_s1  ;;  %6360 = vmatmul.msk.bf16.vlgmr.msra.gmra.mxu1 %vm10241_vm5, %v6359_v0  ;;  %v3710_v0 = vsel %vm2611_vm2, %v10491_v7, %v8421_v39 }
 0x577   :  { %v3379_v20 = vpop.f32.mrf.mxu2  ;;  %v3747_v61 = vpack.c.bf16 %v3711_v31, %v3710_v0  ;;  %v12144_v31 = vld [vmem:[#allocation78_spill] sm:$0xff] }
 0x57b   :  { %v3246_v44 = vpop.f32.mrf.mxu1 }
 0x57c   :  { %v3247_v11 = vadd.f32 %v10814_v27, %v3246_v44 }
 0x57e   :  { %2516 = vrot.lane.b32.xlu0 %v1719_v46, %s7841_s24  ;;  %v3380_v17 = vadd.f32 %v3379_v20, %v3247_v11  ;;  %v3712_v20 = vsel %vm2611_vm2, %v10724_v41, %v12138_v14  ;;  %v12145_v14 = vld [vmem:[#allocation5_spill] sm:$0xff] }
 0x57f   :  { %v3382_v18 = vpop.f32.mrf.mxu2 }
 0x580   :  { %v3513_v58 = vadd.f32 %v10290_v54, %v3380_v17 }
 0x582   :  { %v3584_v10 = vmax.f32 %v3513_v58, 0.0 }
 0x583   :  { %v3249_v24 = vpop.f32.mrf.mxu1 }
 0x584   :  { %v3250_v2 = vadd.f32 %v10814_v27, %v3249_v24  ;;  %v6368_v24 = vpack.c.bf16 %v12141_v25, %v3712_v20 }
 0x586   :  { %v10848_v34 = vadd.f32 %v3382_v18, %v3250_v2  ;;  %6365 = vmatmul.msk.bf16.gmra.mxu1 %vm10241_vm5, %v6364_v49  ;;  %v12142_v49 = vld [vmem:[#allocation18_spill] sm:$0xff] }
 0x587   :  { %v3384_v33 = vpop.f32.mrf.mxu2  ;;  %v3496_v2 = vadd.f32 %v12142_v49, %v10640_v16 }
 0x58b   :  { %v3251_v35 = vpop.f32.mrf.mxu1 }
 0x58c   :  { %v3252_v26 = vadd.f32 %v10814_v27, %v3251_v35  ;;  %v3577_v35 = vmax.f32 %v3496_v2, 0.0 }
 0x58e   :  { %v3385_v38 = vadd.f32 %v3384_v33, %v3252_v26 }
 0x58f   :  { %v3387_v53 = vpop.f32.mrf.mxu2 }
 0x590   :  { %v3518_v1 = vadd.f32 %v10346_v40, %v3385_v38 }
 0x592   :  { %v3586_v47 = vmax.f32 %v3518_v1, 0.0  ;;  %v12143_v1 = vld [vmem:[#allocation29_spill] sm:$0xff] }
 0x593   :  { %v3254_v22 = vpop.f32.mrf.mxu1  ;;  %v3486_v16 = vadd.f32 %v12143_v1, %v10383_v12 }
 0x594   :  { %v3255_v4 = vadd.f32 %v10814_v27, %v3254_v22  ;;  %v7813_v13 = vpack.i.bf16 %v3584_v10, %v3586_v47  ;;  %v3501_v47 = vadd.f32 %v10135_v9, %v10738_v63 }
 0x596   :  { %v10862_v54 = vadd.f32 %v3387_v53, %v3255_v4  ;;  %7814 = vrot.lane.b32.xlu2 %v7813_v13, %s7843_s1  ;;  %4148 = vmatmul.bf16.gmra.mxu1 %v3747_v61  ;;  %v3491_v53 = vadd.f32 %v12144_v31, %v10454_v43  ;;  %v10897_v13 = vmax.f32 %v3486_v16, 0.0  ;;  %v3579_v12 = vmax.f32 %v3501_v47, 0.0  ;;  %v7054_v16 = vld [vmem:[%s11648_s5 + $0x98] sm:$0xff]  ;;  %v12146_v47 = vld [vmem:[#allocation3_spill] sm:$0xff] }
 0x597   :  { %v3389_v40 = vpop.f32.mrf.mxu2  ;;  %4183 = vmatpush.bf16.msra.mxu2 %v7054_v16 }
 0x59b   :  { %v3256_v55 = vpop.f32.mrf.mxu1 }
 0x59c   :  { %v3257_v33 = vadd.f32 %v10814_v27, %v3256_v55 }
 0x59e   :  { %v3390_v58 = vadd.f32 %v3389_v40, %v3257_v33  ;;  %v10899_v40 = vmax.f32 %v3491_v53, 0.0  ;;  %v3714_v33 = vsel %vm2611_vm2, %v10795_v6, %v8421_v39 }
 0x59f   :  { %v3392_v44 = vpop.f32.mrf.mxu2 }
 0x5a0   :  { %v3523_v22 = vadd.f32 %v10434_v59, %v3390_v58 }
 0x5a2   :  { %v3588_v63 = vmax.f32 %v3523_v22, 0.0 }
 0x5a3   :  { %v3259_v46 = vpop.f32.mrf.mxu1 }
 0x5a4   :  { %v3260_v11 = vadd.f32 %v10814_v27, %v3259_v46 }
 0x5a5   :  { %v7800_v60 = vpop.permute.xlu1 %7799 }
 0x5a6   :  { %v10882_v17 = vadd.f32 %v3392_v44, %v3260_v11  ;;  %6369 = vmatmul.msk.bf16.gmra.mxu1 %vm10872_vm8, %v6368_v24  ;;  %v7801_v26 = vunpack.i.l.bf16 %v7800_v60  ;;  %v7802_v61 = vunpack.i.h.bf16 %v7800_v60 }
 0x5a7   :  { %v3394_v38 = vpop.f32.mrf.mxu2 }
 0x5a8   :  { %v10887_v57 = vsel %vm2611_vm2, %v3577_v35, %v7801_v26  ;;  %v3715_v59 = vsel %vm2611_vm2, %v10897_v13, %v7801_v26  ;;  %v3701_v25 = vsel %vm2611_vm2, %v10897_v13, %v7802_v61 }
 0x5a9   :  { %v3755_v58 = vpack.c.bf16 %v3715_v59, %v3714_v33 }
 0x5ab   :  { %v3261_v10 = vpop.f32.mrf.mxu1 }
 0x5ac   :  { %v3262_v0 = vadd.f32 %v10814_v27, %v3261_v10 }
 0x5ad   :  { %v10901_v55 = vpop.permute.xlu2 %7804 }
 0x5ae   :  { %v3395_v4 = vadd.f32 %v3394_v38, %v3262_v0  ;;  %v7807_v43 = vunpack.i.h.bf16 %v10901_v55  ;;  %v7806_v44 = vunpack.i.l.bf16 %v10901_v55 }
 0x5af   :  { %v3397_v9 = vpop.f32.mrf.mxu2 }
 0x5b0   :  { %v3528_v20 = vadd.f32 %v12145_v14, %v3395_v4  ;;  %v3702_v24 = vsel %vm2611_vm2, %v10899_v40, %v7806_v44  ;;  %v10915_v49 = vsel %vm2611_vm2, %v3579_v12, %v7807_v43 }
 0x5b1   :  { %v10917_v11 = vpack.c.bf16 %v3702_v24, %v3701_v25  ;;  %v3756_v60 = vpack.c.bf16 %v10915_v49, %v10887_v57  ;;  %v7053_v24 = vld [vmem:[%s11648_s5 + $0x90] sm:$0xff] }
 0x5b2   :  { %v3590_v46 = vmax.f32 %v3528_v20, 0.0  ;;  %4184 = vmatpush.bf16.msra.mxu2 %v7053_v24  ;;  %v3716_v24 = vsel %vm2611_vm2, %v10899_v40, %v7807_v43  ;;  %v12150_v43 = vld [vmem:[#allocation7_spill] sm:$0xff]  ;;  %v12157_v57 = vld [vmem:[#allocation56_spill] sm:$0xff] }
 0x5b3   :  { %v3264_v2 = vpop.f32.mrf.mxu1  ;;  %4114 = vmatmul.bf16.gmra.mxu3 %v10917_v11 }
 0x5b4   :  { %v3265_v35 = vadd.f32 %v10814_v27, %v3264_v2  ;;  %v7818_v26 = vpack.i.bf16 %v3590_v46, %v3588_v63 }
 0x5b6   :  { %v10926_v38 = vadd.f32 %v3397_v9, %v3265_v35  ;;  %7819 = vrot.lane.b32.xlu2 %v7818_v26, %s7843_s1  ;;  %4158 = vmatmul.bf16.gmra.mxu1 %v3755_v58  ;;  %v7052_v26 = vld [vmem:[%s11648_s5 + $0x88] sm:$0xff] }
 0x5b7   :  { %v3399_v1 = vpop.f32.mrf.mxu2  ;;  %4185 = vmatpush.bf16.msra.mxu2 %v7052_v26 }
 0x5b8   :  { %v3531_v49 = vadd.f32 %v12157_v57, %v10926_v38  ;;  %v7072_v57 = vld [vmem:[%s11650_s7 + $0x8] sm:$0xff] }
 0x5bb   :  { %v3266_v31 = vpop.f32.mrf.mxu1 }
 0x5bc   :  { %v3267_v53 = vadd.f32 %v10814_v27, %v3266_v31  ;;  %v7051_v31 = vld [vmem:[%s11648_s5 + $0x80] sm:$0xff] }
 0x5bd   :  { %4186 = vmatpush.bf16.msra.mxu2 %v7051_v31  ;;  %v7064_v31 = vld [vmem:[%s11648_s5 + $0xe8] sm:$0xff] }
 0x5be   :  { %v3400_v10 = vadd.f32 %v3399_v1, %v3267_v53 }
 0x5bf   :  { %v3402_v22 = vpop.f32.mrf.mxu2 }
 0x5c0   :  { %v3533_v0 = vadd.f32 %v12146_v47, %v3400_v10 }
 0x5c2   :  { %v3592_v61 = vmax.f32 %v3533_v0, 0.0  ;;  %v12147_v0 = vld [vmem:[#allocation57_spill] sm:$0xff] }
 0x5c3   :  { %v3269_v4 = vpop.f32.mrf.mxu1 }
 0x5c4   :  { %v3270_v12 = vadd.f32 %v10814_v27, %v3269_v4  ;;  %3676 = vrot.lane.b32.xlu1 %v3592_v61, %s7843_s1 }
 0x5c6   :  { %v10936_v14 = vadd.f32 %v3402_v22, %v3270_v12  ;;  %v3511_v22 = vadd.f32 %v12147_v0, %v10826_v48  ;;  %v4090_v12 = vpop.f32.mrf.mxu3 }
 0x5c7   :  { %v3404_v20 = vpop.f32.mrf.mxu2 }
 0x5cb   :  { %v3271_v44 = vpop.f32.mrf.mxu1 }
 0x5cc   :  { %v3272_v46 = vadd.f32 %v10814_v27, %v3271_v44 }
 0x5ce   :  { %v3405_v2 = vadd.f32 %v3404_v20, %v3272_v46  ;;  %v12148_v20 = vld [vmem:[#allocation41_spill] sm:$0xff] }
 0x5cf   :  { %v3407_v9 = vpop.f32.mrf.mxu2  ;;  %v3506_v44 = vadd.f32 %v12148_v20, %v10817_v36  ;;  %v7065_v36 = vld [vmem:[%s11648_s5 + $0xf0] sm:$0xff] }
 0x5d0   :  { %v3538_v1 = vadd.f32 %v10611_v3, %v3405_v2  ;;  %v7066_v3 = vld [vmem:[%s11648_s5 + $0xf8] sm:$0xff] }
 0x5d1   :  { %4228 = vmatpush.bf16.msrb.mxu3 %v7066_v3  ;;  %v3581_v48 = vmax.f32 %v3506_v44, 0.0 }
 0x5d2   :  { %v3594_v10 = vmax.f32 %v3538_v1, 0.0 }
 0x5d3   :  { %v3274_v63 = vpop.f32.mrf.mxu1 }
 0x5d4   :  { %v3275_v59 = vadd.f32 %v10814_v27, %v3274_v63  ;;  %v12149_v63 = vld [vmem:[#allocation12_spill] sm:$0xff] }
 0x5d5   :  { %4229 = vmatpush.bf16.msrb.mxu3 %v7065_v36  ;;  %v7061_v36 = vld [vmem:[%s11648_s5 + $0xd0] sm:$0xff] }
 0x5d6   :  { %v10940_v25 = vadd.f32 %v3407_v9, %v3275_v59  ;;  %v1486_v59 = vadd.f32 %v10834_v32, %v12149_v63  ;;  %v2339_v32 = vpop.permute.xlu1 %2338 }
 0x5d7   :  { %v3409_v58 = vpop.f32.mrf.mxu2 }
 0x5d8   :  { %v1705_v1 = vmax.f32 %v1486_v59, 0.0 }
 0x5d9   :  { %4230 = vmatpush.bf16.msrb.mxu3 %v7064_v31 }
 0x5db   :  { %v3276_v33 = vpop.f32.mrf.mxu1 }
 0x5dc   :  { %v3277_v35 = vadd.f32 %v10814_v27, %v3276_v33 }
 0x5de   :  { %v3410_v16 = vadd.f32 %v3409_v58, %v3277_v35 }
 0x5e0   :  { %v3543_v53 = vadd.f32 %v10665_v15, %v3410_v16  ;;  %v3583_v15 = vmax.f32 %v3511_v22, 0.0  ;;  %v3516_v16 = vadd.f32 %v12150_v43, %v10848_v34 }
 0x5e2   :  { %v3596_v47 = vmax.f32 %v3543_v53, 0.0  ;;  %v10978_v26 = vsel %vm2611_vm2, %v3583_v15, %v8421_v39  ;;  %v10992_v53 = vld [vmem:[%s11649_s6] ss:$0 sm:$0xff] }
 0x5e3   :  { %v10956_v61 = vpop.f32.mrf.mxu1  ;;  %v4091_v15 = vadd.f32 %v10992_v53, %v4090_v12  ;;  %v7062_v12 = vld [vmem:[%s11648_s5 + $0xd8] sm:$0xff] }
 0x5e4   :  { %v7823_v4 = vpack.i.bf16 %v3596_v47, %v3594_v10  ;;  %v10994_v10 = vpop.f32.mrf.mxu3  ;;  %v2753_v47 = vsel %vm2567_vm1, %v1705_v1, %v2339_v32  ;;  %v7060_v32 = vld [vmem:[%s11648_s5 + $0xc8] sm:$0xff]  ;;  %v3280_v18 = vadd.f32 %v10814_v27, %v10956_v61 }
 0x5e6   :  { %7824 = vrot.lane.b32.xlu0 %v7823_v4, %s7843_s1  ;;  %v10998_v4 = vmax.f32 %v3516_v16, 0.0  ;;  %v7059_v16 = vld [vmem:[%s11648_s5 + $0xc0] sm:$0xff] }
 0x5e8   :  { %v7810_v9 = vpop.permute.xlu0 %7809 }
 0x5e9   :  { %v7811_v46 = vunpack.i.l.bf16 %v7810_v9  ;;  %v7812_v58 = vunpack.i.h.bf16 %v7810_v9 }
 0x5eb   :  { %v6372_v2 = vpack.c.bf16 %v7811_v46, %v3716_v24  ;;  %v3281_v33 = vpop.f32.mrf.mxu1  ;;  %v10974_v35 = vsel %vm2611_vm2, %v3581_v48, %v7811_v46  ;;  %v2802_v34 = vsel %vm2611_vm2, %v2753_v47, %v7812_v58  ;;  %v7063_v48 = vld [vmem:[%s11648_s5 + $0xe0] sm:$0xff]  ;;  %v7070_v47 = vld [vmem:[%s11648_s5 + $0x118] sm:$0xff] }
 0x5ec   :  { %v3760_v55 = vpack.c.bf16 %v10978_v26, %v10974_v35  ;;  %4231 = vmatpush.bf16.msrb.mxu3 %v7063_v48  ;;  %4281 = vmatpush.bf16.msrb.mxu1 %v7070_v47  ;;  %v12153_v47 = vld [vmem:[#allocation61_spill] sm:$0xff] }
 0x5ed   :  { %6373 = vmatmul.msk.bf16.gmra.mxu1 %vm10872_vm8, %v6372_v2  ;;  %v4095_v2 = vpop.f32.mrf.mxu3 }
 0x5ee   :  { %v4096_v58 = vadd.f32 %v10992_v53, %v4095_v2 }
 0x5f0   :  { %v7815_v0 = vpop.permute.xlu2 %7814  ;;  %v2517_v22 = vpop.permute.xlu0 %2516  ;;  %4232 = vmatpush.bf16.msrb.mxu3 %v7062_v12  ;;  %4282 = vmatpush.bf16.msrb.mxu1 %v7069_v5 }
 0x5f1   :  { %v7817_v3 = vunpack.i.h.bf16 %v7815_v0  ;;  %v7816_v20 = vunpack.i.l.bf16 %v7815_v0  ;;  %v2851_v44 = vsel %vm2655_vm3, %v2802_v34, %v2517_v22  ;;  %v12151_v34 = vld [vmem:[#allocation34_spill] sm:$0xff] }
 0x5f2   :  { %v2925_v9 = vpack.c.bf16 %v2851_v44, %v2851_v44 }
 0x5f3   :  { %v3704_v63 = vsel %vm2611_vm2, %v10998_v4, %v7816_v20  ;;  %v4139_v59 = vpop.f32.mrf.mxu1  ;;  %v12152_v20 = vld [vmem:[#allocation52_spill] sm:$0xff] }
 0x5f4   :  { %v11007_v46 = vpack.c.bf16 %v3704_v63, %v7817_v3  ;;  %v11009_v24 = vadd.f32 %v4139_v59, %v4091_v15  ;;  %3411 = vmatmul.bf16.gmra.mxu2 %v2925_v9  ;;  %4233 = vmatpush.bf16.msrb.mxu3 %v7061_v36  ;;  %v3521_v3 = vadd.f32 %v12151_v34, %v10862_v54 }
 0x5f5   :  { %v11026_v1 = vpop.f32.mrf.mxu3  ;;  %v3526_v44 = vadd.f32 %v12152_v20, %v10882_v17 }
 0x5f6   :  { %6355 = vmatmul.msk.bf16.gmra.mxu3 %vm10506_vm7, %v11007_v46  ;;  %v11045_v9 = vmax.f32 %v3521_v3, 0.0 }
 0x5f7   :  { %v11047_v19 = vmax.f32 %v3526_v44, 0.0 }
 0x5f8   :  { %4234 = vmatpush.bf16.msrb.mxu3 %v7060_v32 }
 0x5fb   :  { %v11017_v33 = vpop.f32.mrf.mxu1 }
 0x5fc   :  { %4235 = vmatpush.bf16.msrb.mxu3 %v7059_v16 }
 0x5fd   :  { %v4100_v0 = vpop.f32.mrf.mxu3 }
 0x5fe   :  { %v4101_v63 = vadd.f32 %v10992_v53, %v4100_v0 }
 0x603   :  { %v4144_v43 = vpop.f32.mrf.mxu1 }
 0x604   :  { %v11031_v31 = vadd.f32 %v4144_v43, %v4096_v58  ;;  %4187 = vmatmul.bf16.vlgmr.msra.gmra.mxu2 %v3740_v37 }
 0x605   :  { %v11059_v2 = vpop.f32.mrf.mxu3 }
 0x60b   :  { %v11039_v22 = vpop.f32.mrf.mxu1 }
 0x60d   :  { %v4105_v32 = vpop.f32.mrf.mxu3 }
 0x60e   :  { %v4106_v58 = vadd.f32 %v10992_v53, %v4105_v32 }
 0x610   :  { %v7820_v15 = vpop.permute.xlu2 %7819 }
 0x611   :  { %v7822_v28 = vunpack.i.h.bf16 %v7820_v15  ;;  %v7821_v37 = vunpack.i.l.bf16 %v7820_v15  ;;  %v3718_v15 = vsel %vm2611_vm2, %v10998_v4, %v8421_v39 }
 0x613   :  { %v4149_v59 = vpop.f32.mrf.mxu1  ;;  %v3705_v48 = vsel %vm2611_vm2, %v11045_v9, %v7821_v37  ;;  %v3706_v12 = vsel %vm2611_vm2, %v11047_v19, %v7822_v28 }
 0x614   :  { %v11054_v54 = vadd.f32 %v4149_v59, %v4101_v63  ;;  %4192 = vmatmul.bf16.gmra.mxu2 %v3744_v8  ;;  %v3761_v17 = vpack.c.bf16 %v3706_v12, %v3705_v48  ;;  %v7067_v63 = vld [vmem:[%s11648_s5 + $0x100] sm:$0xff]  ;;  %v3591_v48 = vmax.f32 %v3531_v49, 0.0 }
 0x615   :  { %v11075_v29 = vpop.f32.mrf.mxu3  ;;  %v7071_v49 = vld [vmem:[%s11650_s7] sm:$0xff] }
 0x616   :  { %4124 = vmatmul.bf16.gmra.mxu3 %v3761_v17 }
 0x61b   :  { %v11061_v36 = vpop.f32.mrf.mxu1 }
 0x61d   :  { %v4110_v0 = vpop.f32.mrf.mxu3 }
 0x61e   :  { %v4111_v34 = vadd.f32 %v10992_v53, %v4110_v0 }
 0x623   :  { %v4154_v43 = vpop.f32.mrf.mxu1 }
 0x624   :  { %v11064_v16 = vadd.f32 %v4154_v43, %v4106_v58  ;;  %4197 = vmatmul.bf16.gmra.mxu2 %v3748_v50  ;;  %v12156_v50 = vpack.c.bf16 %v12154_v52, %v12155_v42  ;;  %v3541_v42 = vadd.f32 %v10645_v56, %v10940_v25  ;;  %v3750_v56 = vpack.c.bf16 %v10897_v13, %v10795_v6  ;;  %v7076_v6 = vld [vmem:[%s11650_s7 + $0x28] sm:$0xff] }
 0x625   :  { %v11115_v38 = vpop.f32.mrf.mxu3 }
 0x626   :  { %6381 = vmatmul.msk.bf16.vlgmr.msrb.gmra.mxu3 %vm10506_vm7, %v12153_v47 }
 0x62b   :  { %v11077_v8 = vpop.f32.mrf.mxu1 }
 0x633   :  { %v4159_v3 = vpop.f32.mrf.mxu1 }
 0x634   :  { %v11080_v20 = vadd.f32 %v4159_v3, %v4111_v34  ;;  %4202 = vmatmul.bf16.gmra.mxu2 %v12156_v50  ;;  %v3742_v3 = vpack.c.bf16 %v10722_v23, %v10491_v7  ;;  %v3595_v50 = vmax.f32 %v3541_v42, 0.0  ;;  %v7117_v42 = vld [vmem:[%s11650_s7 + $0x170] sm:$0xff] }
 0x636   :  { %v3677_v44 = vpop.permute.xlu1 %3676  ;;  %4241 = vmatmul.bf16.gmra.mxu3 %v10734_v30  ;;  %v7068_v30 = vld [vmem:[%s11648_s5 + $0x108] sm:$0xff] }
 0x637   :  { %v3719_v28 = vsel %vm2611_vm2, %v11045_v9, %v3677_v44  ;;  %4283 = vmatpush.bf16.msrb.mxu1 %v7068_v30  ;;  %v3734_v43 = vsel %vm2611_vm2, %v3591_v48, %v3677_v44  ;;  %v7085_v48 = vld [vmem:[%s11650_s7 + $0x70] sm:$0xff] }
 0x638   :  { %v3763_v37 = vpack.c.bf16 %v3719_v28, %v3718_v15  ;;  %v3746_v15 = vpack.c.bf16 0.0, %v10724_v41  ;;  %v3754_v41 = vpack.c.bf16 0.0, %v10899_v40  ;;  %v7074_v40 = vld [vmem:[%s11650_s7 + $0x18] sm:$0xff]  ;;  %v7073_v28 = vld [vmem:[%s11650_s7 + $0x10] sm:$0xff] }
 0x63a   :  { %4168 = vmatmul.bf16.gmra.mxu1 %v3763_v37  ;;  %v3758_v37 = vpack.c.bf16 %v11045_v9, %v10998_v4  ;;  %v7086_v4 = vld [vmem:[%s11650_s7 + $0x78] sm:$0xff] }
 0x63b   :  { %4284 = vmatpush.bf16.msrb.mxu1 %v7067_v63 }
 0x644   :  { %4207 = vmatmul.bf16.gmra.mxu2 %v3756_v60  ;;  %v12158_v60 = vld [vmem:[#allocation62_spill] sm:$0xff] }
 0x646   :  { %6385 = vmatmul.msk.bf16.gmra.mxu3 %vm10506_vm7, %v10799_v51  ;;  %v3536_v51 = vadd.f32 %v12158_v60, %v10936_v14  ;;  %v4115_v14 = vpop.f32.mrf.mxu3 }
 0x647   :  { %v4116_v5 = vadd.f32 %v10992_v53, %v4115_v14 }
 0x648   :  { %v3593_v12 = vmax.f32 %v3536_v51, 0.0 }
 0x64e   :  { %v11156_v25 = vpop.f32.mrf.mxu3 }
 0x654   :  { %4212 = vmatmul.bf16.gmra.mxu2 %v3760_v55 }
 0x656   :  { %4251 = vmatmul.bf16.gmra.mxu3 %v10917_v11  ;;  %v11119_v11 = vpop.f32.mrf.mxu1 }
 0x658   :  { %v7825_v59 = vpop.permute.xlu0 %7824 }
 0x659   :  { %v7827_v32 = vunpack.i.h.bf16 %v7825_v59  ;;  %v7826_v58 = vunpack.i.l.bf16 %v7825_v59 }
 0x65b   :  { %v3720_v47 = vsel %vm2611_vm2, %v11047_v19, %v7826_v58  ;;  %v3735_v35 = vsel %vm2611_vm2, %v3593_v12, %v7826_v58  ;;  %v3736_v7 = vsel %vm2611_vm2, %v3595_v50, %v7827_v32  ;;  %v3762_v12 = vpack.c.bf16 0.0, %v11047_v19  ;;  %v7082_v19 = vld [vmem:[%s11650_s7 + $0x58] sm:$0xff] }
 0x65c   :  { %v6376_v26 = vpack.c.bf16 %v7827_v32, %v3720_v47  ;;  %v3764_v55 = vpack.c.bf16 %v3735_v35, %v3734_v43  ;;  %v7084_v32 = vld [vmem:[%s11650_s7 + $0x68] sm:$0xff]  ;;  %v7083_v43 = vld [vmem:[%s11650_s7 + $0x60] sm:$0xff]  ;;  %v7110_v47 = vld [vmem:[%s11650_s7 + $0x138] sm:$0xff] }
 0x65d   :  { %5438 = vmatpush.bf16.msra.mxu3 %v7110_v47  ;;  %v7109_v35 = vld [vmem:[%s11650_s7 + $0x130] sm:$0xff] }
 0x65e   :  { %6377 = vmatmul.msk.bf16.gmra.mxu1 %vm10872_vm8, %v6376_v26  ;;  %v7081_v26 = vld [vmem:[%s11650_s7 + $0x50] sm:$0xff] }
 0x65f   :  { %v7141_v47 = vld [vmem:[%s11650_s7 + $0x230] sm:$0xff] }
 0x661   :  { %5439 = vmatpush.bf16.msra.mxu3 %v7109_v35  ;;  %v7094_v35 = vld [vmem:[%s11650_s7 + $0xb8] sm:$0xff] }
 0x664   :  { %4217 = vmatmul.bf16.gmra.mxu2 %v3764_v55 }
 0x666   :  { %6389 = vmatmul.msk.bf16.gmra.mxu3 %vm10506_vm7, %v11007_v46 }
 0x66a   :  { %v4164_v0 = vpop.f32.mrf.mxu1 }
 0x66b   :  { %v11125_v34 = vadd.f32 %v4164_v0, %v4116_v5  ;;  %v7108_v5 = vld [vmem:[%s11650_s7 + $0x128] sm:$0xff]  ;;  %v7118_v0 = vld [vmem:[%s11650_s7 + $0x178] sm:$0xff] }
 0x66c   :  { %5440 = vmatpush.bf16.msra.mxu3 %v7108_v5  ;;  %5451 = vmatpush.bf16.msra.mxu1 %v7118_v0  ;;  %v7140_v5 = vld [vmem:[%s11650_s7 + $0x228] sm:$0xff] }
 0x66e   :  { %6400 = vmatmul.msk.bf16.vlgmr.msrb.gmra.mxu1 %vm2611_vm2, %v3742_v3  ;;  %v7080_v3 = vld [vmem:[%s11650_s7 + $0x48] sm:$0xff] }
 0x670   :  { %5452 = vmatpush.bf16.msra.mxu1 %v7117_v42 }
 0x672   :  { %v11174_v30 = vpop.f32.mrf.mxu1 }
 0x676   :  { %4261 = vmatmul.bf16.gmra.mxu3 %v3761_v17  ;;  %v12159_v17 = vld [vmem:[#allocation40_spill] sm:$0xff] }
 0x677   :  { %v3412_v52 = vpop.f32.mrf.mxu2 }
 0x678   :  { %v3413_v21 = vadd.f32 %v3412_v52, %v3280_v18  ;;  %v7845_v18 = vmov 0.0|0.0   ;;  %v7107_v52 = vld [vmem:[%s11650_s7 + $0x120] sm:$0xff] }
 0x679   :  { %v4120_v13 = vpop.f32.mrf.mxu3  ;;  %5441 = vmatpush.bf16.msra.mxu3 %v7107_v52 }
 0x67a   :  { %v3546_v46 = vadd.f32 %v10693_v45, %v3413_v21  ;;  %v7078_v45 = vld [vmem:[%s11650_s7 + $0x38] sm:$0xff]  ;;  %v4121_v9 = vadd.f32 %v10992_v53, %v4120_v13  ;;  %v7079_v21 = vld [vmem:[%s11650_s7 + $0x40] sm:$0xff]  ;;  %v7113_v13 = vld [vmem:[%s11650_s7 + $0x150] sm:$0xff] }
 0x67b   :  { %5386 = vmatpush.bf16.msrb.mxu2 %v7078_v45  ;;  %v7104_v45 = vld [vmem:[%s11650_s7 + $0x108] sm:$0xff] }
 0x67c   :  { %v3597_v44 = vmax.f32 %v3546_v46, 0.0 }
 0x67e   :  { %6401 = vmatmul.msk.bf16.gmra.mxu1 %vm2611_vm2, %v3746_v15  ;;  %v3737_v23 = vsel %vm2611_vm2, %v3597_v44, %v8421_v39  ;;  %v7077_v39 = vld [vmem:[%s11650_s7 + $0x30] sm:$0xff]  ;;  %v7106_v44 = vld [vmem:[%s11650_s7 + $0x118] sm:$0xff]  ;;  %v7116_v15 = vld [vmem:[%s11650_s7 + $0x168] sm:$0xff] }
 0x67f   :  { %v3414_v27 = vpop.f32.mrf.mxu2  ;;  %v3767_v61 = vpack.c.bf16 %v3737_v23, %v3736_v7  ;;  %5387 = vmatpush.bf16.msrb.mxu2 %v7077_v39  ;;  %5442 = vmatpush.bf16.msra.mxu3 %v7106_v44  ;;  %v7105_v23 = vld [vmem:[%s11650_s7 + $0x110] sm:$0xff]  ;;  %v7114_v39 = vld [vmem:[%s11650_s7 + $0x158] sm:$0xff] }
 0x680   :  { %5453 = vmatpush.bf16.msra.mxu1 %v7116_v15  ;;  %v7115_v27 = vld [vmem:[%s11650_s7 + $0x160] sm:$0xff]  ;;  %v7092_v15 = vld [vmem:[%s11650_s7 + $0xa8] sm:$0xff] }
 0x681   :  { %4222 = vmatmul.bf16.gmra.mxu2 %v3767_v61  ;;  %v11176_v63 = vpop.f32.mrf.mxu3 }
 0x683   :  { %5388 = vmatpush.bf16.msrb.mxu2 %v7076_v6  ;;  %5443 = vmatpush.bf16.msra.mxu3 %v7105_v23 }
 0x684   :  { %5454 = vmatpush.bf16.msra.mxu1 %v7115_v27  ;;  %v7138_v27 = vld [vmem:[%s11650_s7 + $0x218] sm:$0xff] }
 0x686   :  { %6394 = vmatmul.msk.bf16.gmra.mxu3 %vm10241_vm5, %v12159_v17 }
 0x687   :  { %5389 = vmatpush.bf16.msrb.mxu2 %v7075_v62  ;;  %v4188_v55 = vpop.f32.mrf.mxu2  ;;  %5444 = vmatpush.bf16.msra.mxu3 %v7104_v45  ;;  %v7103_v62 = vld [vmem:[%s11650_s7 + $0x100] sm:$0xff] }
 0x688   :  { %5455 = vmatpush.bf16.msra.mxu1 %v7114_v39 }
 0x68b   :  { %5390 = vmatpush.bf16.msrb.mxu2 %v7074_v40  ;;  %v7134_v40 = vld [vmem:[%s11650_s7 + $0x1f8] sm:$0xff]  ;;  %5445 = vmatpush.bf16.msra.mxu3 %v7103_v62  ;;  %v7127_v62 = vld [vmem:[%s11650_s7 + $0x1c0] sm:$0xff] }
 0x68c   :  { %5456 = vmatpush.bf16.msra.mxu1 %v7113_v13  ;;  %v7137_v13 = vld [vmem:[%s11650_s7 + $0x210] sm:$0xff] }
 0x68e   :  { %6402 = vmatmul.msk.bf16.gmra.mxu1 %vm2611_vm2, %v3750_v56 }
 0x68f   :  { %5391 = vmatpush.bf16.msrb.mxu2 %v7073_v28  ;;  %v4190_v50 = vpop.f32.mrf.mxu2  ;;  %5477 = vmatpush.bf16.msrb.mxu3 %v7134_v40  ;;  %v7090_v40 = vld [vmem:[%s11650_s7 + $0x98] sm:$0xff] }
 0x693   :  { %5392 = vmatpush.bf16.msrb.mxu2 %v7072_v57  ;;  %v7133_v57 = vld [vmem:[%s11650_s7 + $0x1f0] sm:$0xff] }
 0x694   :  { %5478 = vmatpush.bf16.msrb.mxu3 %v7133_v57  ;;  %v7136_v57 = vld [vmem:[%s11650_s7 + $0x208] sm:$0xff] }
 0x696   :  { %6399 = vmatmul.msk.bf16.gmra.mxu3 %vm10241_vm5, %v12159_v17 }
 0x697   :  { %5393 = vmatpush.bf16.msrb.mxu2 %v7071_v49  ;;  %v4189_v49 = vadd.f32 %v4188_v55, %v11009_v24 }
 0x699   :  { %v4125_v60 = vpop.f32.mrf.mxu3 }
 0x69a   :  { %v4126_v61 = vadd.f32 %v10992_v53, %v4125_v60 }
 0x69b   :  { %5399 = vmatpush.bf16.msra.mxu2 %v7086_v4 }
 0x69e   :  { %6403 = vmatmul.msk.bf16.gmra.mxu1 %vm2611_vm2, %v3754_v41  ;;  %v11258_v41 = vpop.f32.mrf.mxu2 }
 0x69f   :  { %5400 = vmatpush.bf16.msra.mxu2 %v7085_v48  ;;  %v7142_v48 = vld [vmem:[%s11650_s7 + $0x238] sm:$0xff] }
 0x6a1   :  { %v11198_v58 = vpop.f32.mrf.mxu3 }
 0x6a3   :  { %5401 = vmatpush.bf16.msra.mxu2 %v7084_v32 }
 0x6a6   :  { %v11280_v4 = vpop.f32.mrf.mxu2 }
 0x6a7   :  { %5402 = vmatpush.bf16.msra.mxu2 %v7083_v43  ;;  %v7131_v43 = vld [vmem:[%s11650_s7 + $0x1e0] sm:$0xff] }
 0x6a9   :  { %v4237_v14 = vpop.f32.mrf.mxu3 }
 0x6ab   :  { %5403 = vmatpush.bf16.msra.mxu2 %v7082_v19 }
 0x6ae   :  { %6404 = vmatmul.msk.bf16.gmra.mxu1 %vm2611_vm2, %v3758_v37  ;;  %v7112_v37 = vld [vmem:[%s11650_s7 + $0x148] sm:$0xff] }
 0x6af   :  { %5404 = vmatpush.bf16.msra.mxu2 %v7081_v26  ;;  %5457 = vmatpush.bf16.msra.mxu1 %v7112_v37  ;;  %v4093_v26 = vadd.f32 %v10992_v53, %v10994_v10  ;;  %v7093_v10 = vld [vmem:[%s11650_s7 + $0xb0] sm:$0xff] }
 0x6b1   :  { %v11241_v7 = vpop.f32.mrf.mxu3  ;;  %v4142_v0 = vadd.f32 %v11017_v33, %v4093_v26  ;;  %v7139_v33 = vld [vmem:[%s11650_s7 + $0x220] sm:$0xff] }
 0x6b3   :  { %5405 = vmatpush.bf16.msra.mxu2 %v7080_v3  ;;  %v4198_v3 = vpop.f32.mrf.mxu2  ;;  %v4191_v42 = vadd.f32 %v4190_v50, %v4142_v0  ;;  %v7128_v50 = vld [vmem:[%s11650_s7 + $0x1c8] sm:$0xff]  ;;  %v7158_v0 = vld [vmem:[%s11650_s7 + $0x2b8] sm:$0xff] }
 0x6b5   :  { %v4240_v44 = vadd.f32 %v11241_v7, %v4191_v42  ;;  %v7091_v7 = vld [vmem:[%s11650_s7 + $0xa0] sm:$0xff] }
 0x6b7   :  { %v4169_v51 = vpop.f32.mrf.mxu1  ;;  %5406 = vmatpush.bf16.msra.mxu2 %v7079_v21  ;;  %v7129_v21 = vld [vmem:[%s11650_s7 + $0x1d0] sm:$0xff] }
 0x6b8   :  { %v11188_v59 = vadd.f32 %v4169_v51, %v4121_v9  ;;  %v7111_v9 = vld [vmem:[%s11650_s7 + $0x140] sm:$0xff]  ;;  %v7132_v51 = vld [vmem:[%s11650_s7 + $0x1e8] sm:$0xff] }
 0x6b9   :  { %v11260_v6 = vpop.f32.mrf.mxu3  ;;  %5458 = vmatpush.bf16.msra.mxu1 %v7111_v9  ;;  %5479 = vmatpush.bf16.msrb.mxu3 %v7132_v51  ;;  %v7089_v9 = vld [vmem:[%s11650_s7 + $0x90] sm:$0xff]  ;;  %v4194_v51 = vadd.f32 %v11258_v41, %v11031_v31 }
 0x6bd   :  { %5490 = vmatpush.bf16.msrb.mxu1 %v7142_v48  ;;  %5480 = vmatpush.bf16.msrb.mxu3 %v7131_v43  ;;  %v7135_v48 = vld [vmem:[%s11650_s7 + $0x200] sm:$0xff]  ;;  %v7088_v43 = vld [vmem:[%s11650_s7 + $0x88] sm:$0xff] }
 0x6be   :  { %6405 = vmatmul.msk.bf16.gmra.mxu1 %vm2611_vm2, %v3762_v12  ;;  %v4238_v12 = vadd.f32 %v4237_v14, %v4189_v49  ;;  %v7130_v14 = vld [vmem:[%s11650_s7 + $0x1d8] sm:$0xff] }
 0x6bf   :  { %v11233_v46 = vpop.f32.mrf.mxu1 }
 0x6c1   :  { %v11285_v60 = vpop.f32.mrf.mxu3  ;;  %5491 = vmatpush.bf16.msrb.mxu1 %v7141_v47  ;;  %5481 = vmatpush.bf16.msrb.mxu3 %v7130_v14  ;;  %v4199_v47 = vadd.f32 %v4198_v3, %v11054_v54  ;;  %v7102_v14 = vld [vmem:[%s11650_s7 + $0xf8] sm:$0xff] }
 0x6c5   :  { %5492 = vmatpush.bf16.msrb.mxu1 %v7140_v5  ;;  %5482 = vmatpush.bf16.msrb.mxu3 %v7129_v21 }
 0x6c9   :  { %5493 = vmatpush.bf16.msrb.mxu1 %v7139_v33  ;;  %5483 = vmatpush.bf16.msrb.mxu3 %v7128_v50  ;;  %v7157_v33 = vld [vmem:[%s11650_s7 + $0x2b0] sm:$0xff]  ;;  %v7156_v50 = vld [vmem:[%s11650_s7 + $0x2a8] sm:$0xff] }
 0x6cd   :  { %5494 = vmatpush.bf16.msrb.mxu1 %v7138_v27  ;;  %5484 = vmatpush.bf16.msrb.mxu3 %v7127_v62  ;;  %v7166_v27 = vld [vmem:[%s11650_s7 + $0x2f8] sm:$0xff]  ;;  %v7155_v62 = vld [vmem:[%s11650_s7 + $0x2a0] sm:$0xff] }
 0x6ce   :  { %4315 = vmatmul.bf16.gmra.mxu1 %v7845_v18 }
 0x6d1   :  { %5495 = vmatpush.bf16.msrb.mxu1 %v7137_v13  ;;  %v7165_v13 = vld [vmem:[%s11650_s7 + $0x2f0] sm:$0xff] }
 0x6d5   :  { %5496 = vmatpush.bf16.msrb.mxu1 %v7136_v57  ;;  %v4098_v57 = vadd.f32 %v10992_v53, %v11026_v1  ;;  %v7097_v1 = vld [vmem:[%s11650_s7 + $0xd0] sm:$0xff] }
 0x6d9   :  { %5497 = vmatpush.bf16.msrb.mxu1 %v7135_v48  ;;  %v7154_v48 = vld [vmem:[%s11650_s7 + $0x298] sm:$0xff] }
 0x6db   :  { %v4174_v17 = vpop.f32.mrf.mxu1 }
 0x6dc   :  { %v11250_v56 = vadd.f32 %v4174_v17, %v4126_v61  ;;  %v4200_v17 = vpop.f32.mrf.mxu2 }
 0x6de   :  { %4320 = vmatmul.bf16.gmra.mxu1 %v7845_v18  ;;  %v4247_v18 = vpop.f32.mrf.mxu3 }
 0x6df   :  { %v4248_v31 = vadd.f32 %v4247_v18, %v4199_v47 }
 0x6e3   :  { %v11271_v28 = vpop.f32.mrf.mxu1 }
 0x6e6   :  { %v4249_v39 = vpop.f32.mrf.mxu3 }
 0x6eb   :  { %v4286_v32 = vpop.f32.mrf.mxu1 }
 0x6ec   :  { %v4287_v24 = vadd.f32 %v4286_v32, %v4238_v12  ;;  %v11355_v12 = vpop.f32.mrf.mxu2  ;;  %v4243_v32 = vadd.f32 %v11260_v6, %v4194_v51  ;;  %v4103_v6 = vadd.f32 %v10992_v53, %v11059_v2  ;;  %v7101_v2 = vld [vmem:[%s11650_s7 + $0xf0] sm:$0xff]  ;;  %v4147_v51 = vadd.f32 %v11039_v22, %v4098_v57  ;;  %v7179_v57 = vld [vmem:[%s11650_s7 + $0x360] sm:$0xff] }
 0x6ee   :  { %v4326_v19 = vmax.f32 %v4287_v24, 0.0  ;;  %v11358_v24 = vpop.f32.mrf.mxu3  ;;  %v4152_v54 = vadd.f32 %v11061_v36, %v4103_v6 }
 0x6f0   :  { %v4342_v55 = vpack.c.bf16 %v4326_v19, %v4326_v19  ;;  %v4201_v3 = vadd.f32 %v4200_v17, %v4152_v54 }
 0x6f2   :  { %5394 = vmatmul.bf16.vlgmr.msrb.gmra.mxu2 %v4342_v55  ;;  %v4250_v21 = vadd.f32 %v4249_v39, %v4201_v3  ;;  %v7126_v3 = vld [vmem:[%s11650_s7 + $0x1b8] sm:$0xff] }
 0x6f3   :  { %5412 = vmatpush.bf16.msrb.mxu2 %v7094_v35  ;;  %v4288_v52 = vpop.f32.mrf.mxu1  ;;  %v7087_v35 = vld [vmem:[%s11650_s7 + $0x80] sm:$0xff] }
 0x6f4   :  { %v4289_v23 = vadd.f32 %v4288_v52, %v4240_v44  ;;  %v4205_v18 = vpop.f32.mrf.mxu2 }
 0x6f6   :  { %v4327_v45 = vmax.f32 %v4289_v23, 0.0  ;;  %v4254_v42 = vpop.f32.mrf.mxu3 }
 0x6f7   :  { %5413 = vmatpush.bf16.msrb.mxu2 %v7093_v10 }
 0x6f8   :  { %v4343_v37 = vpack.c.bf16 %v4327_v45, %v4327_v45 }
 0x6fb   :  { %5414 = vmatpush.bf16.msrb.mxu2 %v7092_v15  ;;  %v4291_v61 = vpop.f32.mrf.mxu1  ;;  %v7100_v15 = vld [vmem:[%s11650_s7 + $0xe8] sm:$0xff] }
 0x6fc   :  { %v4292_v19 = vadd.f32 %v4291_v61, %v4243_v32  ;;  %v4208_v17 = vpop.f32.mrf.mxu2 }
 0x6fd   :  { %v4209_v54 = vadd.f32 %v4208_v17, %v11080_v20  ;;  %v7151_v20 = vld [vmem:[%s11650_s7 + $0x280] sm:$0xff] }
 0x6fe   :  { %v4328_v26 = vmax.f32 %v4292_v19, 0.0  ;;  %v4257_v45 = vpop.f32.mrf.mxu3  ;;  %v7153_v19 = vld [vmem:[%s11650_s7 + $0x290] sm:$0xff]  ;;  %v7159_v17 = vld [vmem:[%s11650_s7 + $0x2c0] sm:$0xff] }
 0x6ff   :  { %5415 = vmatpush.bf16.msrb.mxu2 %v7091_v7  ;;  %v7099_v7 = vld [vmem:[%s11650_s7 + $0xe0] sm:$0xff] }
 0x700   :  { %v4344_v52 = vpack.c.bf16 %v4328_v26, %v4328_v26 }
 0x702   :  { %5407 = vmatmul.bf16.vlgmr.msra.gmra.mxu2 %v4343_v37  ;;  %v7098_v37 = vld [vmem:[%s11650_s7 + $0xd8] sm:$0xff] }
 0x703   :  { %5416 = vmatpush.bf16.msrb.mxu2 %v7090_v40  ;;  %v11345_v49 = vpop.f32.mrf.mxu1  ;;  %v4108_v40 = vadd.f32 %v10992_v53, %v11075_v29  ;;  %v7164_v29 = vld [vmem:[%s11650_s7 + $0x2e8] sm:$0xff] }
 0x707   :  { %5417 = vmatpush.bf16.msrb.mxu2 %v7089_v9  ;;  %v4157_v9 = vadd.f32 %v11077_v8, %v4108_v40  ;;  %v4196_v8 = vadd.f32 %v11280_v4, %v4147_v51  ;;  %v7096_v4 = vld [vmem:[%s11650_s7 + $0xc8] sm:$0xff]  ;;  %v7122_v51 = vld [vmem:[%s11650_s7 + $0x198] sm:$0xff] }
 0x709   :  { %v4206_v32 = vadd.f32 %v4205_v18, %v4157_v9  ;;  %v4245_v22 = vadd.f32 %v11285_v60, %v4196_v8  ;;  %v11433_v60 = vpop.f32.mrf.mxu3  ;;  %v4258_v18 = vadd.f32 %v4257_v45, %v4209_v54  ;;  %v7180_v45 = vld [vmem:[%s11650_s7 + $0x368] sm:$0xff]  ;;  %v7178_v8 = vld [vmem:[%s11650_s7 + $0x358] sm:$0xff] }
 0x70b   :  { %5418 = vmatpush.bf16.msrb.mxu2 %v7088_v43  ;;  %v4296_v41 = vpop.f32.mrf.mxu1  ;;  %v4255_v43 = vadd.f32 %v4254_v42, %v4206_v32  ;;  %v4294_v6 = vadd.f32 %v11345_v49, %v4245_v22  ;;  %v7182_v42 = vld [vmem:[%s11650_s7 + $0x378] sm:$0xff]  ;;  %v4118_v32 = vadd.f32 %v10992_v53, %v11156_v25  ;;  %v7188_v22 = vld [vmem:[%s11650_s7 + $0x3a8] sm:$0xff]  ;;  %v4204_v25 = vadd.f32 %v11355_v12, %v11064_v16  ;;  %v7187_v16 = vld [vmem:[%s11650_s7 + $0x3a0] sm:$0xff] }
 0x70c   :  { %v4297_v55 = vadd.f32 %v4296_v41, %v4248_v31  ;;  %v7163_v31 = vld [vmem:[%s11650_s7 + $0x2e0] sm:$0xff]  ;;  %v11428_v41 = vpop.f32.mrf.mxu2 }
 0x70d   :  { %v4329_v49 = vmax.f32 %v4294_v6, 0.0  ;;  %v7177_v6 = vld [vmem:[%s11650_s7 + $0x350] sm:$0xff] }
 0x70e   :  { %v4330_v5 = vmax.f32 %v4297_v55, 0.0  ;;  %v7152_v55 = vld [vmem:[%s11650_s7 + $0x288] sm:$0xff] }
 0x70f   :  { %5419 = vmatpush.bf16.msrb.mxu2 %v7087_v35 }
 0x710   :  { %v4346_v10 = vpack.c.bf16 %v4330_v5, %v4330_v5 }
 0x712   :  { %5420 = vmatmul.bf16.vlgmr.msrb.gmra.mxu2 %v4344_v52  ;;  %5446 = vmatmul.bf16.vlgmr.msra.gmra.mxu3 %v4346_v10 }
 0x713   :  { %5425 = vmatpush.bf16.msra.mxu2 %v7102_v14  ;;  %v4298_v36 = vpop.f32.mrf.mxu1  ;;  %5516 = vmatpush.bf16.msra.mxu3 %v7158_v0  ;;  %v7162_v14 = vld [vmem:[%s11650_s7 + $0x2d8] sm:$0xff]  ;;  %v7095_v0 = vld [vmem:[%s11650_s7 + $0xc0] sm:$0xff] }
 0x714   :  { %v4299_v44 = vadd.f32 %v4298_v36, %v4250_v21  ;;  %v4345_v21 = vpack.c.bf16 %v4329_v49, %v4329_v49  ;;  %v7125_v36 = vld [vmem:[%s11650_s7 + $0x1b0] sm:$0xff] }
 0x716   :  { %v4331_v23 = vmax.f32 %v4299_v44, 0.0 }
 0x717   :  { %5426 = vmatpush.bf16.msra.mxu2 %v7101_v2  ;;  %5517 = vmatpush.bf16.msra.mxu3 %v7157_v33  ;;  %v7161_v2 = vld [vmem:[%s11650_s7 + $0x2d0] sm:$0xff]  ;;  %v4213_v33 = vpop.f32.mrf.mxu2 }
 0x718   :  { %v4347_v61 = vpack.c.bf16 %v4331_v23, %v4331_v23  ;;  %v4214_v40 = vadd.f32 %v4213_v33, %v11125_v34 }
 0x71a   :  { %5459 = vmatmul.bf16.vlgmr.msra.gmra.mxu1 %v4347_v61  ;;  %v7124_v61 = vld [vmem:[%s11650_s7 + $0x1a8] sm:$0xff] }
 0x71b   :  { %5427 = vmatpush.bf16.msra.mxu2 %v7100_v15  ;;  %v11394_v39 = vpop.f32.mrf.mxu1  ;;  %5518 = vmatpush.bf16.msra.mxu3 %v7156_v50  ;;  %v4262_v15 = vpop.f32.mrf.mxu3  ;;  %v7160_v50 = vld [vmem:[%s11650_s7 + $0x2c8] sm:$0xff] }
 0x71c   :  { %5529 = vmatpush.bf16.msra.mxu1 %v7166_v27  ;;  %v7181_v27 = vld [vmem:[%s11650_s7 + $0x370] sm:$0xff] }
 0x71f   :  { %5428 = vmatpush.bf16.msra.mxu2 %v7099_v7  ;;  %5519 = vmatpush.bf16.msra.mxu3 %v7155_v62  ;;  %v7123_v62 = vld [vmem:[%s11650_s7 + $0x1a0] sm:$0xff] }
 0x720   :  { %5530 = vmatpush.bf16.msra.mxu1 %v7165_v13  ;;  %v7190_v13 = vld [vmem:[%s11650_s7 + $0x3b8] sm:$0xff] }
 0x723   :  { %5429 = vmatpush.bf16.msra.mxu2 %v7098_v37  ;;  %v4303_v47 = vpop.f32.mrf.mxu1  ;;  %5520 = vmatpush.bf16.msra.mxu3 %v7154_v48  ;;  %v4215_v37 = vpop.f32.mrf.mxu2  ;;  %v7189_v48 = vld [vmem:[%s11650_s7 + $0x3b0] sm:$0xff] }
 0x724   :  { %5531 = vmatpush.bf16.msra.mxu1 %v7164_v29  ;;  %v4304_v35 = vadd.f32 %v4303_v47, %v4255_v43  ;;  %v4264_v9 = vpop.f32.mrf.mxu3  ;;  %v4263_v29 = vadd.f32 %v4262_v15, %v4214_v40  ;;  %v7121_v43 = vld [vmem:[%s11650_s7 + $0x190] sm:$0xff]  ;;  %v4167_v47 = vadd.f32 %v11174_v30, %v4118_v32  ;;  %v7184_v15 = vld [vmem:[%s11650_s7 + $0x388] sm:$0xff]  ;;  %v7146_v40 = vld [vmem:[%s11650_s7 + $0x258] sm:$0xff] }
 0x726   :  { %v4333_v26 = vmax.f32 %v4304_v35, 0.0  ;;  %v4216_v35 = vadd.f32 %v4215_v37, %v4167_v47  ;;  %v4113_v37 = vadd.f32 %v10992_v53, %v11115_v38  ;;  %v7144_v38 = vld [vmem:[%s11650_s7 + $0x248] sm:$0xff] }
 0x727   :  { %5430 = vmatpush.bf16.msra.mxu2 %v7097_v1  ;;  %5521 = vmatpush.bf16.msra.mxu3 %v7153_v19 }
 0x728   :  { %5532 = vmatpush.bf16.msra.mxu1 %v7163_v31  ;;  %v4349_v5 = vpack.c.bf16 %v4333_v26, %v4333_v26  ;;  %v4253_v31 = vadd.f32 %v11358_v24, %v4204_v25  ;;  %v7120_v26 = vld [vmem:[%s11650_s7 + $0x188] sm:$0xff]  ;;  %v4265_v12 = vadd.f32 %v4264_v9, %v4216_v35  ;;  %v7173_v25 = vld [vmem:[%s11650_s7 + $0x330] sm:$0xff]  ;;  %v7170_v35 = vld [vmem:[%s11650_s7 + $0x318] sm:$0xff] }
 0x72a   :  { %5485 = vmatmul.bf16.vlgmr.msrb.gmra.mxu3 %v4349_v5  ;;  %v4302_v24 = vadd.f32 %v11394_v39, %v4253_v31  ;;  %v7176_v5 = vld [vmem:[%s11650_s7 + $0x348] sm:$0xff]  ;;  %v7186_v39 = vld [vmem:[%s11650_s7 + $0x398] sm:$0xff]  ;;  %v7171_v31 = vld [vmem:[%s11650_s7 + $0x320] sm:$0xff] }
 0x72b   :  { %5431 = vmatpush.bf16.msra.mxu2 %v7096_v4  ;;  %v4306_v52 = vpop.f32.mrf.mxu1  ;;  %5522 = vmatpush.bf16.msra.mxu3 %v7152_v55  ;;  %v11518_v30 = vpop.f32.mrf.mxu2 }
 0x72c   :  { %5533 = vmatpush.bf16.msra.mxu1 %v7162_v14  ;;  %v4307_v10 = vadd.f32 %v4306_v52, %v4258_v18  ;;  %v11521_v55 = vpop.f32.mrf.mxu3  ;;  %v4332_v49 = vmax.f32 %v4302_v24, 0.0  ;;  %v7150_v18 = vld [vmem:[%s11650_s7 + $0x278] sm:$0xff] }
 0x72e   :  { %v4334_v44 = vmax.f32 %v4307_v10, 0.0  ;;  %v7185_v10 = vld [vmem:[%s11650_s7 + $0x390] sm:$0xff] }
 0x72f   :  { %5432 = vmatpush.bf16.msra.mxu2 %v7095_v0  ;;  %5523 = vmatpush.bf16.msra.mxu3 %v7151_v20  ;;  %v7119_v0 = vld [vmem:[%s11650_s7 + $0x180] sm:$0xff] }
 0x730   :  { %v4350_v23 = vpack.c.bf16 %v4334_v44, %v4334_v44  ;;  %5534 = vmatpush.bf16.msra.mxu1 %v7161_v2  ;;  %v7175_v20 = vld [vmem:[%s11650_s7 + $0x340] sm:$0xff]  ;;  %v4348_v2 = vpack.c.bf16 %v4332_v49, %v4332_v49 }
 0x732   :  { %5433 = vmatmul.bf16.vlgmr.msra.gmra.mxu2 %v4345_v21  ;;  %5498 = vmatmul.bf16.vlgmr.msrb.gmra.mxu1 %v4350_v23 }
 0x733   :  { %5464 = vmatpush.bf16.msrb.mxu2 %v7126_v3  ;;  %5555 = vmatpush.bf16.msrb.mxu3 %v7182_v42  ;;  %v11470_v7 = vpop.f32.mrf.mxu1  ;;  %v7149_v42 = vld [vmem:[%s11650_s7 + $0x270] sm:$0xff]  ;;  %v4220_v33 = vpop.f32.mrf.mxu2 }
 0x734   :  { %5535 = vmatpush.bf16.msra.mxu1 %v7160_v50  ;;  %v4269_v44 = vpop.f32.mrf.mxu3  ;;  %v7148_v50 = vld [vmem:[%s11650_s7 + $0x268] sm:$0xff] }
 0x737   :  { %5465 = vmatpush.bf16.msrb.mxu2 %v7125_v36  ;;  %5556 = vmatpush.bf16.msrb.mxu3 %v7181_v27  ;;  %v4123_v36 = vadd.f32 %v10992_v53, %v11176_v63  ;;  %v7183_v63 = vld [vmem:[%s11650_s7 + $0x380] sm:$0xff] }
 0x738   :  { %5536 = vmatpush.bf16.msra.mxu1 %v7159_v17  ;;  %v7147_v17 = vld [vmem:[%s11650_s7 + $0x260] sm:$0xff] }
 0x739   :  { %v4172_v23 = vadd.f32 %v11233_v46, %v4123_v36 }
 0x73b   :  { %5466 = vmatpush.bf16.msrb.mxu2 %v7124_v61  ;;  %5557 = vmatpush.bf16.msrb.mxu3 %v7180_v45  ;;  %v4311_v34 = vpop.f32.mrf.mxu1  ;;  %v4221_v27 = vadd.f32 %v4220_v33, %v4172_v23  ;;  %v4223_v46 = vpop.f32.mrf.mxu2 }
 0x73c   :  { %5568 = vmatpush.bf16.msrb.mxu1 %v7190_v13  ;;  %v4312_v1 = vadd.f32 %v4311_v34, %v4263_v29  ;;  %v4224_v9 = vadd.f32 %v4223_v46, %v11250_v56  ;;  %v7145_v34 = vld [vmem:[%s11650_s7 + $0x250] sm:$0xff] }
 0x73d   :  { %v4270_v61 = vadd.f32 %v4269_v44, %v4221_v27  ;;  %v7193_v44 = vld [vmem:[%s11650_s7 + $0x3d0] sm:$0xff] }
 0x73e   :  { %v4336_v19 = vmax.f32 %v4312_v1, 0.0 }
 0x73f   :  { %5467 = vmatpush.bf16.msrb.mxu2 %v7123_v62  ;;  %5558 = vmatpush.bf16.msrb.mxu3 %v7179_v57  ;;  %v4272_v57 = vpop.f32.mrf.mxu3 }
 0x740   :  { %5569 = vmatpush.bf16.msrb.mxu1 %v7189_v48  ;;  %v4352_v4 = vpack.c.bf16 %v4336_v19, %v4336_v19  ;;  %v4162_v48 = vadd.f32 %v11119_v11, %v4113_v37  ;;  %v4273_v29 = vadd.f32 %v4272_v57, %v4224_v9 }
 0x742   :  { %5524 = vmatmul.bf16.vlgmr.msra.gmra.mxu3 %v4352_v4  ;;  %v4211_v32 = vadd.f32 %v11428_v41, %v4162_v48 }
 0x743   :  { %5468 = vmatpush.bf16.msrb.mxu2 %v7122_v51  ;;  %5559 = vmatpush.bf16.msrb.mxu3 %v7178_v8  ;;  %v4313_v14 = vpop.f32.mrf.mxu1  ;;  %v4225_v19 = vpop.f32.mrf.mxu2 }
 0x744   :  { %5570 = vmatpush.bf16.msrb.mxu1 %v7188_v22  ;;  %v4314_v54 = vadd.f32 %v4313_v14, %v4265_v12  ;;  %v7143_v22 = vld [vmem:[%s11650_s7 + $0x240] sm:$0xff]  ;;  %v7168_v12 = vld [vmem:[%s11650_s7 + $0x308] sm:$0xff] }
 0x746   :  { %v4337_v3 = vmax.f32 %v4314_v54, 0.0  ;;  %v7167_v54 = vld [vmem:[%s11650_s7 + $0x300] sm:$0xff] }
 0x747   :  { %5469 = vmatpush.bf16.msrb.mxu2 %v7121_v43  ;;  %5560 = vmatpush.bf16.msrb.mxu3 %v7177_v6  ;;  %v4260_v43 = vadd.f32 %v11433_v60, %v4211_v32  ;;  %v7174_v60 = vld [vmem:[%s11650_s7 + $0x338] sm:$0xff]  ;;  %v7169_v6 = vld [vmem:[%s11650_s7 + $0x310] sm:$0xff] }
 0x748   :  { %5571 = vmatpush.bf16.msrb.mxu1 %v7187_v16  ;;  %v4353_v52 = vpack.c.bf16 %v4337_v3, %v4337_v3 }
 0x749   :  { %v4309_v11 = vadd.f32 %v11470_v7, %v4260_v43  ;;  %v7172_v7 = vld [vmem:[%s11650_s7 + $0x328] sm:$0xff] }
 0x74a   :  { %5537 = vmatmul.bf16.vlgmr.msra.gmra.mxu1 %v4353_v52  ;;  %v7195_v52 = vld [vmem:[%s11650_s7 + $0x3e0] sm:$0xff] }
 0x74b   :  { %5470 = vmatpush.bf16.msrb.mxu2 %v7120_v26  ;;  %5561 = vmatpush.bf16.msrb.mxu3 %v7176_v5  ;;  %v11544_v21 = vpop.f32.mrf.mxu1  ;;  %v4335_v41 = vmax.f32 %v4309_v11, 0.0  ;;  %v4219_v26 = vadd.f32 %v11518_v30, %v11188_v59  ;;  %v7831_v59 = vld [vmem:[%s11651_s8] ss:$0 sm:$0xff]  ;;  %v7198_v30 = vld [vmem:[%s11650_s7 + $0x3f8] sm:$0xff] }
 0x74c   :  { %5572 = vmatpush.bf16.msrb.mxu1 %v7186_v39  ;;  %v7197_v39 = vld [vmem:[%s11650_s7 + $0x3f0] sm:$0xff] }
 0x74d   :  { %v4351_v47 = vpack.c.bf16 %v4335_v41, %v4335_v41  ;;  %v4268_v16 = vadd.f32 %v11521_v55, %v4219_v26 }
 0x74f   :  { %5471 = vmatpush.bf16.msrb.mxu2 %v7119_v0  ;;  %5562 = vmatpush.bf16.msrb.mxu3 %v7175_v20  ;;  %v4317_v24 = vadd.f32 %v11544_v21, %v4268_v16  ;;  %v4274_v20 = vpop.f32.mrf.mxu3  ;;  %v7839_v21 = vld [vmem:[%s11649_s6] ss:$0 sm:$0xff] }
 0x750   :  { %5573 = vmatpush.bf16.msrb.mxu1 %v7185_v10  ;;  %v4128_v36 = vadd.f32 %v7839_v21, %v11198_v58  ;;  %v7191_v58 = vld [vmem:[%s11650_s7 + $0x3c0] sm:$0xff] }
 0x751   :  { %v4338_v5 = vmax.f32 %v4317_v24, 0.0 }
 0x752   :  { %5472 = vmatmul.bf16.vlgmr.msrb.gmra.mxu2 %v4348_v2  ;;  %v4177_v33 = vadd.f32 %v11271_v28, %v4128_v36 }
 0x753   :  { %5503 = vmatpush.bf16.msra.mxu2 %v7150_v18  ;;  %v4318_v45 = vpop.f32.mrf.mxu1  ;;  %v4354_v55 = vpack.c.bf16 %v4338_v5, %v4338_v5  ;;  %v7196_v18 = vld [vmem:[%s11650_s7 + $0x3e8] sm:$0xff] }
 0x754   :  { %5574 = vmatpush.bf16.msrb.mxu1 %v7184_v15  ;;  %v4319_v62 = vadd.f32 %v4318_v45, %v4270_v61  ;;  %v4226_v15 = vadd.f32 %v4225_v19, %v4177_v33 }
 0x756   :  { %v4339_v13 = vmax.f32 %v4319_v62, 0.0 }
 0x757   :  { %5504 = vmatpush.bf16.msra.mxu2 %v7149_v42  ;;  %v7194_v42 = vld [vmem:[%s11650_s7 + $0x3d8] sm:$0xff] }
 0x758   :  { %5575 = vmatpush.bf16.msrb.mxu1 %v7183_v63  ;;  %v4355_v51 = vpack.c.bf16 %v4339_v13, %v4339_v13  ;;  %v4275_v63 = vadd.f32 %v4274_v20, %v4226_v15 }
 0x75a   :  { %5563 = vmatmul.bf16.vlgmr.msrb.gmra.mxu3 %v4355_v51 }
 0x75b   :  { %5505 = vmatpush.bf16.msra.mxu2 %v7148_v50  ;;  %v4321_v1 = vpop.f32.mrf.mxu1 }
 0x75c   :  { %v4322_v8 = vadd.f32 %v4321_v1, %v4273_v29 }
 0x75e   :  { %v4340_v53 = vmax.f32 %v4322_v8, 0.0 }
 0x75f   :  { %5506 = vmatpush.bf16.msra.mxu2 %v7147_v17  ;;  %v7192_v17 = vld [vmem:[%s11650_s7 + $0x3c8] sm:$0xff] }
 0x760   :  { %v4356_v56 = vpack.c.bf16 %v4340_v53, %v4340_v53 }
 0x762   :  { %5576 = vmatmul.bf16.vlgmr.msrb.gmra.mxu1 %v4356_v56 }
 0x763   :  { %5507 = vmatpush.bf16.msra.mxu2 %v7146_v40  ;;  %v4323_v2 = vpop.f32.mrf.mxu1 }
 0x764   :  { %v4324_v45 = vadd.f32 %v4323_v2, %v4275_v63 }
 0x766   :  { %v4341_v28 = vmax.f32 %v4324_v45, 0.0 }
 0x767   :  { %5508 = vmatpush.bf16.msra.mxu2 %v7145_v34 }
 0x768   :  { %v4357_v40 = vpack.c.bf16 %v4341_v28, %v4341_v28 }
 0x76b   :  { %5509 = vmatpush.bf16.msra.mxu2 %v7144_v38 }
 0x76f   :  { %5510 = vmatpush.bf16.msra.mxu2 %v7143_v22 }
 0x772   :  { %5511 = vmatmul.bf16.vlgmr.msra.gmra.mxu2 %v4351_v47 }
 0x773   :  { %5542 = vmatpush.bf16.msrb.mxu2 %v7174_v60 }
 0x775   :  { %v5395_v4 = vpop.f32.mrf.mxu2 }
 0x776   :  { %v5396_v0 = vadd.f32 %v7831_v59, %v5395_v4 }
 0x777   :  { %5543 = vmatpush.bf16.msrb.mxu2 %v7173_v25 }
 0x77b   :  { %5544 = vmatpush.bf16.msrb.mxu2 %v7172_v7 }
 0x77d   :  { %v5397_v14 = vpop.f32.mrf.mxu2 }
 0x77f   :  { %5545 = vmatpush.bf16.msrb.mxu2 %v7171_v31 }
 0x783   :  { %5546 = vmatpush.bf16.msrb.mxu2 %v7170_v35 }
 0x785   :  { %v5408_v49 = vpop.f32.mrf.mxu2 }
 0x786   :  { %v5409_v3 = vadd.f32 %v5408_v49, %v5396_v0 }
 0x787   :  { %5547 = vmatpush.bf16.msrb.mxu2 %v7169_v6 }
 0x78b   :  { %5548 = vmatpush.bf16.msrb.mxu2 %v7168_v12 }
 0x78d   :  { %v5410_v10 = vpop.f32.mrf.mxu2 }
 0x78f   :  { %5549 = vmatpush.bf16.msrb.mxu2 %v7167_v54 }
 0x792   :  { %5550 = vmatmul.bf16.vlgmr.msrb.gmra.mxu2 %v4354_v55 }
 0x793   :  { %5581 = vmatpush.bf16.msra.mxu2 %v7198_v30 }
 0x795   :  { %v5421_v23 = vpop.f32.mrf.mxu2  ;;  %v5447_v50 = vpop.f32.mrf.mxu3 }
 0x796   :  { %v5422_v27 = vadd.f32 %v5421_v23, %v5409_v3 }
 0x797   :  { %5582 = vmatpush.bf16.msra.mxu2 %v7197_v39  ;;  %v5460_v61 = vpop.f32.mrf.mxu1 }
 0x79b   :  { %5583 = vmatpush.bf16.msra.mxu2 %v7196_v18 }
 0x79d   :  { %v5423_v62 = vpop.f32.mrf.mxu2  ;;  %v5449_v46 = vpop.f32.mrf.mxu3 }
 0x79f   :  { %5584 = vmatpush.bf16.msra.mxu2 %v7195_v52  ;;  %v5462_v13 = vpop.f32.mrf.mxu1 }
 0x7a3   :  { %5585 = vmatpush.bf16.msra.mxu2 %v7194_v42 }
 0x7a7   :  { %5586 = vmatpush.bf16.msra.mxu2 %v7193_v44 }
 0x7ab   :  { %5587 = vmatpush.bf16.msra.mxu2 %v7192_v17 }
 0x7ad   :  { %v5486_v37 = vpop.f32.mrf.mxu3 }
 0x7af   :  { %5588 = vmatpush.bf16.msra.mxu2 %v7191_v58  ;;  %v5499_v57 = vpop.f32.mrf.mxu1 }
 0x7b2   :  { %5589 = vmatmul.bf16.vlgmr.msra.gmra.mxu2 %v4357_v40 }
 0x7b5   :  { %v5434_v9 = vpop.f32.mrf.mxu2  ;;  %v5488_v29 = vpop.f32.mrf.mxu3 }
 0x7b6   :  { %v5435_v51 = vadd.f32 %v5434_v9, %v5422_v27 }
 0x7b7   :  { %v5501_v34 = vpop.f32.mrf.mxu1 }
 0x7b8   :  { %v5448_v48 = vadd.f32 %v5447_v50, %v5435_v51 }
 0x7ba   :  { %v5461_v32 = vadd.f32 %v5460_v61, %v5448_v48 }
 0x7bd   :  { %v5436_v1 = vpop.f32.mrf.mxu2 }
 0x7c5   :  { %v5525_v8 = vpop.f32.mrf.mxu3 }
 0x7c7   :  { %v5538_v43 = vpop.f32.mrf.mxu1 }
 0x7cd   :  { %v5527_v53 = vpop.f32.mrf.mxu3 }
 0x7cf   :  { %v5540_v11 = vpop.f32.mrf.mxu1 }
 0x7d5   :  { %v5473_v38 = vpop.f32.mrf.mxu2 }
 0x7d6   :  { %v5474_v56 = vadd.f32 %v5473_v38, %v5461_v32 }
 0x7d8   :  { %v5487_v22 = vadd.f32 %v5486_v37, %v5474_v56 }
 0x7da   :  { %v5500_v41 = vadd.f32 %v5499_v57, %v5487_v22 }
 0x7dd   :  { %v5475_v60 = vpop.f32.mrf.mxu2  ;;  %v5564_v47 = vpop.f32.mrf.mxu3 }
 0x7df   :  { %v5577_v25 = vpop.f32.mrf.mxu1 }
 0x7e5   :  { %v5566_v7 = vpop.f32.mrf.mxu3 }
 0x7e7   :  { %v5579_v19 = vpop.f32.mrf.mxu1 }
 0x7f5   :  { %v5512_v31 = vpop.f32.mrf.mxu2 }
 0x7f6   :  { %v5513_v35 = vadd.f32 %v5512_v31, %v5500_v41 }
 0x7f8   :  { %v5526_v4 = vadd.f32 %v5525_v8, %v5513_v35 }
 0x7fa   :  { %v5539_v6 = vadd.f32 %v5538_v43, %v5526_v4 }
 0x7fd   :  { %v5514_v26 = vpop.f32.mrf.mxu2 }
 0x815   :  { %v5551_v16 = vpop.f32.mrf.mxu2 }
 0x816   :  { %v5552_v12 = vadd.f32 %v5551_v16, %v5539_v6 }
 0x818   :  { %v5565_v24 = vadd.f32 %v5564_v47, %v5552_v12 }
 0x81a   :  { %v5578_v14 = vadd.f32 %v5577_v25, %v5565_v24 }
 0x81d   :  { %v5553_v54 = vpop.f32.mrf.mxu2 }
 0x835   :  { %v5590_v5 = vpop.f32.mrf.mxu2 }
 0x836   :  { %v5591_v59 = vadd.f32 %v5590_v5, %v5578_v14 }
 0x838   :  { %5594 = vst [vmem:[%s11652_s9] sm:$0xff] %v5591_v59 }
 0x83d   :  { %v5592_v30 = vpop.f32.mrf.mxu2 }

</bundles_post_ra>
